<compile_context>
chip_gen: v6e
topology: v6e:2x2x1
jax: 0.10.0
libtpu: 0.0.40
codegen_flags: <defaults>
</compile_context>

<pallas_src>
import functools

import jax
import jax.numpy as jnp
from jax import lax
from jax.experimental import pallas as pl
from jax.experimental.pallas import tpu as pltpu


_VMEM = pl.BlockSpec(memory_space=pltpu.MemorySpace.VMEM)
_ROW_PAD = 16   # every slab segment starts on a 16-row (bf16 sublane-tile) boundary


# ----------------------------------------------------------------------------
# Fused decoder kernel (built per static config; slab offsets are static ints)
# ----------------------------------------------------------------------------
def _build_decoder_kernel(*, T, L, F, H, n_layer, n_iter, offsets):
    TL = T * L
    H2, H4, H6 = 2 * H, 4 * H, 6 * H

    def kernel(rec_ref, p_ref, pinv_ref, slab_ref, out_ref):
        f32 = jnp.float32
        bf16 = jnp.bfloat16

        def seg(tag, rows, cols):
            o = offsets[tag]
            return slab_ref[o:o + rows, 0:cols]            # static slice of the slab

        def fdot(x, w):                                     # bf16 MXU, f32 accumulate
            return jnp.dot(x.astype(bf16), w, preferred_element_type=f32)

        # fused gate-column layout: [r_f, r_b, z_f, z_b, n_f, n_b] (each width H)
        li = lax.broadcasted_iota(jnp.int32, (1, H6), 1)
        fwd_mask = (li < H)
        for g in (1, 2):
            fwd_mask = fwd_mask | ((li >= 2 * g * H) & (li < (2 * g + 1) * H))

        def bigru_layer(gi, whh, bhn_row):
            # gi: (T*L, 6H) time-major gate pre-activations (fwd+bwd columns).
            # At loop step s the fwd half uses time s, the bwd half time T-1-s;
            # the per-step blocks are assembled OFF the critical path.
            gi_step = [jnp.where(fwd_mask,
                                 gi[s * L:(s + 1) * L, :],
                                 gi[(T - 1 - s) * L:(T - s) * L, :])
                       for s in range(T)]
            bhn_b = jnp.broadcast_to(bhn_row.astype(f32), (L, H2))   # hoisted
            h = jnp.zeros((L, H2), f32)                     # [h_f | h_b]
            out_f = [None] * T
            out_b = [None] * T
            # Statically unrolled recurrence (T == bs is tiny); ONE block-diag
            # matmul per step drives both directions.  For much larger T /
            # n_iter this would switch to lax.fori_loop over a stacked slab.
            for s in range(T):
                gh = fdot(h, whh)                           # (L, 6H)
                g = gi_step[s]
                rz = jax.nn.sigmoid(g[:, :H4] + gh[:, :H4])          # r_f,r_b,z_f,z_b
                n = jnp.tanh(g[:, H4:] + rz[:, :H2] * (gh[:, H4:] + bhn_b))
                h = n + rz[:, H2:] * (h - n)                # (1-z)*n + z*h
                out_f[s] = h[:, :H]
                out_b[T - 1 - s] = h[:, H:]
            return (jnp.concatenate(out_f, axis=0),         # (T*L, H), time order
                    jnp.concatenate(out_b, axis=0))

        def gru_stack(a, b, c, idx, rnn):
            xf = xb = None
            for l in range(n_layer):
                base = (idx, rnn, l)
                whh = seg(base + ("whh",), H2, H6)           # block-diag (2H, 6H)
                bih = seg(base + ("bih",), 1, H6).astype(f32)
                bhn = seg(base + ("bhn",), 1, H2)
                if l == 0:
                    # input = [a | b | prior]: concat avoided via split weights
                    wih = seg(base + ("wih",), 2 + F, H6)
                    gi = (a * wih[0:1, :].astype(f32)
                          + b * wih[1:2, :].astype(f32)
                          + fdot(c, wih[2:2 + F, :]) + bih)
                else:
                    # input = [fwd | bwd]: split weight rows instead of concat
                    wih = seg(base + ("wih",), H2, H6)
                    gi = fdot(xf, wih[0:H, :]) + fdot(xb, wih[H:H2, :]) + bih
                xf, xb = bigru_layer(gi, whh, bhn)
            return xf, xb

        def linear(xf, xb, idx, lin, dout):
            w = seg((idx, lin, "w"), H2, dout)
            bb = seg((idx, lin, "b"), 1, dout).astype(f32)
            return fdot(xf, w[0:H, :]) + fdot(xb, w[H:H2, :]) + bb

        pmat = p_ref[...]                                   # (T*L, T*L) f32, exact
        pinv = pinv_ref[...]

        def interleave(x):
            return jnp.dot(pmat, x, preferred_element_type=f32)

        def deinterleave(x):
            return jnp.dot(pinv, x, preferred_element_type=f32)

        rec = rec_ref[...]                                  # (T*L, 2) f32
        r_sys = rec[:, 0:1]
        r_par = rec[:, 1:2]
        r_par_deint = deinterleave(r_par)
        r_sys_int = interleave(r_sys)
        prior = jnp.zeros((TL, F), f32)

        for idx in range(n_iter):
            xf, xb = gru_stack(r_sys, r_par_deint, prior, idx, "rnn1")
            x_plr = linear(xf, xb, idx, "lin1", F)
            x_plr_ex_int = interleave(x_plr - prior)
            xf, xb = gru_stack(r_sys_int, r_par, x_plr_ex_int, idx, "rnn2")
            if idx < n_iter - 1:
                x_plr = linear(xf, xb, idx, "lin2", F)
                prior = deinterleave(x_plr - x_plr_ex_int)
            else:
                x_plr = linear(xf, xb, idx, "lin2", 1)
                out_ref[...] = jax.nn.sigmoid(deinterleave(x_plr))   # single store

    return kernel


# ----------------------------------------------------------------------------
# Wrapper: one pallas_call, 4 input DMAs total
# ----------------------------------------------------------------------------
def dec_forward(received, slab, p_block, pinv_block, *, cfg, offsets):
    L = cfg["block_len"]
    F = cfg["num_iter_ft"]
    H = cfg["dec_num_unit"]
    n_layer = cfg["dec_num_layer"]
    n_iter = cfg["num_iteration"]
    bs = received.shape[0]

    rec = received.astype(jnp.float32).reshape(bs * L, 2)   # (T*L, 2), time-major
    kernel = _build_decoder_kernel(T=bs, L=L, F=F, H=H, n_layer=n_layer,
                                   n_iter=n_iter, offsets=offsets)
    out = pl.pallas_call(
        kernel,
        out_shape=jax.ShapeDtypeStruct((bs * L, 1), jnp.float32),
        in_specs=[_VMEM] * 4,
        out_specs=_VMEM,
    )(rec, p_block, pinv_block, slab)
    return out.reshape(bs, L)


# ----------------------------------------------------------------------------
# Parameters: PyTorch-shaped init + one-time host-side packing into ONE slab
# ----------------------------------------------------------------------------
def init_params(key, cfg):
    """Random parameters with the same shapes / init ranges as the PyTorch module."""
    H = cfg["dec_num_unit"]
    F = cfg["num_iter_ft"]
    input_dim = 2 + F
    n_layer = cfg["dec_num_layer"]
    n_iter = cfg["num_iteration"]
    keys = iter(jax.random.split(key, 4096))

    def u(shape, scale):
        return jax.random.uniform(next(keys), shape, jnp.float32, -scale, scale)

    k_gru = 1.0 / float(H) ** 0.5

    def make_gru():
        layers = []
        for l in range(n_layer):
            in_l = input_dim if l == 0 else 2 * H
            layer = {}
            for d in ("fwd", "bwd"):
                layer[d] = (
                    u((3 * H, in_l), k_gru),   # weight_ih
                    u((3 * H, H), k_gru),      # weight_hh
                    u((3 * H,), k_gru),        # bias_ih
                    u((3 * H,), k_gru),        # bias_hh
                )
            layers.append(layer)
        return layers

    params = {"rnn1": [], "rnn2": [], "lin1": [], "lin2": []}
    out_dim = 2 * H
    k_lin = 1.0 / float(out_dim) ** 0.5
    for idx in range(n_iter):
        params["rnn1"].append(make_gru())
        params["rnn2"].append(make_gru())
        params["lin1"].append((u((F, out_dim), k_lin), u((F,), k_lin)))
        osz = 1 if idx == n_iter - 1 else F
        params["lin2"].append((u((osz, out_dim), k_lin), u((osz,), k_lin)))
    return params


def prepare_params(params, cfg):
    """Pack every weight / bias into a single lane-aligned bf16 slab (width 6H).

    Gate columns are pre-scattered into the fused layout [r_f,r_b,z_f,z_b,n_f,n_b],
    W_hh of both directions is pre-packed block-diagonally, and the hidden r/z
    biases are folded into the input bias.  Returns (slab, static row offsets).
    """
    H = cfg["dec_num_unit"]
    F = cfg["num_iter_ft"]
    n_layer = cfg["dec_num_layer"]
    n_iter = cfg["num_iteration"]
    W = 6 * H

    segs = []
    offsets = {}
    cur = 0

    def add(tag, mat):
        nonlocal cur
        mat = jnp.asarray(mat, jnp.float32)
        r, c = mat.shape
        rp = ((r + _ROW_PAD - 1) // _ROW_PAD) * _ROW_PAD
        buf = jnp.zeros((rp, W), jnp.float32).at[:r, :c].set(mat)
        segs.append(buf)
        offsets[tag] = cur
        cur += rp

    def scatter_cols(mf, mb):
        # per-direction (rows, 3H) gate blocks -> fused (rows, 6H) layout
        out = jnp.zeros((mf.shape[0], W), jnp.float32)
        for g in range(3):
            out = out.at[:, (2 * g) * H:(2 * g + 1) * H].set(mf[:, g * H:(g + 1) * H])
            out = out.at[:, (2 * g + 1) * H:(2 * g + 2) * H].set(mb[:, g * H:(g + 1) * H])
        return out

    def pack_gru_layer(base, layer):
        wih_f, whh_f, bih_f, bhh_f = layer["fwd"]
        wih_b, whh_b, bih_b, bhh_b = layer["bwd"]
        add(base + ("wih",), scatter_cols(wih_f.T, wih_b.T))            # (C, 6H)
        zpad = jnp.zeros((H,), jnp.float32)
        bf = bih_f + jnp.concatenate([bhh_f[:2 * H], zpad])             # fold b_hh r,z
        bb = bih_b + jnp.concatenate([bhh_b[:2 * H], zpad])
        add(base + ("bih",), scatter_cols(bf[None, :], bb[None, :]))    # (1, 6H)
        whh = jnp.zeros((2 * H, W), jnp.float32)
        whh_fT, whh_bT = whh_f.T, whh_b.T
        for g in range(3):
            whh = whh.at[:H, (2 * g) * H:(2 * g + 1) * H].set(whh_fT[:, g * H:(g + 1) * H])
            whh = whh.at[H:, (2 * g + 1) * H:(2 * g + 2) * H].set(whh_bT[:, g * H:(g + 1) * H])
        add(base + ("whh",), whh)                                       # block-diag (2H, 6H)
        add(base + ("bhn",),
            jnp.concatenate([bhh_f[2 * H:], bhh_b[2 * H:]])[None, :])   # (1, 2H)

    for idx in range(n_iter):
        for rnn in ("rnn1", "rnn2"):
            for l in range(n_layer):
                pack_gru_layer((idx, rnn, l), params[rnn][idx][l])
        for lin in ("lin1", "lin2"):
            w, b = params[lin][idx]
            add((idx, lin, "w"), w.T)             # (2H, Dout)
            add((idx, lin, "b"), b[None, :])      # (1, Dout)

    slab = jnp.concatenate(segs, axis=0).astype(jnp.bfloat16)
    return slab, offsets


# ----------------------------------------------------------------------------
# Pure-JAX reference (mirrors the PyTorch module) for a correctness cross-check
# ----------------------------------------------------------------------------
def _ref_gru_direction(x, w_ih, w_hh, b_ih, b_hh, reverse):
    hp = jax.lax.Precision.HIGHEST
    T = x.shape[0]
    Hh = w_hh.shape[1]
    h = jnp.zeros((x.shape[1], Hh), jnp.float32)
    outs = [None] * T
    order = range(T - 1, -1, -1) if reverse else range(T)
    for t in order:
        gi = jnp.dot(x[t], w_ih.T, precision=hp) + b_ih
        gh = jnp.dot(h, w_hh.T, precision=hp) + b_hh
        r = jax.nn.sigmoid(gi[:, :Hh] + gh[:, :Hh])
        z = jax.nn.sigmoid(gi[:, Hh:2 * Hh] + gh[:, Hh:2 * Hh])
        n = jnp.tanh(gi[:, 2 * Hh:] + r * gh[:, 2 * Hh:])
        h = (1.0 - z) * n + z * h
        outs[t] = h
    return jnp.stack(outs, axis=0)


def _ref_gru_stack(x, layers):
    out = x
    for layer in layers:
        f = _ref_gru_direction(out, *layer["fwd"], reverse=False)
        b = _ref_gru_direction(out, *layer["bwd"], reverse=True)
        out = jnp.concatenate([f, b], axis=-1)
    return out


def reference_forward(received, params, perm, inv_perm, cfg):
    hp = jax.lax.Precision.HIGHEST
    bs = received.shape[0]
    L, F, n_iter = cfg["block_len"], cfg["num_iter_ft"], cfg["num_iteration"]
    rec = received.reshape(bs, -1, 2).astype(jnp.float32)
    r_sys = rec[:, :, 0:1]
    r_par = rec[:, :, 1:2]
    r_par_deint = r_par[:, inv_perm, :]
    r_sys_int = r_sys[:, perm, :]
    prior = jnp.zeros((bs, L, F), jnp.float32)

    def lin(x, w, b):
        return jnp.dot(x, w.T, precision=hp) + b

    final = None
    for idx in range(n_iter):
        x_in = jnp.concatenate([r_sys, r_par_deint, prior], axis=2)
        x_dec = _ref_gru_stack(x_in, params["rnn1"][idx])
        x_plr = lin(x_dec, *params["lin1"][idx])
        x_plr_ex = x_plr - prior
        x_plr_ex_int = x_plr_ex[:, perm, :]
        x_in = jnp.concatenate([r_sys_int, r_par, x_plr_ex_int], axis=2)
        x_dec = _ref_gru_stack(x_in, params["rnn2"][idx])
        x_plr = lin(x_dec, *params["lin2"][idx])
        if idx < n_iter - 1:
            x_plr_ex = x_plr - x_plr_ex_int
            prior = x_plr_ex[:, inv_perm, :]
        else:
            final = jax.nn.sigmoid(x_plr[:, inv_perm, :])
    return jnp.squeeze(final, axis=-1)


# ----------------------------------------------------------------------------
# Main
# ----------------------------------------------------------------------------
if __name__ == "__main__":
    cfg = dict(
        block_len=16,
        num_iter_ft=4,
        num_iteration=2,
        dec_num_unit=32,
        dec_num_layer=2,
    )
    bs = 2

    root = jax.random.PRNGKey(0)
    k_in, k_param, k_perm = jax.random.split(root, 3)

    # deterministic interleaver permutation + exact one-hot matrices; the
    # kernel uses block-diagonal (T*L, T*L) versions covering all codewords.
    perm = jax.random.permutation(k_perm, cfg["block_len"])
    inv_perm = jnp.argsort(perm)
    p_mat = jax.nn.one_hot(perm, cfg["block_len"], dtype=jnp.float32)
    pinv_mat = jax.nn.one_hot(inv_perm, cfg["block_len"], dtype=jnp.float32)
    eye_t = jnp.eye(bs, dtype=jnp.float32)
    p_block = jnp.kron(eye_t, p_mat)
    pinv_block = jnp.kron(eye_t, pinv_mat)

    params = init_params(k_param, cfg)
    slab, offsets = prepare_params(params, cfg)     # one-time host packing

    # received: (bs, block_len, 2) -> module views it as (bs, -1, 2)
    received = jax.random.normal(k_in, (bs, cfg["block_len"], 2), jnp.float32)

    fwd = jax.jit(functools.partial(dec_forward, cfg=cfg, offsets=offsets))
    out = jax.block_until_ready(fwd(received, slab, p_block, pinv_block))

    assert out.shape == (bs, cfg["block_len"])
    assert bool(jnp.all(jnp.isfinite(out)))
    assert bool(jnp.all((out >= 0.0) & (out <= 1.0)))

    # cross-check against the pure-JAX (f32 HIGHEST) reference; bf16 MXU
    # operands leave a few-1e-3 quantization noise after the final sigmoid.
    ref = reference_forward(received, params, perm, inv_perm, cfg)
    max_err = float(jnp.max(jnp.abs(out - ref)))
    assert max_err < 2e-2, f"kernel/reference mismatch: max_err={max_err}"

    print("KERNEL_OK")
</pallas_src>

<mosaic_0001>
module attributes {stable_mosaic.version = 11 : i64} {
  func.func @kernel(%arg0: memref<32x2xf32, #tpu.memory_space<vmem>>, %arg1: memref<32x32xf32, #tpu.memory_space<vmem>>, %arg2: memref<32x32xf32, #tpu.memory_space<vmem>>, %arg3: memref<1408x192xbf16, #tpu.memory_space<vmem>>, %arg4: memref<32x1xf32, #tpu.memory_space<vmem>>) attributes {dimension_semantics = [], scalar_prefetch = 0 : i64, scratch_operands = 0 : i64, tpu.core_type = #tpu.core_type<tc>} {
    %0 = tpu.iota {dimensions = array<i32: 1>} : vector<1x192xi32>
    %c32_i32 = arith.constant 32 : i32
    %1 = vector.broadcast %c32_i32 : i32 to vector<1x192xi32>
    %2 = arith.cmpi slt, %0, %1 : vector<1x192xi32>
    %c64_i32 = arith.constant 64 : i32
    %3 = vector.broadcast %c64_i32 : i32 to vector<1x192xi32>
    %4 = arith.cmpi sge, %0, %3 : vector<1x192xi32>
    %c96_i32 = arith.constant 96 : i32
    %5 = vector.broadcast %c96_i32 : i32 to vector<1x192xi32>
    %6 = arith.cmpi slt, %0, %5 : vector<1x192xi32>
    %7 = arith.andi %4, %6 : vector<1x192xi1>
    %8 = arith.ori %2, %7 : vector<1x192xi1>
    %c128_i32 = arith.constant 128 : i32
    %9 = vector.broadcast %c128_i32 : i32 to vector<1x192xi32>
    %10 = arith.cmpi sge, %0, %9 : vector<1x192xi32>
    %c160_i32 = arith.constant 160 : i32
    %11 = vector.broadcast %c160_i32 : i32 to vector<1x192xi32>
    %12 = arith.cmpi slt, %0, %11 : vector<1x192xi32>
    %13 = arith.andi %10, %12 : vector<1x192xi1>
    %14 = arith.ori %8, %13 : vector<1x192xi1>
    %c0 = arith.constant 0 : index
    %c0_0 = arith.constant 0 : index
    %15 = vector.load %arg1[%c0, %c0_0] : memref<32x32xf32, #tpu.memory_space<vmem>>, vector<32x32xf32>
    %c0_1 = arith.constant 0 : index
    %c0_2 = arith.constant 0 : index
    %16 = vector.load %arg2[%c0_1, %c0_2] : memref<32x32xf32, #tpu.memory_space<vmem>>, vector<32x32xf32>
    %c0_3 = arith.constant 0 : index
    %c0_4 = arith.constant 0 : index
    %17 = vector.load %arg0[%c0_3, %c0_4] : memref<32x2xf32, #tpu.memory_space<vmem>>, vector<32x2xf32>
    %18 = vector.extract_strided_slice %17 {offsets = [0, 0], sizes = [32, 1], strides = [1, 1]} : vector<32x2xf32> to vector<32x1xf32>
    %19 = vector.extract_strided_slice %17 {offsets = [0, 1], sizes = [32, 1], strides = [1, 1]} : vector<32x2xf32> to vector<32x1xf32>
    %cst = arith.constant dense<0.000000e+00> : vector<32x1xf32>
    %20 = tpu.matmul %16, %19, %cst {dimension_numbers = #tpu.dot_dimension_numbers<[1], [0], [0], [1], [0, 0, 1, 1], [], []>} : vector<32x32xf32>, vector<32x1xf32>, vector<32x1xf32> -> vector<32x1xf32>
    %cst_5 = arith.constant dense<0.000000e+00> : vector<32x1xf32>
    %21 = tpu.matmul %15, %18, %cst_5 {dimension_numbers = #tpu.dot_dimension_numbers<[1], [0], [0], [1], [0, 0, 1, 1], [], []>} : vector<32x32xf32>, vector<32x1xf32>, vector<32x1xf32> -> vector<32x1xf32>
    %cst_6 = arith.constant 0.000000e+00 : f32
    %22 = vector.broadcast %cst_6 : f32 to vector<32x4xf32>
    %c32 = arith.constant 32 : index
    %c0_7 = arith.constant 0 : index
    %23 = vector.load %arg3[%c32, %c0_7] : memref<1408x192xbf16, #tpu.memory_space<vmem>>, vector<64x192xbf16>
    %c16 = arith.constant 16 : index
    %c0_8 = arith.constant 0 : index
    %24 = vector.load %arg3[%c16, %c0_8] : memref<1408x192xbf16, #tpu.memory_space<vmem>>, vector<1x192xbf16>
    %25 = arith.extf %24 : vector<1x192xbf16> to vector<1x192xf32>
    %c96 = arith.constant 96 : index
    %c0_9 = arith.constant 0 : index
    %26 = vector.load %arg3[%c96, %c0_9] : memref<1408x192xbf16, #tpu.memory_space<vmem>>, vector<1x64xbf16>
    %c0_10 = arith.constant 0 : index
    %c0_11 = arith.constant 0 : index
    %27 = vector.load %arg3[%c0_10, %c0_11] : memref<1408x192xbf16, #tpu.memory_space<vmem>>, vector<6x192xbf16>
    %28 = vector.extract_strided_slice %27 {offsets = [0, 0], sizes = [1, 192], strides = [1, 1]} : vector<6x192xbf16> to vector<1x192xbf16>
    %29 = arith.extf %28 : vector<1x192xbf16> to vector<1x192xf32>
    %30 = vector.broadcast %18 : vector<32x1xf32> to vector<32x192xf32>
    %31 = vector.broadcast %29 : vector<1x192xf32> to vector<32x192xf32>
    %32 = arith.mulf %30, %31 : vector<32x192xf32>
    %33 = vector.extract_strided_slice %27 {offsets = [1, 0], sizes = [1, 192], strides = [1, 1]} : vector<6x192xbf16> to vector<1x192xbf16>
    %34 = arith.extf %33 : vector<1x192xbf16> to vector<1x192xf32>
    %35 = vector.broadcast %20 : vector<32x1xf32> to vector<32x192xf32>
    %36 = vector.broadcast %34 : vector<1x192xf32> to vector<32x192xf32>
    %37 = arith.mulf %35, %36 : vector<32x192xf32>
    %38 = arith.addf %32, %37 : vector<32x192xf32>
    %39 = vector.extract_strided_slice %27 {offsets = [2, 0], sizes = [4, 192], strides = [1, 1]} : vector<6x192xbf16> to vector<4x192xbf16>
    %40 = arith.truncf %22 : vector<32x4xf32> to vector<32x4xbf16>
    %cst_12 = arith.constant dense<0.000000e+00> : vector<32x192xf32>
    %41 = tpu.matmul %40, %39, %cst_12 {dimension_numbers = #tpu.dot_dimension_numbers<[1], [0], [0], [1], [0, 0, 1, 1], [], []>} : vector<32x4xbf16>, vector<4x192xbf16>, vector<32x192xf32> -> vector<32x192xf32>
    %42 = arith.addf %38, %41 : vector<32x192xf32>
    %43 = vector.broadcast %25 : vector<1x192xf32> to vector<32x192xf32>
    %44 = arith.addf %42, %43 : vector<32x192xf32>
    %45 = vector.extract_strided_slice %44 {offsets = [0, 0], sizes = [16, 192], strides = [1, 1]} : vector<32x192xf32> to vector<16x192xf32>
    %46 = vector.extract_strided_slice %44 {offsets = [16, 0], sizes = [16, 192], strides = [1, 1]} : vector<32x192xf32> to vector<16x192xf32>
    %47 = vector.shape_cast %14 : vector<1x192xi1> to vector<1x192xi1>
    %48 = vector.broadcast %47 : vector<1x192xi1> to vector<16x192xi1>
    %49 = arith.select %48, %45, %46 : vector<16x192xi1>, vector<16x192xf32>
    %50 = vector.extract_strided_slice %44 {offsets = [16, 0], sizes = [16, 192], strides = [1, 1]} : vector<32x192xf32> to vector<16x192xf32>
    %51 = vector.extract_strided_slice %44 {offsets = [0, 0], sizes = [16, 192], strides = [1, 1]} : vector<32x192xf32> to vector<16x192xf32>
    %52 = vector.shape_cast %14 : vector<1x192xi1> to vector<1x192xi1>
    %53 = vector.broadcast %52 : vector<1x192xi1> to vector<16x192xi1>
    %54 = arith.select %53, %50, %51 : vector<16x192xi1>, vector<16x192xf32>
    %55 = arith.extf %26 : vector<1x64xbf16> to vector<1x64xf32>
    %56 = vector.shape_cast %55 : vector<1x64xf32> to vector<1x64xf32>
    %57 = vector.broadcast %56 : vector<1x64xf32> to vector<16x64xf32>
    %cst_13 = arith.constant 0.000000e+00 : f32
    %58 = vector.broadcast %cst_13 : f32 to vector<16x64xf32>
    %59 = arith.truncf %58 : vector<16x64xf32> to vector<16x64xbf16>
    %cst_14 = arith.constant dense<0.000000e+00> : vector<16x192xf32>
    %60 = tpu.matmul %59, %23, %cst_14 {dimension_numbers = #tpu.dot_dimension_numbers<[1], [0], [0], [1], [0, 0, 1, 1], [], []>} : vector<16x64xbf16>, vector<64x192xbf16>, vector<16x192xf32> -> vector<16x192xf32>
    %61 = vector.extract_strided_slice %49 {offsets = [0, 0], sizes = [16, 128], strides = [1, 1]} : vector<16x192xf32> to vector<16x128xf32>
    %62 = vector.extract_strided_slice %60 {offsets = [0, 0], sizes = [16, 128], strides = [1, 1]} : vector<16x192xf32> to vector<16x128xf32>
    %63 = arith.addf %61, %62 : vector<16x128xf32>
    %64 = arith.negf %63 : vector<16x128xf32>
    %65 = math.exp %64 : vector<16x128xf32>
    %cst_15 = arith.constant 1.000000e+00 : f32
    %66 = vector.broadcast %cst_15 : f32 to vector<16x128xf32>
    %67 = arith.addf %66, %65 : vector<16x128xf32>
    %68 = arith.divf %66, %67 : vector<16x128xf32>
    %69 = vector.extract_strided_slice %49 {offsets = [0, 128], sizes = [16, 64], strides = [1, 1]} : vector<16x192xf32> to vector<16x64xf32>
    %70 = vector.extract_strided_slice %68 {offsets = [0, 0], sizes = [16, 64], strides = [1, 1]} : vector<16x128xf32> to vector<16x64xf32>
    %71 = vector.extract_strided_slice %60 {offsets = [0, 128], sizes = [16, 64], strides = [1, 1]} : vector<16x192xf32> to vector<16x64xf32>
    %72 = arith.addf %71, %57 : vector<16x64xf32>
    %73 = arith.mulf %70, %72 : vector<16x64xf32>
    %74 = arith.addf %69, %73 : vector<16x64xf32>
    %75 = math.tanh %74 : vector<16x64xf32>
    %76 = vector.extract_strided_slice %68 {offsets = [0, 64], sizes = [16, 64], strides = [1, 1]} : vector<16x128xf32> to vector<16x64xf32>
    %77 = arith.subf %58, %75 : vector<16x64xf32>
    %78 = arith.mulf %76, %77 : vector<16x64xf32>
    %79 = arith.addf %75, %78 : vector<16x64xf32>
    %80 = vector.extract_strided_slice %79 {offsets = [0, 0], sizes = [16, 32], strides = [1, 1]} : vector<16x64xf32> to vector<16x32xf32>
    %81 = vector.extract_strided_slice %79 {offsets = [0, 32], sizes = [16, 32], strides = [1, 1]} : vector<16x64xf32> to vector<16x32xf32>
    %82 = arith.truncf %79 : vector<16x64xf32> to vector<16x64xbf16>
    %cst_16 = arith.constant dense<0.000000e+00> : vector<16x192xf32>
    %83 = tpu.matmul %82, %23, %cst_16 {dimension_numbers = #tpu.dot_dimension_numbers<[1], [0], [0], [1], [0, 0, 1, 1], [], []>} : vector<16x64xbf16>, vector<64x192xbf16>, vector<16x192xf32> -> vector<16x192xf32>
    %84 = vector.extract_strided_slice %54 {offsets = [0, 0], sizes = [16, 128], strides = [1, 1]} : vector<16x192xf32> to vector<16x128xf32>
    %85 = vector.extract_strided_slice %83 {offsets = [0, 0], sizes = [16, 128], strides = [1, 1]} : vector<16x192xf32> to vector<16x128xf32>
    %86 = arith.addf %84, %85 : vector<16x128xf32>
    %87 = arith.negf %86 : vector<16x128xf32>
    %88 = math.exp %87 : vector<16x128xf32>
    %cst_17 = arith.constant 1.000000e+00 : f32
    %89 = vector.broadcast %cst_17 : f32 to vector<16x128xf32>
    %90 = arith.addf %89, %88 : vector<16x128xf32>
    %91 = arith.divf %89, %90 : vector<16x128xf32>
    %92 = vector.extract_strided_slice %54 {offsets = [0, 128], sizes = [16, 64], strides = [1, 1]} : vector<16x192xf32> to vector<16x64xf32>
    %93 = vector.extract_strided_slice %91 {offsets = [0, 0], sizes = [16, 64], strides = [1, 1]} : vector<16x128xf32> to vector<16x64xf32>
    %94 = vector.extract_strided_slice %83 {offsets = [0, 128], sizes = [16, 64], strides = [1, 1]} : vector<16x192xf32> to vector<16x64xf32>
    %95 = arith.addf %94, %57 : vector<16x64xf32>
    %96 = arith.mulf %93, %95 : vector<16x64xf32>
    %97 = arith.addf %92, %96 : vector<16x64xf32>
    %98 = math.tanh %97 : vector<16x64xf32>
    %99 = vector.extract_strided_slice %91 {offsets = [0, 64], sizes = [16, 64], strides = [1, 1]} : vector<16x128xf32> to vector<16x64xf32>
    %100 = arith.subf %79, %98 : vector<16x64xf32>
    %101 = arith.mulf %99, %100 : vector<16x64xf32>
    %102 = arith.addf %98, %101 : vector<16x64xf32>
    %103 = vector.extract_strided_slice %102 {offsets = [0, 0], sizes = [16, 32], strides = [1, 1]} : vector<16x64xf32> to vector<16x32xf32>
    %104 = vector.extract_strided_slice %102 {offsets = [0, 32], sizes = [16, 32], strides = [1, 1]} : vector<16x64xf32> to vector<16x32xf32>
    %105 = tpu.concatenate %80, %103 in 0 : vector<16x32xf32>, vector<16x32xf32> -> vector<32x32xf32>
    %106 = tpu.concatenate %104, %81 in 0 : vector<16x32xf32>, vector<16x32xf32> -> vector<32x32xf32>
    %c192 = arith.constant 192 : index
    %c0_18 = arith.constant 0 : index
    %107 = vector.load %arg3[%c192, %c0_18] : memref<1408x192xbf16, #tpu.memory_space<vmem>>, vector<64x192xbf16>
    %c176 = arith.constant 176 : index
    %c0_19 = arith.constant 0 : index
    %108 = vector.load %arg3[%c176, %c0_19] : memref<1408x192xbf16, #tpu.memory_space<vmem>>, vector<1x192xbf16>
    %109 = arith.extf %108 : vector<1x192xbf16> to vector<1x192xf32>
    %c256 = arith.constant 256 : index
    %c0_20 = arith.constant 0 : index
    %110 = vector.load %arg3[%c256, %c0_20] : memref<1408x192xbf16, #tpu.memory_space<vmem>>, vector<1x64xbf16>
    %c112 = arith.constant 112 : index
    %c0_21 = arith.constant 0 : index
    %111 = vector.load %arg3[%c112, %c0_21] : memref<1408x192xbf16, #tpu.memory_space<vmem>>, vector<64x192xbf16>
    %112 = vector.extract_strided_slice %111 {offsets = [0, 0], sizes = [32, 192], strides = [1, 1]} : vector<64x192xbf16> to vector<32x192xbf16>
    %113 = arith.truncf %105 : vector<32x32xf32> to vector<32x32xbf16>
    %cst_22 = arith.constant dense<0.000000e+00> : vector<32x192xf32>
    %114 = tpu.matmul %113, %112, %cst_22 {dimension_numbers = #tpu.dot_dimension_numbers<[1], [0], [0], [1], [0, 0, 1, 1], [], []>} : vector<32x32xbf16>, vector<32x192xbf16>, vector<32x192xf32> -> vector<32x192xf32>
    %115 = vector.extract_strided_slice %111 {offsets = [32, 0], sizes = [32, 192], strides = [1, 1]} : vector<64x192xbf16> to vector<32x192xbf16>
    %116 = arith.truncf %106 : vector<32x32xf32> to vector<32x32xbf16>
    %cst_23 = arith.constant dense<0.000000e+00> : vector<32x192xf32>
    %117 = tpu.matmul %116, %115, %cst_23 {dimension_numbers = #tpu.dot_dimension_numbers<[1], [0], [0], [1], [0, 0, 1, 1], [], []>} : vector<32x32xbf16>, vector<32x192xbf16>, vector<32x192xf32> -> vector<32x192xf32>
    %118 = arith.addf %114, %117 : vector<32x192xf32>
    %119 = vector.broadcast %109 : vector<1x192xf32> to vector<32x192xf32>
    %120 = arith.addf %118, %119 : vector<32x192xf32>
    %121 = vector.extract_strided_slice %120 {offsets = [0, 0], sizes = [16, 192], strides = [1, 1]} : vector<32x192xf32> to vector<16x192xf32>
    %122 = vector.extract_strided_slice %120 {offsets = [16, 0], sizes = [16, 192], strides = [1, 1]} : vector<32x192xf32> to vector<16x192xf32>
    %123 = vector.shape_cast %14 : vector<1x192xi1> to vector<1x192xi1>
    %124 = vector.broadcast %123 : vector<1x192xi1> to vector<16x192xi1>
    %125 = arith.select %124, %121, %122 : vector<16x192xi1>, vector<16x192xf32>
    %126 = vector.extract_strided_slice %120 {offsets = [16, 0], sizes = [16, 192], strides = [1, 1]} : vector<32x192xf32> to vector<16x192xf32>
    %127 = vector.extract_strided_slice %120 {offsets = [0, 0], sizes = [16, 192], strides = [1, 1]} : vector<32x192xf32> to vector<16x192xf32>
    %128 = vector.shape_cast %14 : vector<1x192xi1> to vector<1x192xi1>
    %129 = vector.broadcast %128 : vector<1x192xi1> to vector<16x192xi1>
    %130 = arith.select %129, %126, %127 : vector<16x192xi1>, vector<16x192xf32>
    %131 = arith.extf %110 : vector<1x64xbf16> to vector<1x64xf32>
    %132 = vector.shape_cast %131 : vector<1x64xf32> to vector<1x64xf32>
    %133 = vector.broadcast %132 : vector<1x64xf32> to vector<16x64xf32>
    %cst_24 = arith.constant 0.000000e+00 : f32
    %134 = vector.broadcast %cst_24 : f32 to vector<16x64xf32>
    %135 = arith.truncf %134 : vector<16x64xf32> to vector<16x64xbf16>
    %cst_25 = arith.constant dense<0.000000e+00> : vector<16x192xf32>
    %136 = tpu.matmul %135, %107, %cst_25 {dimension_numbers = #tpu.dot_dimension_numbers<[1], [0], [0], [1], [0, 0, 1, 1], [], []>} : vector<16x64xbf16>, vector<64x192xbf16>, vector<16x192xf32> -> vector<16x192xf32>
    %137 = vector.extract_strided_slice %125 {offsets = [0, 0], sizes = [16, 128], strides = [1, 1]} : vector<16x192xf32> to vector<16x128xf32>
    %138 = vector.extract_strided_slice %136 {offsets = [0, 0], sizes = [16, 128], strides = [1, 1]} : vector<16x192xf32> to vector<16x128xf32>
    %139 = arith.addf %137, %138 : vector<16x128xf32>
    %140 = arith.negf %139 : vector<16x128xf32>
    %141 = math.exp %140 : vector<16x128xf32>
    %cst_26 = arith.constant 1.000000e+00 : f32
    %142 = vector.broadcast %cst_26 : f32 to vector<16x128xf32>
    %143 = arith.addf %142, %141 : vector<16x128xf32>
    %144 = arith.divf %142, %143 : vector<16x128xf32>
    %145 = vector.extract_strided_slice %125 {offsets = [0, 128], sizes = [16, 64], strides = [1, 1]} : vector<16x192xf32> to vector<16x64xf32>
    %146 = vector.extract_strided_slice %144 {offsets = [0, 0], sizes = [16, 64], strides = [1, 1]} : vector<16x128xf32> to vector<16x64xf32>
    %147 = vector.extract_strided_slice %136 {offsets = [0, 128], sizes = [16, 64], strides = [1, 1]} : vector<16x192xf32> to vector<16x64xf32>
    %148 = arith.addf %147, %133 : vector<16x64xf32>
    %149 = arith.mulf %146, %148 : vector<16x64xf32>
    %150 = arith.addf %145, %149 : vector<16x64xf32>
    %151 = math.tanh %150 : vector<16x64xf32>
    %152 = vector.extract_strided_slice %144 {offsets = [0, 64], sizes = [16, 64], strides = [1, 1]} : vector<16x128xf32> to vector<16x64xf32>
    %153 = arith.subf %134, %151 : vector<16x64xf32>
    %154 = arith.mulf %152, %153 : vector<16x64xf32>
    %155 = arith.addf %151, %154 : vector<16x64xf32>
    %156 = vector.extract_strided_slice %155 {offsets = [0, 0], sizes = [16, 32], strides = [1, 1]} : vector<16x64xf32> to vector<16x32xf32>
    %157 = vector.extract_strided_slice %155 {offsets = [0, 32], sizes = [16, 32], strides = [1, 1]} : vector<16x64xf32> to vector<16x32xf32>
    %158 = arith.truncf %155 : vector<16x64xf32> to vector<16x64xbf16>
    %cst_27 = arith.constant dense<0.000000e+00> : vector<16x192xf32>
    %159 = tpu.matmul %158, %107, %cst_27 {dimension_numbers = #tpu.dot_dimension_numbers<[1], [0], [0], [1], [0, 0, 1, 1], [], []>} : vector<16x64xbf16>, vector<64x192xbf16>, vector<16x192xf32> -> vector<16x192xf32>
    %160 = vector.extract_strided_slice %130 {offsets = [0, 0], sizes = [16, 128], strides = [1, 1]} : vector<16x192xf32> to vector<16x128xf32>
    %161 = vector.extract_strided_slice %159 {offsets = [0, 0], sizes = [16, 128], strides = [1, 1]} : vector<16x192xf32> to vector<16x128xf32>
    %162 = arith.addf %160, %161 : vector<16x128xf32>
    %163 = arith.negf %162 : vector<16x128xf32>
    %164 = math.exp %163 : vector<16x128xf32>
    %cst_28 = arith.constant 1.000000e+00 : f32
    %165 = vector.broadcast %cst_28 : f32 to vector<16x128xf32>
    %166 = arith.addf %165, %164 : vector<16x128xf32>
    %167 = arith.divf %165, %166 : vector<16x128xf32>
    %168 = vector.extract_strided_slice %130 {offsets = [0, 128], sizes = [16, 64], strides = [1, 1]} : vector<16x192xf32> to vector<16x64xf32>
    %169 = vector.extract_strided_slice %167 {offsets = [0, 0], sizes = [16, 64], strides = [1, 1]} : vector<16x128xf32> to vector<16x64xf32>
    %170 = vector.extract_strided_slice %159 {offsets = [0, 128], sizes = [16, 64], strides = [1, 1]} : vector<16x192xf32> to vector<16x64xf32>
    %171 = arith.addf %170, %133 : vector<16x64xf32>
    %172 = arith.mulf %169, %171 : vector<16x64xf32>
    %173 = arith.addf %168, %172 : vector<16x64xf32>
    %174 = math.tanh %173 : vector<16x64xf32>
    %175 = vector.extract_strided_slice %167 {offsets = [0, 64], sizes = [16, 64], strides = [1, 1]} : vector<16x128xf32> to vector<16x64xf32>
    %176 = arith.subf %155, %174 : vector<16x64xf32>
    %177 = arith.mulf %175, %176 : vector<16x64xf32>
    %178 = arith.addf %174, %177 : vector<16x64xf32>
    %179 = vector.extract_strided_slice %178 {offsets = [0, 0], sizes = [16, 32], strides = [1, 1]} : vector<16x64xf32> to vector<16x32xf32>
    %180 = vector.extract_strided_slice %178 {offsets = [0, 32], sizes = [16, 32], strides = [1, 1]} : vector<16x64xf32> to vector<16x32xf32>
    %181 = tpu.concatenate %156, %179 in 0 : vector<16x32xf32>, vector<16x32xf32> -> vector<32x32xf32>
    %182 = tpu.concatenate %180, %157 in 0 : vector<16x32xf32>, vector<16x32xf32> -> vector<32x32xf32>
    %c544 = arith.constant 544 : index
    %c0_29 = arith.constant 0 : index
    %183 = vector.load %arg3[%c544, %c0_29] : memref<1408x192xbf16, #tpu.memory_space<vmem>>, vector<64x4xbf16>
    %c608 = arith.constant 608 : index
    %c0_30 = arith.constant 0 : index
    %184 = vector.load %arg3[%c608, %c0_30] : memref<1408x192xbf16, #tpu.memory_space<vmem>>, vector<1x4xbf16>
    %185 = arith.extf %184 : vector<1x4xbf16> to vector<1x4xf32>
    %186 = vector.extract_strided_slice %183 {offsets = [0, 0], sizes = [32, 4], strides = [1, 1]} : vector<64x4xbf16> to vector<32x4xbf16>
    %187 = arith.truncf %181 : vector<32x32xf32> to vector<32x32xbf16>
    %cst_31 = arith.constant dense<0.000000e+00> : vector<32x4xf32>
    %188 = tpu.matmul %187, %186, %cst_31 {dimension_numbers = #tpu.dot_dimension_numbers<[1], [0], [0], [1], [0, 0, 1, 1], [], []>} : vector<32x32xbf16>, vector<32x4xbf16>, vector<32x4xf32> -> vector<32x4xf32>
    %189 = vector.extract_strided_slice %183 {offsets = [32, 0], sizes = [32, 4], strides = [1, 1]} : vector<64x4xbf16> to vector<32x4xbf16>
    %190 = arith.truncf %182 : vector<32x32xf32> to vector<32x32xbf16>
    %cst_32 = arith.constant dense<0.000000e+00> : vector<32x4xf32>
    %191 = tpu.matmul %190, %189, %cst_32 {dimension_numbers = #tpu.dot_dimension_numbers<[1], [0], [0], [1], [0, 0, 1, 1], [], []>} : vector<32x32xbf16>, vector<32x4xbf16>, vector<32x4xf32> -> vector<32x4xf32>
    %192 = arith.addf %188, %191 : vector<32x4xf32>
    %193 = vector.broadcast %185 : vector<1x4xf32> to vector<32x4xf32>
    %194 = arith.addf %192, %193 : vector<32x4xf32>
    %195 = arith.subf %194, %22 : vector<32x4xf32>
    %cst_33 = arith.constant dense<0.000000e+00> : vector<32x4xf32>
    %196 = tpu.matmul %15, %195, %cst_33 {dimension_numbers = #tpu.dot_dimension_numbers<[1], [0], [0], [1], [0, 0, 1, 1], [], []>} : vector<32x32xf32>, vector<32x4xf32>, vector<32x4xf32> -> vector<32x4xf32>
    %c304 = arith.constant 304 : index
    %c0_34 = arith.constant 0 : index
    %197 = vector.load %arg3[%c304, %c0_34] : memref<1408x192xbf16, #tpu.memory_space<vmem>>, vector<64x192xbf16>
    %c288 = arith.constant 288 : index
    %c0_35 = arith.constant 0 : index
    %198 = vector.load %arg3[%c288, %c0_35] : memref<1408x192xbf16, #tpu.memory_space<vmem>>, vector<1x192xbf16>
    %199 = arith.extf %198 : vector<1x192xbf16> to vector<1x192xf32>
    %c368 = arith.constant 368 : index
    %c0_36 = arith.constant 0 : index
    %200 = vector.load %arg3[%c368, %c0_36] : memref<1408x192xbf16, #tpu.memory_space<vmem>>, vector<1x64xbf16>
    %c272 = arith.constant 272 : index
    %c0_37 = arith.constant 0 : index
    %201 = vector.load %arg3[%c272, %c0_37] : memref<1408x192xbf16, #tpu.memory_space<vmem>>, vector<6x192xbf16>
    %202 = vector.extract_strided_slice %201 {offsets = [0, 0], sizes = [1, 192], strides = [1, 1]} : vector<6x192xbf16> to vector<1x192xbf16>
    %203 = arith.extf %202 : vector<1x192xbf16> to vector<1x192xf32>
    %204 = vector.broadcast %21 : vector<32x1xf32> to vector<32x192xf32>
    %205 = vector.broadcast %203 : vector<1x192xf32> to vector<32x192xf32>
    %206 = arith.mulf %204, %205 : vector<32x192xf32>
    %207 = vector.extract_strided_slice %201 {offsets = [1, 0], sizes = [1, 192], strides = [1, 1]} : vector<6x192xbf16> to vector<1x192xbf16>
    %208 = arith.extf %207 : vector<1x192xbf16> to vector<1x192xf32>
    %209 = vector.broadcast %19 : vector<32x1xf32> to vector<32x192xf32>
    %210 = vector.broadcast %208 : vector<1x192xf32> to vector<32x192xf32>
    %211 = arith.mulf %209, %210 : vector<32x192xf32>
    %212 = arith.addf %206, %211 : vector<32x192xf32>
    %213 = vector.extract_strided_slice %201 {offsets = [2, 0], sizes = [4, 192], strides = [1, 1]} : vector<6x192xbf16> to vector<4x192xbf16>
    %214 = arith.truncf %196 : vector<32x4xf32> to vector<32x4xbf16>
    %cst_38 = arith.constant dense<0.000000e+00> : vector<32x192xf32>
    %215 = tpu.matmul %214, %213, %cst_38 {dimension_numbers = #tpu.dot_dimension_numbers<[1], [0], [0], [1], [0, 0, 1, 1], [], []>} : vector<32x4xbf16>, vector<4x192xbf16>, vector<32x192xf32> -> vector<32x192xf32>
    %216 = arith.addf %212, %215 : vector<32x192xf32>
    %217 = vector.broadcast %199 : vector<1x192xf32> to vector<32x192xf32>
    %218 = arith.addf %216, %217 : vector<32x192xf32>
    %219 = vector.extract_strided_slice %218 {offsets = [0, 0], sizes = [16, 192], strides = [1, 1]} : vector<32x192xf32> to vector<16x192xf32>
    %220 = vector.extract_strided_slice %218 {offsets = [16, 0], sizes = [16, 192], strides = [1, 1]} : vector<32x192xf32> to vector<16x192xf32>
    %221 = vector.shape_cast %14 : vector<1x192xi1> to vector<1x192xi1>
    %222 = vector.broadcast %221 : vector<1x192xi1> to vector<16x192xi1>
    %223 = arith.select %222, %219, %220 : vector<16x192xi1>, vector<16x192xf32>
    %224 = vector.extract_strided_slice %218 {offsets = [16, 0], sizes = [16, 192], strides = [1, 1]} : vector<32x192xf32> to vector<16x192xf32>
    %225 = vector.extract_strided_slice %218 {offsets = [0, 0], sizes = [16, 192], strides = [1, 1]} : vector<32x192xf32> to vector<16x192xf32>
    %226 = vector.shape_cast %14 : vector<1x192xi1> to vector<1x192xi1>
    %227 = vector.broadcast %226 : vector<1x192xi1> to vector<16x192xi1>
    %228 = arith.select %227, %224, %225 : vector<16x192xi1>, vector<16x192xf32>
    %229 = arith.extf %200 : vector<1x64xbf16> to vector<1x64xf32>
    %230 = vector.shape_cast %229 : vector<1x64xf32> to vector<1x64xf32>
    %231 = vector.broadcast %230 : vector<1x64xf32> to vector<16x64xf32>
    %cst_39 = arith.constant 0.000000e+00 : f32
    %232 = vector.broadcast %cst_39 : f32 to vector<16x64xf32>
    %233 = arith.truncf %232 : vector<16x64xf32> to vector<16x64xbf16>
    %cst_40 = arith.constant dense<0.000000e+00> : vector<16x192xf32>
    %234 = tpu.matmul %233, %197, %cst_40 {dimension_numbers = #tpu.dot_dimension_numbers<[1], [0], [0], [1], [0, 0, 1, 1], [], []>} : vector<16x64xbf16>, vector<64x192xbf16>, vector<16x192xf32> -> vector<16x192xf32>
    %235 = vector.extract_strided_slice %223 {offsets = [0, 0], sizes = [16, 128], strides = [1, 1]} : vector<16x192xf32> to vector<16x128xf32>
    %236 = vector.extract_strided_slice %234 {offsets = [0, 0], sizes = [16, 128], strides = [1, 1]} : vector<16x192xf32> to vector<16x128xf32>
    %237 = arith.addf %235, %236 : vector<16x128xf32>
    %238 = arith.negf %237 : vector<16x128xf32>
    %239 = math.exp %238 : vector<16x128xf32>
    %cst_41 = arith.constant 1.000000e+00 : f32
    %240 = vector.broadcast %cst_41 : f32 to vector<16x128xf32>
    %241 = arith.addf %240, %239 : vector<16x128xf32>
    %242 = arith.divf %240, %241 : vector<16x128xf32>
    %243 = vector.extract_strided_slice %223 {offsets = [0, 128], sizes = [16, 64], strides = [1, 1]} : vector<16x192xf32> to vector<16x64xf32>
    %244 = vector.extract_strided_slice %242 {offsets = [0, 0], sizes = [16, 64], strides = [1, 1]} : vector<16x128xf32> to vector<16x64xf32>
    %245 = vector.extract_strided_slice %234 {offsets = [0, 128], sizes = [16, 64], strides = [1, 1]} : vector<16x192xf32> to vector<16x64xf32>
    %246 = arith.addf %245, %231 : vector<16x64xf32>
    %247 = arith.mulf %244, %246 : vector<16x64xf32>
    %248 = arith.addf %243, %247 : vector<16x64xf32>
    %249 = math.tanh %248 : vector<16x64xf32>
    %250 = vector.extract_strided_slice %242 {offsets = [0, 64], sizes = [16, 64], strides = [1, 1]} : vector<16x128xf32> to vector<16x64xf32>
    %251 = arith.subf %232, %249 : vector<16x64xf32>
    %252 = arith.mulf %250, %251 : vector<16x64xf32>
    %253 = arith.addf %249, %252 : vector<16x64xf32>
    %254 = vector.extract_strided_slice %253 {offsets = [0, 0], sizes = [16, 32], strides = [1, 1]} : vector<16x64xf32> to vector<16x32xf32>
    %255 = vector.extract_strided_slice %253 {offsets = [0, 32], sizes = [16, 32], strides = [1, 1]} : vector<16x64xf32> to vector<16x32xf32>
    %256 = arith.truncf %253 : vector<16x64xf32> to vector<16x64xbf16>
    %cst_42 = arith.constant dense<0.000000e+00> : vector<16x192xf32>
    %257 = tpu.matmul %256, %197, %cst_42 {dimension_numbers = #tpu.dot_dimension_numbers<[1], [0], [0], [1], [0, 0, 1, 1], [], []>} : vector<16x64xbf16>, vector<64x192xbf16>, vector<16x192xf32> -> vector<16x192xf32>
    %258 = vector.extract_strided_slice %228 {offsets = [0, 0], sizes = [16, 128], strides = [1, 1]} : vector<16x192xf32> to vector<16x128xf32>
    %259 = vector.extract_strided_slice %257 {offsets = [0, 0], sizes = [16, 128], strides = [1, 1]} : vector<16x192xf32> to vector<16x128xf32>
    %260 = arith.addf %258, %259 : vector<16x128xf32>
    %261 = arith.negf %260 : vector<16x128xf32>
    %262 = math.exp %261 : vector<16x128xf32>
    %cst_43 = arith.constant 1.000000e+00 : f32
    %263 = vector.broadcast %cst_43 : f32 to vector<16x128xf32>
    %264 = arith.addf %263, %262 : vector<16x128xf32>
    %265 = arith.divf %263, %264 : vector<16x128xf32>
    %266 = vector.extract_strided_slice %228 {offsets = [0, 128], sizes = [16, 64], strides = [1, 1]} : vector<16x192xf32> to vector<16x64xf32>
    %267 = vector.extract_strided_slice %265 {offsets = [0, 0], sizes = [16, 64], strides = [1, 1]} : vector<16x128xf32> to vector<16x64xf32>
    %268 = vector.extract_strided_slice %257 {offsets = [0, 128], sizes = [16, 64], strides = [1, 1]} : vector<16x192xf32> to vector<16x64xf32>
    %269 = arith.addf %268, %231 : vector<16x64xf32>
    %270 = arith.mulf %267, %269 : vector<16x64xf32>
    %271 = arith.addf %266, %270 : vector<16x64xf32>
    %272 = math.tanh %271 : vector<16x64xf32>
    %273 = vector.extract_strided_slice %265 {offsets = [0, 64], sizes = [16, 64], strides = [1, 1]} : vector<16x128xf32> to vector<16x64xf32>
    %274 = arith.subf %253, %272 : vector<16x64xf32>
    %275 = arith.mulf %273, %274 : vector<16x64xf32>
    %276 = arith.addf %272, %275 : vector<16x64xf32>
    %277 = vector.extract_strided_slice %276 {offsets = [0, 0], sizes = [16, 32], strides = [1, 1]} : vector<16x64xf32> to vector<16x32xf32>
    %278 = vector.extract_strided_slice %276 {offsets = [0, 32], sizes = [16, 32], strides = [1, 1]} : vector<16x64xf32> to vector<16x32xf32>
    %279 = tpu.concatenate %254, %277 in 0 : vector<16x32xf32>, vector<16x32xf32> -> vector<32x32xf32>
    %280 = tpu.concatenate %278, %255 in 0 : vector<16x32xf32>, vector<16x32xf32> -> vector<32x32xf32>
    %c464 = arith.constant 464 : index
    %c0_44 = arith.constant 0 : index
    %281 = vector.load %arg3[%c464, %c0_44] : memref<1408x192xbf16, #tpu.memory_space<vmem>>, vector<64x192xbf16>
    %c448 = arith.constant 448 : index
    %c0_45 = arith.constant 0 : index
    %282 = vector.load %arg3[%c448, %c0_45] : memref<1408x192xbf16, #tpu.memory_space<vmem>>, vector<1x192xbf16>
    %283 = arith.extf %282 : vector<1x192xbf16> to vector<1x192xf32>
    %c528 = arith.constant 528 : index
    %c0_46 = arith.constant 0 : index
    %284 = vector.load %arg3[%c528, %c0_46] : memref<1408x192xbf16, #tpu.memory_space<vmem>>, vector<1x64xbf16>
    %c384 = arith.constant 384 : index
    %c0_47 = arith.constant 0 : index
    %285 = vector.load %arg3[%c384, %c0_47] : memref<1408x192xbf16, #tpu.memory_space<vmem>>, vector<64x192xbf16>
    %286 = vector.extract_strided_slice %285 {offsets = [0, 0], sizes = [32, 192], strides = [1, 1]} : vector<64x192xbf16> to vector<32x192xbf16>
    %287 = arith.truncf %279 : vector<32x32xf32> to vector<32x32xbf16>
    %cst_48 = arith.constant dense<0.000000e+00> : vector<32x192xf32>
    %288 = tpu.matmul %287, %286, %cst_48 {dimension_numbers = #tpu.dot_dimension_numbers<[1], [0], [0], [1], [0, 0, 1, 1], [], []>} : vector<32x32xbf16>, vector<32x192xbf16>, vector<32x192xf32> -> vector<32x192xf32>
    %289 = vector.extract_strided_slice %285 {offsets = [32, 0], sizes = [32, 192], strides = [1, 1]} : vector<64x192xbf16> to vector<32x192xbf16>
    %290 = arith.truncf %280 : vector<32x32xf32> to vector<32x32xbf16>
    %cst_49 = arith.constant dense<0.000000e+00> : vector<32x192xf32>
    %291 = tpu.matmul %290, %289, %cst_49 {dimension_numbers = #tpu.dot_dimension_numbers<[1], [0], [0], [1], [0, 0, 1, 1], [], []>} : vector<32x32xbf16>, vector<32x192xbf16>, vector<32x192xf32> -> vector<32x192xf32>
    %292 = arith.addf %288, %291 : vector<32x192xf32>
    %293 = vector.broadcast %283 : vector<1x192xf32> to vector<32x192xf32>
    %294 = arith.addf %292, %293 : vector<32x192xf32>
    %295 = vector.extract_strided_slice %294 {offsets = [0, 0], sizes = [16, 192], strides = [1, 1]} : vector<32x192xf32> to vector<16x192xf32>
    %296 = vector.extract_strided_slice %294 {offsets = [16, 0], sizes = [16, 192], strides = [1, 1]} : vector<32x192xf32> to vector<16x192xf32>
    %297 = vector.shape_cast %14 : vector<1x192xi1> to vector<1x192xi1>
    %298 = vector.broadcast %297 : vector<1x192xi1> to vector<16x192xi1>
    %299 = arith.select %298, %295, %296 : vector<16x192xi1>, vector<16x192xf32>
    %300 = vector.extract_strided_slice %294 {offsets = [16, 0], sizes = [16, 192], strides = [1, 1]} : vector<32x192xf32> to vector<16x192xf32>
    %301 = vector.extract_strided_slice %294 {offsets = [0, 0], sizes = [16, 192], strides = [1, 1]} : vector<32x192xf32> to vector<16x192xf32>
    %302 = vector.shape_cast %14 : vector<1x192xi1> to vector<1x192xi1>
    %303 = vector.broadcast %302 : vector<1x192xi1> to vector<16x192xi1>
    %304 = arith.select %303, %300, %301 : vector<16x192xi1>, vector<16x192xf32>
    %305 = arith.extf %284 : vector<1x64xbf16> to vector<1x64xf32>
    %306 = vector.shape_cast %305 : vector<1x64xf32> to vector<1x64xf32>
    %307 = vector.broadcast %306 : vector<1x64xf32> to vector<16x64xf32>
    %cst_50 = arith.constant 0.000000e+00 : f32
    %308 = vector.broadcast %cst_50 : f32 to vector<16x64xf32>
    %309 = arith.truncf %308 : vector<16x64xf32> to vector<16x64xbf16>
    %cst_51 = arith.constant dense<0.000000e+00> : vector<16x192xf32>
    %310 = tpu.matmul %309, %281, %cst_51 {dimension_numbers = #tpu.dot_dimension_numbers<[1], [0], [0], [1], [0, 0, 1, 1], [], []>} : vector<16x64xbf16>, vector<64x192xbf16>, vector<16x192xf32> -> vector<16x192xf32>
    %311 = vector.extract_strided_slice %299 {offsets = [0, 0], sizes = [16, 128], strides = [1, 1]} : vector<16x192xf32> to vector<16x128xf32>
    %312 = vector.extract_strided_slice %310 {offsets = [0, 0], sizes = [16, 128], strides = [1, 1]} : vector<16x192xf32> to vector<16x128xf32>
    %313 = arith.addf %311, %312 : vector<16x128xf32>
    %314 = arith.negf %313 : vector<16x128xf32>
    %315 = math.exp %314 : vector<16x128xf32>
    %cst_52 = arith.constant 1.000000e+00 : f32
    %316 = vector.broadcast %cst_52 : f32 to vector<16x128xf32>
    %317 = arith.addf %316, %315 : vector<16x128xf32>
    %318 = arith.divf %316, %317 : vector<16x128xf32>
    %319 = vector.extract_strided_slice %299 {offsets = [0, 128], sizes = [16, 64], strides = [1, 1]} : vector<16x192xf32> to vector<16x64xf32>
    %320 = vector.extract_strided_slice %318 {offsets = [0, 0], sizes = [16, 64], strides = [1, 1]} : vector<16x128xf32> to vector<16x64xf32>
    %321 = vector.extract_strided_slice %310 {offsets = [0, 128], sizes = [16, 64], strides = [1, 1]} : vector<16x192xf32> to vector<16x64xf32>
    %322 = arith.addf %321, %307 : vector<16x64xf32>
    %323 = arith.mulf %320, %322 : vector<16x64xf32>
    %324 = arith.addf %319, %323 : vector<16x64xf32>
    %325 = math.tanh %324 : vector<16x64xf32>
    %326 = vector.extract_strided_slice %318 {offsets = [0, 64], sizes = [16, 64], strides = [1, 1]} : vector<16x128xf32> to vector<16x64xf32>
    %327 = arith.subf %308, %325 : vector<16x64xf32>
    %328 = arith.mulf %326, %327 : vector<16x64xf32>
    %329 = arith.addf %325, %328 : vector<16x64xf32>
    %330 = vector.extract_strided_slice %329 {offsets = [0, 0], sizes = [16, 32], strides = [1, 1]} : vector<16x64xf32> to vector<16x32xf32>
    %331 = vector.extract_strided_slice %329 {offsets = [0, 32], sizes = [16, 32], strides = [1, 1]} : vector<16x64xf32> to vector<16x32xf32>
    %332 = arith.truncf %329 : vector<16x64xf32> to vector<16x64xbf16>
    %cst_53 = arith.constant dense<0.000000e+00> : vector<16x192xf32>
    %333 = tpu.matmul %332, %281, %cst_53 {dimension_numbers = #tpu.dot_dimension_numbers<[1], [0], [0], [1], [0, 0, 1, 1], [], []>} : vector<16x64xbf16>, vector<64x192xbf16>, vector<16x192xf32> -> vector<16x192xf32>
    %334 = vector.extract_strided_slice %304 {offsets = [0, 0], sizes = [16, 128], strides = [1, 1]} : vector<16x192xf32> to vector<16x128xf32>
    %335 = vector.extract_strided_slice %333 {offsets = [0, 0], sizes = [16, 128], strides = [1, 1]} : vector<16x192xf32> to vector<16x128xf32>
    %336 = arith.addf %334, %335 : vector<16x128xf32>
    %337 = arith.negf %336 : vector<16x128xf32>
    %338 = math.exp %337 : vector<16x128xf32>
    %cst_54 = arith.constant 1.000000e+00 : f32
    %339 = vector.broadcast %cst_54 : f32 to vector<16x128xf32>
    %340 = arith.addf %339, %338 : vector<16x128xf32>
    %341 = arith.divf %339, %340 : vector<16x128xf32>
    %342 = vector.extract_strided_slice %304 {offsets = [0, 128], sizes = [16, 64], strides = [1, 1]} : vector<16x192xf32> to vector<16x64xf32>
    %343 = vector.extract_strided_slice %341 {offsets = [0, 0], sizes = [16, 64], strides = [1, 1]} : vector<16x128xf32> to vector<16x64xf32>
    %344 = vector.extract_strided_slice %333 {offsets = [0, 128], sizes = [16, 64], strides = [1, 1]} : vector<16x192xf32> to vector<16x64xf32>
    %345 = arith.addf %344, %307 : vector<16x64xf32>
    %346 = arith.mulf %343, %345 : vector<16x64xf32>
    %347 = arith.addf %342, %346 : vector<16x64xf32>
    %348 = math.tanh %347 : vector<16x64xf32>
    %349 = vector.extract_strided_slice %341 {offsets = [0, 64], sizes = [16, 64], strides = [1, 1]} : vector<16x128xf32> to vector<16x64xf32>
    %350 = arith.subf %329, %348 : vector<16x64xf32>
    %351 = arith.mulf %349, %350 : vector<16x64xf32>
    %352 = arith.addf %348, %351 : vector<16x64xf32>
    %353 = vector.extract_strided_slice %352 {offsets = [0, 0], sizes = [16, 32], strides = [1, 1]} : vector<16x64xf32> to vector<16x32xf32>
    %354 = vector.extract_strided_slice %352 {offsets = [0, 32], sizes = [16, 32], strides = [1, 1]} : vector<16x64xf32> to vector<16x32xf32>
    %355 = tpu.concatenate %330, %353 in 0 : vector<16x32xf32>, vector<16x32xf32> -> vector<32x32xf32>
    %356 = tpu.concatenate %354, %331 in 0 : vector<16x32xf32>, vector<16x32xf32> -> vector<32x32xf32>
    %c624 = arith.constant 624 : index
    %c0_55 = arith.constant 0 : index
    %357 = vector.load %arg3[%c624, %c0_55] : memref<1408x192xbf16, #tpu.memory_space<vmem>>, vector<64x4xbf16>
    %c688 = arith.constant 688 : index
    %c0_56 = arith.constant 0 : index
    %358 = vector.load %arg3[%c688, %c0_56] : memref<1408x192xbf16, #tpu.memory_space<vmem>>, vector<1x4xbf16>
    %359 = arith.extf %358 : vector<1x4xbf16> to vector<1x4xf32>
    %360 = vector.extract_strided_slice %357 {offsets = [0, 0], sizes = [32, 4], strides = [1, 1]} : vector<64x4xbf16> to vector<32x4xbf16>
    %361 = arith.truncf %355 : vector<32x32xf32> to vector<32x32xbf16>
    %cst_57 = arith.constant dense<0.000000e+00> : vector<32x4xf32>
    %362 = tpu.matmul %361, %360, %cst_57 {dimension_numbers = #tpu.dot_dimension_numbers<[1], [0], [0], [1], [0, 0, 1, 1], [], []>} : vector<32x32xbf16>, vector<32x4xbf16>, vector<32x4xf32> -> vector<32x4xf32>
    %363 = vector.extract_strided_slice %357 {offsets = [32, 0], sizes = [32, 4], strides = [1, 1]} : vector<64x4xbf16> to vector<32x4xbf16>
    %364 = arith.truncf %356 : vector<32x32xf32> to vector<32x32xbf16>
    %cst_58 = arith.constant dense<0.000000e+00> : vector<32x4xf32>
    %365 = tpu.matmul %364, %363, %cst_58 {dimension_numbers = #tpu.dot_dimension_numbers<[1], [0], [0], [1], [0, 0, 1, 1], [], []>} : vector<32x32xbf16>, vector<32x4xbf16>, vector<32x4xf32> -> vector<32x4xf32>
    %366 = arith.addf %362, %365 : vector<32x4xf32>
    %367 = vector.broadcast %359 : vector<1x4xf32> to vector<32x4xf32>
    %368 = arith.addf %366, %367 : vector<32x4xf32>
    %369 = arith.subf %368, %196 : vector<32x4xf32>
    %cst_59 = arith.constant dense<0.000000e+00> : vector<32x4xf32>
    %370 = tpu.matmul %16, %369, %cst_59 {dimension_numbers = #tpu.dot_dimension_numbers<[1], [0], [0], [1], [0, 0, 1, 1], [], []>} : vector<32x32xf32>, vector<32x4xf32>, vector<32x4xf32> -> vector<32x4xf32>
    %c736 = arith.constant 736 : index
    %c0_60 = arith.constant 0 : index
    %371 = vector.load %arg3[%c736, %c0_60] : memref<1408x192xbf16, #tpu.memory_space<vmem>>, vector<64x192xbf16>
    %c720 = arith.constant 720 : index
    %c0_61 = arith.constant 0 : index
    %372 = vector.load %arg3[%c720, %c0_61] : memref<1408x192xbf16, #tpu.memory_space<vmem>>, vector<1x192xbf16>
    %373 = arith.extf %372 : vector<1x192xbf16> to vector<1x192xf32>
    %c800 = arith.constant 800 : index
    %c0_62 = arith.constant 0 : index
    %374 = vector.load %arg3[%c800, %c0_62] : memref<1408x192xbf16, #tpu.memory_space<vmem>>, vector<1x64xbf16>
    %c704 = arith.constant 704 : index
    %c0_63 = arith.constant 0 : index
    %375 = vector.load %arg3[%c704, %c0_63] : memref<1408x192xbf16, #tpu.memory_space<vmem>>, vector<6x192xbf16>
    %376 = vector.extract_strided_slice %375 {offsets = [0, 0], sizes = [1, 192], strides = [1, 1]} : vector<6x192xbf16> to vector<1x192xbf16>
    %377 = arith.extf %376 : vector<1x192xbf16> to vector<1x192xf32>
    %378 = vector.broadcast %18 : vector<32x1xf32> to vector<32x192xf32>
    %379 = vector.broadcast %377 : vector<1x192xf32> to vector<32x192xf32>
    %380 = arith.mulf %378, %379 : vector<32x192xf32>
    %381 = vector.extract_strided_slice %375 {offsets = [1, 0], sizes = [1, 192], strides = [1, 1]} : vector<6x192xbf16> to vector<1x192xbf16>
    %382 = arith.extf %381 : vector<1x192xbf16> to vector<1x192xf32>
    %383 = vector.broadcast %20 : vector<32x1xf32> to vector<32x192xf32>
    %384 = vector.broadcast %382 : vector<1x192xf32> to vector<32x192xf32>
    %385 = arith.mulf %383, %384 : vector<32x192xf32>
    %386 = arith.addf %380, %385 : vector<32x192xf32>
    %387 = vector.extract_strided_slice %375 {offsets = [2, 0], sizes = [4, 192], strides = [1, 1]} : vector<6x192xbf16> to vector<4x192xbf16>
    %388 = arith.truncf %370 : vector<32x4xf32> to vector<32x4xbf16>
    %cst_64 = arith.constant dense<0.000000e+00> : vector<32x192xf32>
    %389 = tpu.matmul %388, %387, %cst_64 {dimension_numbers = #tpu.dot_dimension_numbers<[1], [0], [0], [1], [0, 0, 1, 1], [], []>} : vector<32x4xbf16>, vector<4x192xbf16>, vector<32x192xf32> -> vector<32x192xf32>
    %390 = arith.addf %386, %389 : vector<32x192xf32>
    %391 = vector.broadcast %373 : vector<1x192xf32> to vector<32x192xf32>
    %392 = arith.addf %390, %391 : vector<32x192xf32>
    %393 = vector.extract_strided_slice %392 {offsets = [0, 0], sizes = [16, 192], strides = [1, 1]} : vector<32x192xf32> to vector<16x192xf32>
    %394 = vector.extract_strided_slice %392 {offsets = [16, 0], sizes = [16, 192], strides = [1, 1]} : vector<32x192xf32> to vector<16x192xf32>
    %395 = vector.shape_cast %14 : vector<1x192xi1> to vector<1x192xi1>
    %396 = vector.broadcast %395 : vector<1x192xi1> to vector<16x192xi1>
    %397 = arith.select %396, %393, %394 : vector<16x192xi1>, vector<16x192xf32>
    %398 = vector.extract_strided_slice %392 {offsets = [16, 0], sizes = [16, 192], strides = [1, 1]} : vector<32x192xf32> to vector<16x192xf32>
    %399 = vector.extract_strided_slice %392 {offsets = [0, 0], sizes = [16, 192], strides = [1, 1]} : vector<32x192xf32> to vector<16x192xf32>
    %400 = vector.shape_cast %14 : vector<1x192xi1> to vector<1x192xi1>
    %401 = vector.broadcast %400 : vector<1x192xi1> to vector<16x192xi1>
    %402 = arith.select %401, %398, %399 : vector<16x192xi1>, vector<16x192xf32>
    %403 = arith.extf %374 : vector<1x64xbf16> to vector<1x64xf32>
    %404 = vector.shape_cast %403 : vector<1x64xf32> to vector<1x64xf32>
    %405 = vector.broadcast %404 : vector<1x64xf32> to vector<16x64xf32>
    %cst_65 = arith.constant 0.000000e+00 : f32
    %406 = vector.broadcast %cst_65 : f32 to vector<16x64xf32>
    %407 = arith.truncf %406 : vector<16x64xf32> to vector<16x64xbf16>
    %cst_66 = arith.constant dense<0.000000e+00> : vector<16x192xf32>
    %408 = tpu.matmul %407, %371, %cst_66 {dimension_numbers = #tpu.dot_dimension_numbers<[1], [0], [0], [1], [0, 0, 1, 1], [], []>} : vector<16x64xbf16>, vector<64x192xbf16>, vector<16x192xf32> -> vector<16x192xf32>
    %409 = vector.extract_strided_slice %397 {offsets = [0, 0], sizes = [16, 128], strides = [1, 1]} : vector<16x192xf32> to vector<16x128xf32>
    %410 = vector.extract_strided_slice %408 {offsets = [0, 0], sizes = [16, 128], strides = [1, 1]} : vector<16x192xf32> to vector<16x128xf32>
    %411 = arith.addf %409, %410 : vector<16x128xf32>
    %412 = arith.negf %411 : vector<16x128xf32>
    %413 = math.exp %412 : vector<16x128xf32>
    %cst_67 = arith.constant 1.000000e+00 : f32
    %414 = vector.broadcast %cst_67 : f32 to vector<16x128xf32>
    %415 = arith.addf %414, %413 : vector<16x128xf32>
    %416 = arith.divf %414, %415 : vector<16x128xf32>
    %417 = vector.extract_strided_slice %397 {offsets = [0, 128], sizes = [16, 64], strides = [1, 1]} : vector<16x192xf32> to vector<16x64xf32>
    %418 = vector.extract_strided_slice %416 {offsets = [0, 0], sizes = [16, 64], strides = [1, 1]} : vector<16x128xf32> to vector<16x64xf32>
    %419 = vector.extract_strided_slice %408 {offsets = [0, 128], sizes = [16, 64], strides = [1, 1]} : vector<16x192xf32> to vector<16x64xf32>
    %420 = arith.addf %419, %405 : vector<16x64xf32>
    %421 = arith.mulf %418, %420 : vector<16x64xf32>
    %422 = arith.addf %417, %421 : vector<16x64xf32>
    %423 = math.tanh %422 : vector<16x64xf32>
    %424 = vector.extract_strided_slice %416 {offsets = [0, 64], sizes = [16, 64], strides = [1, 1]} : vector<16x128xf32> to vector<16x64xf32>
    %425 = arith.subf %406, %423 : vector<16x64xf32>
    %426 = arith.mulf %424, %425 : vector<16x64xf32>
    %427 = arith.addf %423, %426 : vector<16x64xf32>
    %428 = vector.extract_strided_slice %427 {offsets = [0, 0], sizes = [16, 32], strides = [1, 1]} : vector<16x64xf32> to vector<16x32xf32>
    %429 = vector.extract_strided_slice %427 {offsets = [0, 32], sizes = [16, 32], strides = [1, 1]} : vector<16x64xf32> to vector<16x32xf32>
    %430 = arith.truncf %427 : vector<16x64xf32> to vector<16x64xbf16>
    %cst_68 = arith.constant dense<0.000000e+00> : vector<16x192xf32>
    %431 = tpu.matmul %430, %371, %cst_68 {dimension_numbers = #tpu.dot_dimension_numbers<[1], [0], [0], [1], [0, 0, 1, 1], [], []>} : vector<16x64xbf16>, vector<64x192xbf16>, vector<16x192xf32> -> vector<16x192xf32>
    %432 = vector.extract_strided_slice %402 {offsets = [0, 0], sizes = [16, 128], strides = [1, 1]} : vector<16x192xf32> to vector<16x128xf32>
    %433 = vector.extract_strided_slice %431 {offsets = [0, 0], sizes = [16, 128], strides = [1, 1]} : vector<16x192xf32> to vector<16x128xf32>
    %434 = arith.addf %432, %433 : vector<16x128xf32>
    %435 = arith.negf %434 : vector<16x128xf32>
    %436 = math.exp %435 : vector<16x128xf32>
    %cst_69 = arith.constant 1.000000e+00 : f32
    %437 = vector.broadcast %cst_69 : f32 to vector<16x128xf32>
    %438 = arith.addf %437, %436 : vector<16x128xf32>
    %439 = arith.divf %437, %438 : vector<16x128xf32>
    %440 = vector.extract_strided_slice %402 {offsets = [0, 128], sizes = [16, 64], strides = [1, 1]} : vector<16x192xf32> to vector<16x64xf32>
    %441 = vector.extract_strided_slice %439 {offsets = [0, 0], sizes = [16, 64], strides = [1, 1]} : vector<16x128xf32> to vector<16x64xf32>
    %442 = vector.extract_strided_slice %431 {offsets = [0, 128], sizes = [16, 64], strides = [1, 1]} : vector<16x192xf32> to vector<16x64xf32>
    %443 = arith.addf %442, %405 : vector<16x64xf32>
    %444 = arith.mulf %441, %443 : vector<16x64xf32>
    %445 = arith.addf %440, %444 : vector<16x64xf32>
    %446 = math.tanh %445 : vector<16x64xf32>
    %447 = vector.extract_strided_slice %439 {offsets = [0, 64], sizes = [16, 64], strides = [1, 1]} : vector<16x128xf32> to vector<16x64xf32>
    %448 = arith.subf %427, %446 : vector<16x64xf32>
    %449 = arith.mulf %447, %448 : vector<16x64xf32>
    %450 = arith.addf %446, %449 : vector<16x64xf32>
    %451 = vector.extract_strided_slice %450 {offsets = [0, 0], sizes = [16, 32], strides = [1, 1]} : vector<16x64xf32> to vector<16x32xf32>
    %452 = vector.extract_strided_slice %450 {offsets = [0, 32], sizes = [16, 32], strides = [1, 1]} : vector<16x64xf32> to vector<16x32xf32>
    %453 = tpu.concatenate %428, %451 in 0 : vector<16x32xf32>, vector<16x32xf32> -> vector<32x32xf32>
    %454 = tpu.concatenate %452, %429 in 0 : vector<16x32xf32>, vector<16x32xf32> -> vector<32x32xf32>
    %c896 = arith.constant 896 : index
    %c0_70 = arith.constant 0 : index
    %455 = vector.load %arg3[%c896, %c0_70] : memref<1408x192xbf16, #tpu.memory_space<vmem>>, vector<64x192xbf16>
    %c880 = arith.constant 880 : index
    %c0_71 = arith.constant 0 : index
    %456 = vector.load %arg3[%c880, %c0_71] : memref<1408x192xbf16, #tpu.memory_space<vmem>>, vector<1x192xbf16>
    %457 = arith.extf %456 : vector<1x192xbf16> to vector<1x192xf32>
    %c960 = arith.constant 960 : index
    %c0_72 = arith.constant 0 : index
    %458 = vector.load %arg3[%c960, %c0_72] : memref<1408x192xbf16, #tpu.memory_space<vmem>>, vector<1x64xbf16>
    %c816 = arith.constant 816 : index
    %c0_73 = arith.constant 0 : index
    %459 = vector.load %arg3[%c816, %c0_73] : memref<1408x192xbf16, #tpu.memory_space<vmem>>, vector<64x192xbf16>
    %460 = vector.extract_strided_slice %459 {offsets = [0, 0], sizes = [32, 192], strides = [1, 1]} : vector<64x192xbf16> to vector<32x192xbf16>
    %461 = arith.truncf %453 : vector<32x32xf32> to vector<32x32xbf16>
    %cst_74 = arith.constant dense<0.000000e+00> : vector<32x192xf32>
    %462 = tpu.matmul %461, %460, %cst_74 {dimension_numbers = #tpu.dot_dimension_numbers<[1], [0], [0], [1], [0, 0, 1, 1], [], []>} : vector<32x32xbf16>, vector<32x192xbf16>, vector<32x192xf32> -> vector<32x192xf32>
    %463 = vector.extract_strided_slice %459 {offsets = [32, 0], sizes = [32, 192], strides = [1, 1]} : vector<64x192xbf16> to vector<32x192xbf16>
    %464 = arith.truncf %454 : vector<32x32xf32> to vector<32x32xbf16>
    %cst_75 = arith.constant dense<0.000000e+00> : vector<32x192xf32>
    %465 = tpu.matmul %464, %463, %cst_75 {dimension_numbers = #tpu.dot_dimension_numbers<[1], [0], [0], [1], [0, 0, 1, 1], [], []>} : vector<32x32xbf16>, vector<32x192xbf16>, vector<32x192xf32> -> vector<32x192xf32>
    %466 = arith.addf %462, %465 : vector<32x192xf32>
    %467 = vector.broadcast %457 : vector<1x192xf32> to vector<32x192xf32>
    %468 = arith.addf %466, %467 : vector<32x192xf32>
    %469 = vector.extract_strided_slice %468 {offsets = [0, 0], sizes = [16, 192], strides = [1, 1]} : vector<32x192xf32> to vector<16x192xf32>
    %470 = vector.extract_strided_slice %468 {offsets = [16, 0], sizes = [16, 192], strides = [1, 1]} : vector<32x192xf32> to vector<16x192xf32>
    %471 = vector.shape_cast %14 : vector<1x192xi1> to vector<1x192xi1>
    %472 = vector.broadcast %471 : vector<1x192xi1> to vector<16x192xi1>
    %473 = arith.select %472, %469, %470 : vector<16x192xi1>, vector<16x192xf32>
    %474 = vector.extract_strided_slice %468 {offsets = [16, 0], sizes = [16, 192], strides = [1, 1]} : vector<32x192xf32> to vector<16x192xf32>
    %475 = vector.extract_strided_slice %468 {offsets = [0, 0], sizes = [16, 192], strides = [1, 1]} : vector<32x192xf32> to vector<16x192xf32>
    %476 = vector.shape_cast %14 : vector<1x192xi1> to vector<1x192xi1>
    %477 = vector.broadcast %476 : vector<1x192xi1> to vector<16x192xi1>
    %478 = arith.select %477, %474, %475 : vector<16x192xi1>, vector<16x192xf32>
    %479 = arith.extf %458 : vector<1x64xbf16> to vector<1x64xf32>
    %480 = vector.shape_cast %479 : vector<1x64xf32> to vector<1x64xf32>
    %481 = vector.broadcast %480 : vector<1x64xf32> to vector<16x64xf32>
    %cst_76 = arith.constant 0.000000e+00 : f32
    %482 = vector.broadcast %cst_76 : f32 to vector<16x64xf32>
    %483 = arith.truncf %482 : vector<16x64xf32> to vector<16x64xbf16>
    %cst_77 = arith.constant dense<0.000000e+00> : vector<16x192xf32>
    %484 = tpu.matmul %483, %455, %cst_77 {dimension_numbers = #tpu.dot_dimension_numbers<[1], [0], [0], [1], [0, 0, 1, 1], [], []>} : vector<16x64xbf16>, vector<64x192xbf16>, vector<16x192xf32> -> vector<16x192xf32>
    %485 = vector.extract_strided_slice %473 {offsets = [0, 0], sizes = [16, 128], strides = [1, 1]} : vector<16x192xf32> to vector<16x128xf32>
    %486 = vector.extract_strided_slice %484 {offsets = [0, 0], sizes = [16, 128], strides = [1, 1]} : vector<16x192xf32> to vector<16x128xf32>
    %487 = arith.addf %485, %486 : vector<16x128xf32>
    %488 = arith.negf %487 : vector<16x128xf32>
    %489 = math.exp %488 : vector<16x128xf32>
    %cst_78 = arith.constant 1.000000e+00 : f32
    %490 = vector.broadcast %cst_78 : f32 to vector<16x128xf32>
    %491 = arith.addf %490, %489 : vector<16x128xf32>
    %492 = arith.divf %490, %491 : vector<16x128xf32>
    %493 = vector.extract_strided_slice %473 {offsets = [0, 128], sizes = [16, 64], strides = [1, 1]} : vector<16x192xf32> to vector<16x64xf32>
    %494 = vector.extract_strided_slice %492 {offsets = [0, 0], sizes = [16, 64], strides = [1, 1]} : vector<16x128xf32> to vector<16x64xf32>
    %495 = vector.extract_strided_slice %484 {offsets = [0, 128], sizes = [16, 64], strides = [1, 1]} : vector<16x192xf32> to vector<16x64xf32>
    %496 = arith.addf %495, %481 : vector<16x64xf32>
    %497 = arith.mulf %494, %496 : vector<16x64xf32>
    %498 = arith.addf %493, %497 : vector<16x64xf32>
    %499 = math.tanh %498 : vector<16x64xf32>
    %500 = vector.extract_strided_slice %492 {offsets = [0, 64], sizes = [16, 64], strides = [1, 1]} : vector<16x128xf32> to vector<16x64xf32>
    %501 = arith.subf %482, %499 : vector<16x64xf32>
    %502 = arith.mulf %500, %501 : vector<16x64xf32>
    %503 = arith.addf %499, %502 : vector<16x64xf32>
    %504 = vector.extract_strided_slice %503 {offsets = [0, 0], sizes = [16, 32], strides = [1, 1]} : vector<16x64xf32> to vector<16x32xf32>
    %505 = vector.extract_strided_slice %503 {offsets = [0, 32], sizes = [16, 32], strides = [1, 1]} : vector<16x64xf32> to vector<16x32xf32>
    %506 = arith.truncf %503 : vector<16x64xf32> to vector<16x64xbf16>
    %cst_79 = arith.constant dense<0.000000e+00> : vector<16x192xf32>
    %507 = tpu.matmul %506, %455, %cst_79 {dimension_numbers = #tpu.dot_dimension_numbers<[1], [0], [0], [1], [0, 0, 1, 1], [], []>} : vector<16x64xbf16>, vector<64x192xbf16>, vector<16x192xf32> -> vector<16x192xf32>
    %508 = vector.extract_strided_slice %478 {offsets = [0, 0], sizes = [16, 128], strides = [1, 1]} : vector<16x192xf32> to vector<16x128xf32>
    %509 = vector.extract_strided_slice %507 {offsets = [0, 0], sizes = [16, 128], strides = [1, 1]} : vector<16x192xf32> to vector<16x128xf32>
    %510 = arith.addf %508, %509 : vector<16x128xf32>
    %511 = arith.negf %510 : vector<16x128xf32>
    %512 = math.exp %511 : vector<16x128xf32>
    %cst_80 = arith.constant 1.000000e+00 : f32
    %513 = vector.broadcast %cst_80 : f32 to vector<16x128xf32>
    %514 = arith.addf %513, %512 : vector<16x128xf32>
    %515 = arith.divf %513, %514 : vector<16x128xf32>
    %516 = vector.extract_strided_slice %478 {offsets = [0, 128], sizes = [16, 64], strides = [1, 1]} : vector<16x192xf32> to vector<16x64xf32>
    %517 = vector.extract_strided_slice %515 {offsets = [0, 0], sizes = [16, 64], strides = [1, 1]} : vector<16x128xf32> to vector<16x64xf32>
    %518 = vector.extract_strided_slice %507 {offsets = [0, 128], sizes = [16, 64], strides = [1, 1]} : vector<16x192xf32> to vector<16x64xf32>
    %519 = arith.addf %518, %481 : vector<16x64xf32>
    %520 = arith.mulf %517, %519 : vector<16x64xf32>
    %521 = arith.addf %516, %520 : vector<16x64xf32>
    %522 = math.tanh %521 : vector<16x64xf32>
    %523 = vector.extract_strided_slice %515 {offsets = [0, 64], sizes = [16, 64], strides = [1, 1]} : vector<16x128xf32> to vector<16x64xf32>
    %524 = arith.subf %503, %522 : vector<16x64xf32>
    %525 = arith.mulf %523, %524 : vector<16x64xf32>
    %526 = arith.addf %522, %525 : vector<16x64xf32>
    %527 = vector.extract_strided_slice %526 {offsets = [0, 0], sizes = [16, 32], strides = [1, 1]} : vector<16x64xf32> to vector<16x32xf32>
    %528 = vector.extract_strided_slice %526 {offsets = [0, 32], sizes = [16, 32], strides = [1, 1]} : vector<16x64xf32> to vector<16x32xf32>
    %529 = tpu.concatenate %504, %527 in 0 : vector<16x32xf32>, vector<16x32xf32> -> vector<32x32xf32>
    %530 = tpu.concatenate %528, %505 in 0 : vector<16x32xf32>, vector<16x32xf32> -> vector<32x32xf32>
    %c1248 = arith.constant 1248 : index
    %c0_81 = arith.constant 0 : index
    %531 = vector.load %arg3[%c1248, %c0_81] : memref<1408x192xbf16, #tpu.memory_space<vmem>>, vector<64x4xbf16>
    %c1312 = arith.constant 1312 : index
    %c0_82 = arith.constant 0 : index
    %532 = vector.load %arg3[%c1312, %c0_82] : memref<1408x192xbf16, #tpu.memory_space<vmem>>, vector<1x4xbf16>
    %533 = arith.extf %532 : vector<1x4xbf16> to vector<1x4xf32>
    %534 = vector.extract_strided_slice %531 {offsets = [0, 0], sizes = [32, 4], strides = [1, 1]} : vector<64x4xbf16> to vector<32x4xbf16>
    %535 = arith.truncf %529 : vector<32x32xf32> to vector<32x32xbf16>
    %cst_83 = arith.constant dense<0.000000e+00> : vector<32x4xf32>
    %536 = tpu.matmul %535, %534, %cst_83 {dimension_numbers = #tpu.dot_dimension_numbers<[1], [0], [0], [1], [0, 0, 1, 1], [], []>} : vector<32x32xbf16>, vector<32x4xbf16>, vector<32x4xf32> -> vector<32x4xf32>
    %537 = vector.extract_strided_slice %531 {offsets = [32, 0], sizes = [32, 4], strides = [1, 1]} : vector<64x4xbf16> to vector<32x4xbf16>
    %538 = arith.truncf %530 : vector<32x32xf32> to vector<32x32xbf16>
    %cst_84 = arith.constant dense<0.000000e+00> : vector<32x4xf32>
    %539 = tpu.matmul %538, %537, %cst_84 {dimension_numbers = #tpu.dot_dimension_numbers<[1], [0], [0], [1], [0, 0, 1, 1], [], []>} : vector<32x32xbf16>, vector<32x4xbf16>, vector<32x4xf32> -> vector<32x4xf32>
    %540 = arith.addf %536, %539 : vector<32x4xf32>
    %541 = vector.broadcast %533 : vector<1x4xf32> to vector<32x4xf32>
    %542 = arith.addf %540, %541 : vector<32x4xf32>
    %543 = arith.subf %542, %370 : vector<32x4xf32>
    %cst_85 = arith.constant dense<0.000000e+00> : vector<32x4xf32>
    %544 = tpu.matmul %15, %543, %cst_85 {dimension_numbers = #tpu.dot_dimension_numbers<[1], [0], [0], [1], [0, 0, 1, 1], [], []>} : vector<32x32xf32>, vector<32x4xf32>, vector<32x4xf32> -> vector<32x4xf32>
    %c1008 = arith.constant 1008 : index
    %c0_86 = arith.constant 0 : index
    %545 = vector.load %arg3[%c1008, %c0_86] : memref<1408x192xbf16, #tpu.memory_space<vmem>>, vector<64x192xbf16>
    %c992 = arith.constant 992 : index
    %c0_87 = arith.constant 0 : index
    %546 = vector.load %arg3[%c992, %c0_87] : memref<1408x192xbf16, #tpu.memory_space<vmem>>, vector<1x192xbf16>
    %547 = arith.extf %546 : vector<1x192xbf16> to vector<1x192xf32>
    %c1072 = arith.constant 1072 : index
    %c0_88 = arith.constant 0 : index
    %548 = vector.load %arg3[%c1072, %c0_88] : memref<1408x192xbf16, #tpu.memory_space<vmem>>, vector<1x64xbf16>
    %c976 = arith.constant 976 : index
    %c0_89 = arith.constant 0 : index
    %549 = vector.load %arg3[%c976, %c0_89] : memref<1408x192xbf16, #tpu.memory_space<vmem>>, vector<6x192xbf16>
    %550 = vector.extract_strided_slice %549 {offsets = [0, 0], sizes = [1, 192], strides = [1, 1]} : vector<6x192xbf16> to vector<1x192xbf16>
    %551 = arith.extf %550 : vector<1x192xbf16> to vector<1x192xf32>
    %552 = vector.broadcast %21 : vector<32x1xf32> to vector<32x192xf32>
    %553 = vector.broadcast %551 : vector<1x192xf32> to vector<32x192xf32>
    %554 = arith.mulf %552, %553 : vector<32x192xf32>
    %555 = vector.extract_strided_slice %549 {offsets = [1, 0], sizes = [1, 192], strides = [1, 1]} : vector<6x192xbf16> to vector<1x192xbf16>
    %556 = arith.extf %555 : vector<1x192xbf16> to vector<1x192xf32>
    %557 = vector.broadcast %19 : vector<32x1xf32> to vector<32x192xf32>
    %558 = vector.broadcast %556 : vector<1x192xf32> to vector<32x192xf32>
    %559 = arith.mulf %557, %558 : vector<32x192xf32>
    %560 = arith.addf %554, %559 : vector<32x192xf32>
    %561 = vector.extract_strided_slice %549 {offsets = [2, 0], sizes = [4, 192], strides = [1, 1]} : vector<6x192xbf16> to vector<4x192xbf16>
    %562 = arith.truncf %544 : vector<32x4xf32> to vector<32x4xbf16>
    %cst_90 = arith.constant dense<0.000000e+00> : vector<32x192xf32>
    %563 = tpu.matmul %562, %561, %cst_90 {dimension_numbers = #tpu.dot_dimension_numbers<[1], [0], [0], [1], [0, 0, 1, 1], [], []>} : vector<32x4xbf16>, vector<4x192xbf16>, vector<32x192xf32> -> vector<32x192xf32>
    %564 = arith.addf %560, %563 : vector<32x192xf32>
    %565 = vector.broadcast %547 : vector<1x192xf32> to vector<32x192xf32>
    %566 = arith.addf %564, %565 : vector<32x192xf32>
    %567 = vector.extract_strided_slice %566 {offsets = [0, 0], sizes = [16, 192], strides = [1, 1]} : vector<32x192xf32> to vector<16x192xf32>
    %568 = vector.extract_strided_slice %566 {offsets = [16, 0], sizes = [16, 192], strides = [1, 1]} : vector<32x192xf32> to vector<16x192xf32>
    %569 = vector.shape_cast %14 : vector<1x192xi1> to vector<1x192xi1>
    %570 = vector.broadcast %569 : vector<1x192xi1> to vector<16x192xi1>
    %571 = arith.select %570, %567, %568 : vector<16x192xi1>, vector<16x192xf32>
    %572 = vector.extract_strided_slice %566 {offsets = [16, 0], sizes = [16, 192], strides = [1, 1]} : vector<32x192xf32> to vector<16x192xf32>
    %573 = vector.extract_strided_slice %566 {offsets = [0, 0], sizes = [16, 192], strides = [1, 1]} : vector<32x192xf32> to vector<16x192xf32>
    %574 = vector.shape_cast %14 : vector<1x192xi1> to vector<1x192xi1>
    %575 = vector.broadcast %574 : vector<1x192xi1> to vector<16x192xi1>
    %576 = arith.select %575, %572, %573 : vector<16x192xi1>, vector<16x192xf32>
    %577 = arith.extf %548 : vector<1x64xbf16> to vector<1x64xf32>
    %578 = vector.shape_cast %577 : vector<1x64xf32> to vector<1x64xf32>
    %579 = vector.broadcast %578 : vector<1x64xf32> to vector<16x64xf32>
    %cst_91 = arith.constant 0.000000e+00 : f32
    %580 = vector.broadcast %cst_91 : f32 to vector<16x64xf32>
    %581 = arith.truncf %580 : vector<16x64xf32> to vector<16x64xbf16>
    %cst_92 = arith.constant dense<0.000000e+00> : vector<16x192xf32>
    %582 = tpu.matmul %581, %545, %cst_92 {dimension_numbers = #tpu.dot_dimension_numbers<[1], [0], [0], [1], [0, 0, 1, 1], [], []>} : vector<16x64xbf16>, vector<64x192xbf16>, vector<16x192xf32> -> vector<16x192xf32>
    %583 = vector.extract_strided_slice %571 {offsets = [0, 0], sizes = [16, 128], strides = [1, 1]} : vector<16x192xf32> to vector<16x128xf32>
    %584 = vector.extract_strided_slice %582 {offsets = [0, 0], sizes = [16, 128], strides = [1, 1]} : vector<16x192xf32> to vector<16x128xf32>
    %585 = arith.addf %583, %584 : vector<16x128xf32>
    %586 = arith.negf %585 : vector<16x128xf32>
    %587 = math.exp %586 : vector<16x128xf32>
    %cst_93 = arith.constant 1.000000e+00 : f32
    %588 = vector.broadcast %cst_93 : f32 to vector<16x128xf32>
    %589 = arith.addf %588, %587 : vector<16x128xf32>
    %590 = arith.divf %588, %589 : vector<16x128xf32>
    %591 = vector.extract_strided_slice %571 {offsets = [0, 128], sizes = [16, 64], strides = [1, 1]} : vector<16x192xf32> to vector<16x64xf32>
    %592 = vector.extract_strided_slice %590 {offsets = [0, 0], sizes = [16, 64], strides = [1, 1]} : vector<16x128xf32> to vector<16x64xf32>
    %593 = vector.extract_strided_slice %582 {offsets = [0, 128], sizes = [16, 64], strides = [1, 1]} : vector<16x192xf32> to vector<16x64xf32>
    %594 = arith.addf %593, %579 : vector<16x64xf32>
    %595 = arith.mulf %592, %594 : vector<16x64xf32>
    %596 = arith.addf %591, %595 : vector<16x64xf32>
    %597 = math.tanh %596 : vector<16x64xf32>
    %598 = vector.extract_strided_slice %590 {offsets = [0, 64], sizes = [16, 64], strides = [1, 1]} : vector<16x128xf32> to vector<16x64xf32>
    %599 = arith.subf %580, %597 : vector<16x64xf32>
    %600 = arith.mulf %598, %599 : vector<16x64xf32>
    %601 = arith.addf %597, %600 : vector<16x64xf32>
    %602 = vector.extract_strided_slice %601 {offsets = [0, 0], sizes = [16, 32], strides = [1, 1]} : vector<16x64xf32> to vector<16x32xf32>
    %603 = vector.extract_strided_slice %601 {offsets = [0, 32], sizes = [16, 32], strides = [1, 1]} : vector<16x64xf32> to vector<16x32xf32>
    %604 = arith.truncf %601 : vector<16x64xf32> to vector<16x64xbf16>
    %cst_94 = arith.constant dense<0.000000e+00> : vector<16x192xf32>
    %605 = tpu.matmul %604, %545, %cst_94 {dimension_numbers = #tpu.dot_dimension_numbers<[1], [0], [0], [1], [0, 0, 1, 1], [], []>} : vector<16x64xbf16>, vector<64x192xbf16>, vector<16x192xf32> -> vector<16x192xf32>
    %606 = vector.extract_strided_slice %576 {offsets = [0, 0], sizes = [16, 128], strides = [1, 1]} : vector<16x192xf32> to vector<16x128xf32>
    %607 = vector.extract_strided_slice %605 {offsets = [0, 0], sizes = [16, 128], strides = [1, 1]} : vector<16x192xf32> to vector<16x128xf32>
    %608 = arith.addf %606, %607 : vector<16x128xf32>
    %609 = arith.negf %608 : vector<16x128xf32>
    %610 = math.exp %609 : vector<16x128xf32>
    %cst_95 = arith.constant 1.000000e+00 : f32
    %611 = vector.broadcast %cst_95 : f32 to vector<16x128xf32>
    %612 = arith.addf %611, %610 : vector<16x128xf32>
    %613 = arith.divf %611, %612 : vector<16x128xf32>
    %614 = vector.extract_strided_slice %576 {offsets = [0, 128], sizes = [16, 64], strides = [1, 1]} : vector<16x192xf32> to vector<16x64xf32>
    %615 = vector.extract_strided_slice %613 {offsets = [0, 0], sizes = [16, 64], strides = [1, 1]} : vector<16x128xf32> to vector<16x64xf32>
    %616 = vector.extract_strided_slice %605 {offsets = [0, 128], sizes = [16, 64], strides = [1, 1]} : vector<16x192xf32> to vector<16x64xf32>
    %617 = arith.addf %616, %579 : vector<16x64xf32>
    %618 = arith.mulf %615, %617 : vector<16x64xf32>
    %619 = arith.addf %614, %618 : vector<16x64xf32>
    %620 = math.tanh %619 : vector<16x64xf32>
    %621 = vector.extract_strided_slice %613 {offsets = [0, 64], sizes = [16, 64], strides = [1, 1]} : vector<16x128xf32> to vector<16x64xf32>
    %622 = arith.subf %601, %620 : vector<16x64xf32>
    %623 = arith.mulf %621, %622 : vector<16x64xf32>
    %624 = arith.addf %620, %623 : vector<16x64xf32>
    %625 = vector.extract_strided_slice %624 {offsets = [0, 0], sizes = [16, 32], strides = [1, 1]} : vector<16x64xf32> to vector<16x32xf32>
    %626 = vector.extract_strided_slice %624 {offsets = [0, 32], sizes = [16, 32], strides = [1, 1]} : vector<16x64xf32> to vector<16x32xf32>
    %627 = tpu.concatenate %602, %625 in 0 : vector<16x32xf32>, vector<16x32xf32> -> vector<32x32xf32>
    %628 = tpu.concatenate %626, %603 in 0 : vector<16x32xf32>, vector<16x32xf32> -> vector<32x32xf32>
    %c1168 = arith.constant 1168 : index
    %c0_96 = arith.constant 0 : index
    %629 = vector.load %arg3[%c1168, %c0_96] : memref<1408x192xbf16, #tpu.memory_space<vmem>>, vector<64x192xbf16>
    %c1152 = arith.constant 1152 : index
    %c0_97 = arith.constant 0 : index
    %630 = vector.load %arg3[%c1152, %c0_97] : memref<1408x192xbf16, #tpu.memory_space<vmem>>, vector<1x192xbf16>
    %631 = arith.extf %630 : vector<1x192xbf16> to vector<1x192xf32>
    %c1232 = arith.constant 1232 : index
    %c0_98 = arith.constant 0 : index
    %632 = vector.load %arg3[%c1232, %c0_98] : memref<1408x192xbf16, #tpu.memory_space<vmem>>, vector<1x64xbf16>
    %c1088 = arith.constant 1088 : index
    %c0_99 = arith.constant 0 : index
    %633 = vector.load %arg3[%c1088, %c0_99] : memref<1408x192xbf16, #tpu.memory_space<vmem>>, vector<64x192xbf16>
    %634 = vector.extract_strided_slice %633 {offsets = [0, 0], sizes = [32, 192], strides = [1, 1]} : vector<64x192xbf16> to vector<32x192xbf16>
    %635 = arith.truncf %627 : vector<32x32xf32> to vector<32x32xbf16>
    %cst_100 = arith.constant dense<0.000000e+00> : vector<32x192xf32>
    %636 = tpu.matmul %635, %634, %cst_100 {dimension_numbers = #tpu.dot_dimension_numbers<[1], [0], [0], [1], [0, 0, 1, 1], [], []>} : vector<32x32xbf16>, vector<32x192xbf16>, vector<32x192xf32> -> vector<32x192xf32>
    %637 = vector.extract_strided_slice %633 {offsets = [32, 0], sizes = [32, 192], strides = [1, 1]} : vector<64x192xbf16> to vector<32x192xbf16>
    %638 = arith.truncf %628 : vector<32x32xf32> to vector<32x32xbf16>
    %cst_101 = arith.constant dense<0.000000e+00> : vector<32x192xf32>
    %639 = tpu.matmul %638, %637, %cst_101 {dimension_numbers = #tpu.dot_dimension_numbers<[1], [0], [0], [1], [0, 0, 1, 1], [], []>} : vector<32x32xbf16>, vector<32x192xbf16>, vector<32x192xf32> -> vector<32x192xf32>
    %640 = arith.addf %636, %639 : vector<32x192xf32>
    %641 = vector.broadcast %631 : vector<1x192xf32> to vector<32x192xf32>
    %642 = arith.addf %640, %641 : vector<32x192xf32>
    %643 = vector.extract_strided_slice %642 {offsets = [0, 0], sizes = [16, 192], strides = [1, 1]} : vector<32x192xf32> to vector<16x192xf32>
    %644 = vector.extract_strided_slice %642 {offsets = [16, 0], sizes = [16, 192], strides = [1, 1]} : vector<32x192xf32> to vector<16x192xf32>
    %645 = vector.shape_cast %14 : vector<1x192xi1> to vector<1x192xi1>
    %646 = vector.broadcast %645 : vector<1x192xi1> to vector<16x192xi1>
    %647 = arith.select %646, %643, %644 : vector<16x192xi1>, vector<16x192xf32>
    %648 = vector.extract_strided_slice %642 {offsets = [16, 0], sizes = [16, 192], strides = [1, 1]} : vector<32x192xf32> to vector<16x192xf32>
    %649 = vector.extract_strided_slice %642 {offsets = [0, 0], sizes = [16, 192], strides = [1, 1]} : vector<32x192xf32> to vector<16x192xf32>
    %650 = vector.shape_cast %14 : vector<1x192xi1> to vector<1x192xi1>
    %651 = vector.broadcast %650 : vector<1x192xi1> to vector<16x192xi1>
    %652 = arith.select %651, %648, %649 : vector<16x192xi1>, vector<16x192xf32>
    %653 = arith.extf %632 : vector<1x64xbf16> to vector<1x64xf32>
    %654 = vector.shape_cast %653 : vector<1x64xf32> to vector<1x64xf32>
    %655 = vector.broadcast %654 : vector<1x64xf32> to vector<16x64xf32>
    %cst_102 = arith.constant 0.000000e+00 : f32
    %656 = vector.broadcast %cst_102 : f32 to vector<16x64xf32>
    %657 = arith.truncf %656 : vector<16x64xf32> to vector<16x64xbf16>
    %cst_103 = arith.constant dense<0.000000e+00> : vector<16x192xf32>
    %658 = tpu.matmul %657, %629, %cst_103 {dimension_numbers = #tpu.dot_dimension_numbers<[1], [0], [0], [1], [0, 0, 1, 1], [], []>} : vector<16x64xbf16>, vector<64x192xbf16>, vector<16x192xf32> -> vector<16x192xf32>
    %659 = vector.extract_strided_slice %647 {offsets = [0, 0], sizes = [16, 128], strides = [1, 1]} : vector<16x192xf32> to vector<16x128xf32>
    %660 = vector.extract_strided_slice %658 {offsets = [0, 0], sizes = [16, 128], strides = [1, 1]} : vector<16x192xf32> to vector<16x128xf32>
    %661 = arith.addf %659, %660 : vector<16x128xf32>
    %662 = arith.negf %661 : vector<16x128xf32>
    %663 = math.exp %662 : vector<16x128xf32>
    %cst_104 = arith.constant 1.000000e+00 : f32
    %664 = vector.broadcast %cst_104 : f32 to vector<16x128xf32>
    %665 = arith.addf %664, %663 : vector<16x128xf32>
    %666 = arith.divf %664, %665 : vector<16x128xf32>
    %667 = vector.extract_strided_slice %647 {offsets = [0, 128], sizes = [16, 64], strides = [1, 1]} : vector<16x192xf32> to vector<16x64xf32>
    %668 = vector.extract_strided_slice %666 {offsets = [0, 0], sizes = [16, 64], strides = [1, 1]} : vector<16x128xf32> to vector<16x64xf32>
    %669 = vector.extract_strided_slice %658 {offsets = [0, 128], sizes = [16, 64], strides = [1, 1]} : vector<16x192xf32> to vector<16x64xf32>
    %670 = arith.addf %669, %655 : vector<16x64xf32>
    %671 = arith.mulf %668, %670 : vector<16x64xf32>
    %672 = arith.addf %667, %671 : vector<16x64xf32>
    %673 = math.tanh %672 : vector<16x64xf32>
    %674 = vector.extract_strided_slice %666 {offsets = [0, 64], sizes = [16, 64], strides = [1, 1]} : vector<16x128xf32> to vector<16x64xf32>
    %675 = arith.subf %656, %673 : vector<16x64xf32>
    %676 = arith.mulf %674, %675 : vector<16x64xf32>
    %677 = arith.addf %673, %676 : vector<16x64xf32>
    %678 = vector.extract_strided_slice %677 {offsets = [0, 0], sizes = [16, 32], strides = [1, 1]} : vector<16x64xf32> to vector<16x32xf32>
    %679 = vector.extract_strided_slice %677 {offsets = [0, 32], sizes = [16, 32], strides = [1, 1]} : vector<16x64xf32> to vector<16x32xf32>
    %680 = arith.truncf %677 : vector<16x64xf32> to vector<16x64xbf16>
    %cst_105 = arith.constant dense<0.000000e+00> : vector<16x192xf32>
    %681 = tpu.matmul %680, %629, %cst_105 {dimension_numbers = #tpu.dot_dimension_numbers<[1], [0], [0], [1], [0, 0, 1, 1], [], []>} : vector<16x64xbf16>, vector<64x192xbf16>, vector<16x192xf32> -> vector<16x192xf32>
    %682 = vector.extract_strided_slice %652 {offsets = [0, 0], sizes = [16, 128], strides = [1, 1]} : vector<16x192xf32> to vector<16x128xf32>
    %683 = vector.extract_strided_slice %681 {offsets = [0, 0], sizes = [16, 128], strides = [1, 1]} : vector<16x192xf32> to vector<16x128xf32>
    %684 = arith.addf %682, %683 : vector<16x128xf32>
    %685 = arith.negf %684 : vector<16x128xf32>
    %686 = math.exp %685 : vector<16x128xf32>
    %cst_106 = arith.constant 1.000000e+00 : f32
    %687 = vector.broadcast %cst_106 : f32 to vector<16x128xf32>
    %688 = arith.addf %687, %686 : vector<16x128xf32>
    %689 = arith.divf %687, %688 : vector<16x128xf32>
    %690 = vector.extract_strided_slice %652 {offsets = [0, 128], sizes = [16, 64], strides = [1, 1]} : vector<16x192xf32> to vector<16x64xf32>
    %691 = vector.extract_strided_slice %689 {offsets = [0, 0], sizes = [16, 64], strides = [1, 1]} : vector<16x128xf32> to vector<16x64xf32>
    %692 = vector.extract_strided_slice %681 {offsets = [0, 128], sizes = [16, 64], strides = [1, 1]} : vector<16x192xf32> to vector<16x64xf32>
    %693 = arith.addf %692, %655 : vector<16x64xf32>
    %694 = arith.mulf %691, %693 : vector<16x64xf32>
    %695 = arith.addf %690, %694 : vector<16x64xf32>
    %696 = math.tanh %695 : vector<16x64xf32>
    %697 = vector.extract_strided_slice %689 {offsets = [0, 64], sizes = [16, 64], strides = [1, 1]} : vector<16x128xf32> to vector<16x64xf32>
    %698 = arith.subf %677, %696 : vector<16x64xf32>
    %699 = arith.mulf %697, %698 : vector<16x64xf32>
    %700 = arith.addf %696, %699 : vector<16x64xf32>
    %701 = vector.extract_strided_slice %700 {offsets = [0, 0], sizes = [16, 32], strides = [1, 1]} : vector<16x64xf32> to vector<16x32xf32>
    %702 = vector.extract_strided_slice %700 {offsets = [0, 32], sizes = [16, 32], strides = [1, 1]} : vector<16x64xf32> to vector<16x32xf32>
    %703 = tpu.concatenate %678, %701 in 0 : vector<16x32xf32>, vector<16x32xf32> -> vector<32x32xf32>
    %704 = tpu.concatenate %702, %679 in 0 : vector<16x32xf32>, vector<16x32xf32> -> vector<32x32xf32>
    %c1328 = arith.constant 1328 : index
    %c0_107 = arith.constant 0 : index
    %705 = vector.load %arg3[%c1328, %c0_107] : memref<1408x192xbf16, #tpu.memory_space<vmem>>, vector<64x1xbf16>
    %c1392 = arith.constant 1392 : index
    %c0_108 = arith.constant 0 : index
    %706 = vector.load %arg3[%c1392, %c0_108] : memref<1408x192xbf16, #tpu.memory_space<vmem>>, vector<1x1xbf16>
    %707 = arith.extf %706 : vector<1x1xbf16> to vector<1x1xf32>
    %708 = vector.extract_strided_slice %705 {offsets = [0, 0], sizes = [32, 1], strides = [1, 1]} : vector<64x1xbf16> to vector<32x1xbf16>
    %709 = arith.truncf %703 : vector<32x32xf32> to vector<32x32xbf16>
    %cst_109 = arith.constant dense<0.000000e+00> : vector<32x1xf32>
    %710 = tpu.matmul %709, %708, %cst_109 {dimension_numbers = #tpu.dot_dimension_numbers<[1], [0], [0], [1], [0, 0, 1, 1], [], []>} : vector<32x32xbf16>, vector<32x1xbf16>, vector<32x1xf32> -> vector<32x1xf32>
    %711 = vector.extract_strided_slice %705 {offsets = [32, 0], sizes = [32, 1], strides = [1, 1]} : vector<64x1xbf16> to vector<32x1xbf16>
    %712 = arith.truncf %704 : vector<32x32xf32> to vector<32x32xbf16>
    %cst_110 = arith.constant dense<0.000000e+00> : vector<32x1xf32>
    %713 = tpu.matmul %712, %711, %cst_110 {dimension_numbers = #tpu.dot_dimension_numbers<[1], [0], [0], [1], [0, 0, 1, 1], [], []>} : vector<32x32xbf16>, vector<32x1xbf16>, vector<32x1xf32> -> vector<32x1xf32>
    %714 = arith.addf %710, %713 : vector<32x1xf32>
    %715 = vector.broadcast %707 : vector<1x1xf32> to vector<32x1xf32>
    %716 = arith.addf %714, %715 : vector<32x1xf32>
    %cst_111 = arith.constant dense<0.000000e+00> : vector<32x1xf32>
    %717 = tpu.matmul %16, %716, %cst_111 {dimension_numbers = #tpu.dot_dimension_numbers<[1], [0], [0], [1], [0, 0, 1, 1], [], []>} : vector<32x32xf32>, vector<32x1xf32>, vector<32x1xf32> -> vector<32x1xf32>
    %718 = arith.negf %717 : vector<32x1xf32>
    %719 = math.exp %718 : vector<32x1xf32>
    %cst_112 = arith.constant 1.000000e+00 : f32
    %720 = vector.broadcast %cst_112 : f32 to vector<32x1xf32>
    %721 = arith.addf %720, %719 : vector<32x1xf32>
    %722 = arith.divf %720, %721 : vector<32x1xf32>
    %c0_113 = arith.constant 0 : index
    %c0_114 = arith.constant 0 : index
    %723 = vector.load %arg4[%c0_113, %c0_114] : memref<32x1xf32, #tpu.memory_space<vmem>>, vector<32x1xf32>
    tpu.vector_store %arg4[%c0_113, %c0_114], %722 {strides = array<i32>} : memref<32x1xf32, #tpu.memory_space<vmem>>, vector<32x1xf32>,
    return
  }
}

</mosaic_0001>

<bundles_post_ra>
// kernel: dec_forward.1
= control target key start
LH: loop header
LB: loop body
LE: loop exit
PB: predicated region body
PF: predicated region fallthrough
CT: control target
= control target key end

     0   :  { %vm67_vm0 = vcmask 261120   ;;  %s5475_s19 = smov 127   ;;  %v5476_v6 = vmov 0   ;;  %vm364_vm1 = vcmask 1041408   ;;  %v18_v36 = vlaneseq  ;;  %s5477_s10 = smov 64   ;;  %s6873_s0 = inlined_call_operand.vmem [shape: f32[32,2], index: 0, kind: input, shape index: {}]   ;;  %s6874_s2 = inlined_call_operand.vmem [shape: f32[32,32], index: 2, kind: input, shape index: {}]   ;;  %s6875_s3 = inlined_call_operand.vmem [shape: bf16[1408,192], index: 3, kind: input, shape index: {}]   ;;  %s6876_s1 = inlined_call_operand.vmem [shape: f32[32,32], index: 1, kind: input, shape index: {}]   ;;  %s6877_s4 = inlined_call_operand.vmem [shape: f32[32,1], index: 4, kind: output, shape index: {}]  }
   0x1   :  { %v50_v0 = vld [vmem:[%s6873_s0 + $0x18] sm:$0xff]  ;;  %v48_v1 = vld [vmem:[%s6873_s0 + $0x8] sm:$0xff]  ;;  %v43_v2 = vld [vmem:[%s6874_s2] sm:$0xff]  ;;  %5075 = vset.pattern.permute.xlu1 %v5476_v6  ;;  %5074 = vset.pattern.permute.xlu0 %v5476_v6  ;;  %vm505_vm8 = vcmask 523264   ;;  %s5478_s27 = smov 96   ;;  %vm360_vm9 = vcmask 31744  }
   0x2   :  { %61 = vrot.lane.b32.xlu0 %v50_v0, %s5475_s19  ;;  %57 = vrot.lane.b32.xlu1 %v48_v1, %s5475_s19  ;;  %v49_v3 = vld [vmem:[%s6873_s0 + $0x10] sm:$0xff]  ;;  %v47_v4 = vld [vmem:[%s6873_s0] sm:$0xff]  ;;  %v294_v38 = vshrl.u32 %v18_v36, 7  ;;  %v19_v59 = vand.u32 127, %v18_v36  ;;  %vm4602_vm10 = vcmask 7168  }
   0x3   :  { %4929 = vmatprep.mubr.msk.f32.mxu0 %vm67_vm0, %v43_v2  ;;  %4935 = vmatprep.subr.mxu1 %v50_v0  ;;  %v39_v5 = vld [vmem:[%s6876_s1] sm:$0xff]  ;;  %v5529_v7 = vld [vmem:[%s6875_s3 + $0x50] ss:$8 sps:$4 sm:$0xff]   ;;  %v5082_v8 = vld [vmem:[%s6875_s3 + $0x54] ss:$8 sps:$4 sm:$0xff]  }
   0x4   :  { %4936 = vmatpush3.msra.mxu1 %v50_v0  ;;  %4943 = vmatprep.mubr.msk.f32.mxu1 %vm67_vm0, %v39_v5  ;;  %v40_v9 = vld [vmem:[%s6876_s1 + $0x8] sm:$0xff]  ;;  %v41_v11 = vld [vmem:[%s6876_s1 + $0x10] sm:$0xff]  ;;  %v42_v15 = vld [vmem:[%s6876_s1 + $0x18] sm:$0xff]  ;;  %v5609_v44 = vsub.s32 0, %v294_v38  ;;  %v5611_v46 = vsub.s32 1, %v294_v38  ;;  %vm23_vm2 = vcmp.ge.s32.totalorder %v19_v59, 64 }
   0x5   :  { %4937 = vmatprep.subr.mxu1 %v49_v3  ;;  %v5085_v10 = vld [vmem:[%s6875_s3 + $0x44] ss:$8 sps:$4 sm:$0xff]   ;;  %v5083_v12 = vld [vmem:[%s6875_s3 + $0x40] ss:$8 sps:$4 sm:$0xff]   ;;  %v5088_v13 = vld [vmem:[%s6875_s3 + $0x34] ss:$8 sps:$4 sm:$0xff]  }
   0x6   :  { %59 = vrot.lane.b32.xlu0 %v49_v3, %s5475_s19  ;;  %55 = vrot.lane.b32.xlu1 %v47_v4, %s5475_s19  ;;  %v5086_v14 = vld [vmem:[%s6875_s3 + $0x30] ss:$8 sps:$4 sm:$0xff]   ;;  %v5091_v16 = vld [vmem:[%s6875_s3 + $0x24] ss:$8 sps:$4 sm:$0xff]   ;;  %vm25_vm3 = vcmp.lt.s32.totalorder %v19_v59, 96  ;;  %vm21_vm4 = vcmp.lt.s32.totalorder %v19_v59, 32 }
   0x7   :  { %4938 = vmatpush3.msra.mxu1 %v49_v3  ;;  %v5089_v17 = vld [vmem:[%s6875_s3 + $0x20] ss:$8 sps:$4 sm:$0xff]   ;;  %v45_v28 = vld [vmem:[%s6874_s2 + $0x10] sm:$0xff]  ;;  %v46_v30 = vld [vmem:[%s6874_s2 + $0x18] sm:$0xff] }
   0x8   :  { %4939 = vmatprep.subr.mxu1 %v48_v1  ;;  %v5572_v18 = vld [vmem:[%s6875_s3] sm:$0x77]  ;;  %v44_v27 = vld [vmem:[%s6874_s2 + $0x8] sm:$0xff]  ;;  %v270_v57 = vld [vmem:[%s6875_s3 + $0x10] sm:$0x11] }
   0x9   :  { %4940 = vmatpush3.msra.mxu1 %v48_v1  ;;  %v4619_v21 = vcombine.low %v5572_v18, %v5572_v18  ;;  %v4620_v22 = vcombine.high %v5572_v18, %v5572_v18  ;;  %v275_v43 = vunpack.c.l.bf16 %v5572_v18  ;;  %v276_v47 = vunpack.c.h.bf16 %v5572_v18  ;;  %vm27_vm5 = vmand %vm23_vm2, %vm25_vm3 }
   0xa   :  { %4941 = vmatprep.subr.mxu1 %v47_v4  ;;  %278 = vperm.xlu0 %5074, %v47_v4   ;;  %vm5663_vm6 = vmor %vm21_vm4, %vm27_vm5 }
   0xb   :  { %4942 = vmatpush3.msra.mxu1 %v47_v4  ;;  %282 = vperm.xlu1 %5075, %v48_v1   ;;  %v358_v24 = vrot.slane %v4619_v21, 1  ;;  %v359_v26 = vrot.slane %v4620_v22, 1  ;;  %v296_v50 = vrot.slane %v275_v43, %v5609_v44  ;;  %v332_v51 = vrot.slane %v275_v43, %v5611_v46 }
   0xc   :  { %516 = vmatprep.subr.bf16.mxu1 %v5082_v8  ;;  %4944 = vmatmul.mubr.msk.f32.vlgmr.msra.gmra.mxu1 %vm67_vm0, %v40_v9  ;;  %v336_v52 = vrot.slane %v276_v47, %v5611_v46  ;;  %v300_v55 = vrot.slane %v276_v47, %v5609_v44 }
   0xd   :  { %517 = vmatpush1.bf16.msra.mxu1 %v5529_v7  ;;  %4946 = vmatprep.mubr.msk.f32.mxu1 %vm67_vm0, %v41_v11  ;;  %v366_v29 = vsel %vm364_vm1, %v358_v24, 0 }
   0xe   :  { %518 = vmatprep.subr.bf16.mxu1 %v5085_v10  ;;  %290 = vperm.xlu0 %5074, %v50_v0  }
   0xf   :  { %286 = vperm.xlu1 %5075, %v49_v3  }
  0x10   :  { %4947 = vmatmul.mubr.msk.f32.gmra.mxu1 %vm67_vm0, %v42_v15 }
  0x11   :  { %519 = vmatpush1.bf16.msra.mxu1 %v5083_v12  ;;  %540 = vmatprep.mubr.bf16.mxu1 %v5476_v6 }
  0x12   :  { %520 = vmatprep.subr.bf16.mxu1 %v5088_v13 }
  0x15   :  { %521 = vmatpush1.bf16.msra.mxu1 %v5086_v14 }
  0x16   :  { %522 = vmatprep.subr.bf16.mxu1 %v5091_v16 }
  0x19   :  { %523 = vmatpush1.bf16.msra.mxu1 %v5089_v17 }
  0x1c   :  { %541 = vmatmul.mubr.bf16.vlgmr.msra.gmra.mxu1 %v5476_v6 }
  0x1d   :  { %771 = vmatprep.mubr.bf16.mxu1 %v5476_v6 }
  0x74   :  { %v62_v19 = vpop.permute.xlu0 %61  ;;  %v58_v20 = vpop.permute.xlu1 %57 }
  0x75   :  { %4921 = vmatprep.subr.mxu0 %v62_v19 }
  0x76   :  { %4922 = vmatpush3.msra.mxu0 %v62_v19 }
  0x78   :  { %v60_v23 = vpop.permute.xlu0 %59  ;;  %v56_v25 = vpop.permute.xlu1 %55 }
  0x79   :  { %4923 = vmatprep.subr.mxu0 %v60_v23 }
  0x7a   :  { %4924 = vmatpush3.msra.mxu0 %v60_v23 }
  0x7b   :  { %4925 = vmatprep.subr.mxu0 %v58_v20 }
  0x7c   :  { %4926 = vmatpush3.msra.mxu0 %v58_v20 }
  0x7d   :  { %4927 = vmatprep.subr.mxu0 %v56_v25 }
  0x7e   :  { %4928 = vmatpush3.msra.mxu0 %v56_v25  ;;  %v5654_v25 = vadd.s32 128, %v19_v59 }
  0x7f   :  { %4930 = vmatmul.mubr.msk.f32.vlgmr.msra.gmra.mxu0 %vm67_vm0, %v44_v27  ;;  %4621 = vmatprep.subr.msk.bf16.mxu0 %vm364_vm1, %v359_v26 }
  0x80   :  { %4932 = vmatprep.mubr.msk.f32.mxu0 %vm67_vm0, %v45_v28  ;;  %386 = vmatpush1.bf16.msra.mxu0 %v366_v29  ;;  %vm34_vm7 = vcmp.lt.s32.totalorder %v5654_v25, 160 }
  0x81   :  { %607 = vmatprep.subr.bf16.mxu0 %v5082_v8 }
  0x83   :  { %4933 = vmatmul.mubr.msk.f32.gmra.mxu0 %vm67_vm0, %v46_v30 }
  0x84   :  { %403 = vmatprep.mubr.bf16.mxu0 %v5476_v6 }
  0x85   :  { %v5602_v40 = vpop.permute.xlu0 %278 }
  0x86   :  { %v5606_v42 = vpop.permute.xlu1 %282  ;;  %v301_v60 = vmul.f32 %v296_v50, %v5602_v40  ;;  %v302_v2 = vmul.f32 %v300_v55, %v5602_v40 }
  0x87   :  { %404 = vmatmul.mubr.bf16.vlgmr.msra.gmra.mxu0 %v5476_v6  ;;  %v303_v61 = vmul.f32 %v296_v50, %v5606_v42  ;;  %v304_v3 = vmul.f32 %v300_v55, %v5606_v42 }
  0x88   :  { %413 = vmatprep.mubr.bf16.mxu0 %v5476_v6  ;;  %608 = vmatpush1.bf16.msra.mxu0 %v5529_v7  ;;  %v271_v7 = vunpack.c.l.bf16 %v270_v57 }
  0x89   :  { %609 = vmatprep.subr.bf16.mxu0 %v5085_v10  ;;  %v5616_v49 = vpop.permute.xlu0 %290 }
  0x8a   :  { %v5624_v56 = vpop.permute.xlu1 %286  ;;  %v308_v20 = vmul.f32 %v300_v55, %v5616_v49  ;;  %v435_v22 = vrot.slane %v271_v7, %v5609_v44 }
  0x8b   :  { %v305_v4 = vmul.f32 %v296_v50, %v5624_v56  ;;  %v306_v8 = vmul.f32 %v300_v55, %v5624_v56 }
  0x8c   :  { %610 = vmatpush1.bf16.msra.mxu0 %v5083_v12 }
  0x8d   :  { %611 = vmatprep.subr.bf16.mxu0 %v5088_v13 }
  0x8f   :  { %414 = vmatmul.mubr.bf16.gmra.mxu0 %v5476_v6 }
  0x90   :  { %612 = vmatpush1.bf16.msra.mxu0 %v5086_v14  ;;  %631 = vmatprep.mubr.bf16.mxu0 %v5476_v6  ;;  %v272_v14 = vunpack.c.h.bf16 %v270_v57 }
  0x91   :  { %613 = vmatprep.subr.bf16.mxu0 %v5091_v16  ;;  %v307_v16 = vmul.f32 %v296_v50, %v5616_v49 }
  0x94   :  { %614 = vmatpush1.bf16.msra.mxu0 %v5089_v17 }
  0xcc   :  { %v5604_v41 = vpop.f32.mrf.mxu1 }
  0xce   :  { %v5614_v48 = vpop.f32.mrf.mxu1 }
  0xd0   :  { %v5621_v54 = vpop.f32.mrf.mxu1 }
  0xd2   :  { %v5635_v1 = vpop.f32.mrf.mxu1 }
  0xdc   :  { %v542_v19 = vpop.f32.mrf.mxu1 }
  0xde   :  { %v544_v43 = vpop.f32.mrf.mxu1 }
 0x13f   :  { %v4931_v31 = vpop.f32.mrf.mxu0 }
 0x140   :  { %316 = vperm.xlu0 %5074, %v4931_v31   ;;  %v439_v31 = vrot.slane %v272_v14, %v5609_v44 }
 0x141   :  { %v146_v32 = vpop.f32.mrf.mxu0 }
 0x142   :  { %311 = vperm.xlu1 %5075, %v146_v32  }
 0x143   :  { %v4934_v33 = vpop.f32.mrf.mxu0 }
 0x144   :  { %326 = vperm.xlu0 %5074, %v4934_v33  }
 0x145   :  { %v156_v34 = vpop.f32.mrf.mxu0 }
 0x146   :  { %321 = vperm.xlu1 %5075, %v156_v34  }
 0x147   :  { %v5598_v35 = vpop.f32.mrf.mxu0 }
 0x149   :  { %v5600_v37 = vpop.f32.mrf.mxu0 }
 0x14b   :  { %v409_v39 = vpop.f32.mrf.mxu0 }
 0x14d   :  { %v411_v45 = vpop.f32.mrf.mxu0 }
 0x14f   :  { %v415_v53 = vpop.f32.mrf.mxu0 }
 0x151   :  { %v417_v0 = vpop.f32.mrf.mxu0 }
 0x153   :  { %v419_v18 = vpop.f32.mrf.mxu0 }
 0x155   :  { %v421_v36 = vpop.f32.mrf.mxu0 }
 0x1bb   :  { %v5629_v58 = vpop.permute.xlu0 %316 }
 0x1bc   :  { %v339_v62 = vmul.f32 %v332_v51, %v5629_v58  ;;  %v340_v63 = vmul.f32 %v336_v52, %v5629_v58 }
 0x1bd   :  { %v5640_v5 = vpop.permute.xlu1 %311 }
 0x1be   :  { %v347_v9 = vadd.f32 %v339_v62, %v303_v61  ;;  %v337_v10 = vmul.f32 %v332_v51, %v5640_v5  ;;  %v338_v11 = vmul.f32 %v336_v52, %v5640_v5  ;;  %v348_v12 = vadd.f32 %v340_v63, %v304_v3  ;;  %v546_v62 = vpop.f32.mrf.mxu1 }
 0x1bf   :  { %v5645_v13 = vpop.permute.xlu0 %326 }
 0x1c0   :  { %v345_v15 = vadd.f32 %v337_v10, %v301_v60  ;;  %v343_v17 = vmul.f32 %v332_v51, %v5645_v13  ;;  %v346_v21 = vadd.f32 %v338_v11, %v302_v2  ;;  %v344_v23 = vmul.f32 %v336_v52, %v5645_v13 }
 0x1c1   :  { %v5652_v24 = vpop.permute.xlu1 %321  ;;  %v426_v28 = vadd.f32 %v409_v39, %v347_v9  ;;  %v427_v29 = vadd.f32 %v411_v45, %v348_v12 }
 0x1c2   :  { %v351_v26 = vadd.f32 %v343_v17, %v307_v16  ;;  %v341_v27 = vmul.f32 %v332_v51, %v5652_v24  ;;  %v352_v30 = vadd.f32 %v344_v23, %v308_v20  ;;  %v342_v32 = vmul.f32 %v336_v52, %v5652_v24  ;;  %v273_v17 = vld [vmem:[%s6875_s3 + $0x60] sm:$0x1]  ;;  %v548_v20 = vpop.f32.mrf.mxu1 }
 0x1c3   :  { %v424_v33 = vadd.f32 %v5598_v35, %v345_v15  ;;  %v425_v47 = vadd.f32 %v5600_v37, %v346_v21  ;;  %v5670_v52 = vadd.f32 %v435_v22, %v426_v28  ;;  %v443_v60 = vadd.f32 %v439_v31, %v427_v29 }
 0x1c4   :  { %v430_v34 = vadd.f32 %v419_v18, %v351_v26  ;;  %v349_v38 = vadd.f32 %v341_v27, %v305_v4  ;;  %v431_v50 = vadd.f32 %v421_v36, %v352_v30  ;;  %v350_v39 = vadd.f32 %v342_v32, %v306_v8 }
 0x1c5   :  { %v5672_v61 = vadd.f32 %v435_v22, %v424_v33  ;;  %v441_v63 = vadd.f32 %v439_v31, %v425_v47  ;;  %v460_v18 = vunpack.c.l.bf16 %v273_v17 }
 0x1c6   :  { %v5667_v45 = vadd.f32 %v435_v22, %v430_v34  ;;  %v428_v51 = vadd.f32 %v415_v53, %v349_v38  ;;  %v447_v35 = vadd.f32 %v439_v31, %v431_v50  ;;  %v429_v57 = vadd.f32 %v417_v0, %v350_v39 }
 0x1c8   :  { %v5674_v37 = vadd.f32 %v435_v22, %v428_v51  ;;  %v454_v59 = vsel %vm5663_vm6, %v5670_v52, %v5667_v45  ;;  %v458_v53 = vsel %vm5663_vm6, %v5667_v45, %v5670_v52  ;;  %v445_v2 = vadd.f32 %v439_v31, %v429_v57 }
 0x1c9   :  { %v552_v3 = vadd.f32 %v546_v62, %v454_v59  ;;  %v5686_v0 = vsel %vm34_vm7, %v447_v35, %v443_v60  ;;  %v455_v28 = vsel %vm34_vm7, %v443_v60, %v447_v35  ;;  %v5097_v62 = vld [vmem:[%s6875_s3 + $0x74] ss:$8 sps:$4 sm:$0xff]  }
 0x1ca   :  { %v452_v4 = vsel %vm5663_vm6, %v5672_v61, %v5674_v37  ;;  %v456_v7 = vsel %vm5663_vm6, %v5674_v37, %v5672_v61  ;;  %v5698_v10 = vsel %vm34_vm7, %v445_v2, %v441_v63  ;;  %v453_v31 = vsel %vm34_vm7, %v441_v63, %v445_v2  ;;  %v5092_v37 = vld [vmem:[%s6875_s3 + $0x80] ss:$8 sps:$4 sm:$0xff]   ;;  %v5095_v63 = vld [vmem:[%s6875_s3 + $0x70] ss:$8 sps:$4 sm:$0xff]  }
 0x1cb   :  { %v551_v8 = vadd.f32 %v542_v19, %v452_v4  ;;  %v4631_v9 = vmul.f32 -1.442695, %v552_v3  ;;  %v5704_v19 = vrot.slane %v460_v18, %v5609_v44 }
 0x1cd   :  { %v4630_v11 = vmul.f32 -1.442695, %v551_v8  ;;  %5246 = vpow2.f32 %v4631_v9  ;;  %v566_v21 = vadd.f32 %v548_v20, %v5704_v19  ;;  %v565_v23 = vadd.f32 %v544_v43, %v5704_v19  ;;  %v5094_v43 = vld [vmem:[%s6875_s3 + $0x84] ss:$8 sps:$4 sm:$0xff]  }
 0x1ce   :  { %829 = vmatprep.subr.bf16.mxu0 %v5094_v43  ;;  %v5109_v43 = vld [vmem:[%s6875_s3 + $0xe4] ss:$8 sps:$4 sm:$0xff]  }
 0x1cf   :  { %5248 = vpow2.f32 %v4630_v11 }
 0x1da   :  { %v5247_v12 = vpop.eup %5246 }
 0x1db   :  { %v560_v14 = vadd.f32 1.0, %v5247_v12 }
 0x1dc   :  { %v5249_v15 = vpop.eup %5248 }
 0x1dd   :  { %v559_v16 = vadd.f32 1.0, %v5249_v15  ;;  %5250 = vrcp.f32 %v560_v14 }
 0x1df   :  { %5252 = vrcp.f32 %v559_v16 }
 0x1ea   :  { %v5251_v22 = vpop.eup %5250 }
 0x1eb   :  { %v568_v26 = vmul.f32 %v5251_v22, %v566_v21 }
 0x1ec   :  { %v5253_v27 = vpop.eup %5252 }
 0x1ed   :  { %v567_v29 = vmul.f32 %v5253_v27, %v565_v23  ;;  %v570_v30 = vadd.f32 %v568_v26, %v455_v28 }
 0x1ef   :  { %v569_v32 = vadd.f32 %v567_v29, %v453_v31  ;;  %5254 = vtanh.f32 %v570_v30 }
 0x1f1   :  { %5256 = vtanh.f32 %v569_v32  ;;  %v5101_v32 = vld [vmem:[%s6875_s3 + $0x90] ss:$8 sps:$4 sm:$0xff]  }
 0x1fc   :  { %v5255_v33 = vpop.eup %5254 }
 0x1fd   :  { %v574_v34 = vsub.f32 0.0, %v5255_v33 }
 0x1fe   :  { %v5257_v36 = vpop.eup %5256 }
 0x1ff   :  { %579 = vrot.lane.b32.xlu0 %v574_v34, %s5477_s10  ;;  %v573_v38 = vsub.f32 0.0, %v5257_v36 }
 0x201   :  { %577 = vrot.lane.b32.xlu1 %v573_v38, %s5477_s10  ;;  %v5104_v38 = vld [vmem:[%s6875_s3 + $0xf0] ss:$8 sps:$4 sm:$0xff]  }
 0x271   :  { %v580_v47 = vpop.permute.xlu0 %579 }
 0x272   :  { %v584_v50 = vmul.f32 %v5251_v22, %v580_v47  ;;  %v5107_v47 = vld [vmem:[%s6875_s3 + $0xe0] ss:$8 sps:$4 sm:$0xff]  }
 0x273   :  { %v578_v39 = vpop.permute.xlu1 %577 }
 0x274   :  { %v583_v51 = vmul.f32 %v5253_v27, %v578_v39  ;;  %589 = vrot.lane.b32.xlu0 %v584_v50, %s5477_s10  ;;  %v5112_v39 = vld [vmem:[%s6875_s3 + $0xd4] ss:$8 sps:$4 sm:$0xff]  }
 0x276   :  { %587 = vrot.lane.b32.xlu1 %v583_v51, %s5477_s10 }
 0x2e6   :  { %v590_v35 = vpop.permute.xlu0 %589 }
 0x2e7   :  { %v594_v60 = vadd.f32 %v5255_v33, %v590_v35  ;;  %v5110_v35 = vld [vmem:[%s6875_s3 + $0xd0] ss:$8 sps:$4 sm:$0xff]  }
 0x2e8   :  { %v588_v57 = vpop.permute.xlu1 %587 }
 0x2e9   :  { %v593_v61 = vadd.f32 %v5257_v36, %v588_v57  ;;  %v5106_v36 = vld [vmem:[%s6875_s3 + $0xf4] ss:$8 sps:$4 sm:$0xff]  }
 0x2eb   :  { %v595_v59 = vpack.c.bf16 %v594_v60, %v593_v61 }
 0x2ed   :  { %4632 = vmatmul.mubr.msk.bf16.vlgmr.msra.gmra.mxu0 %vm505_vm8, %v595_v59 }
 0x2ee   :  { %830 = vmatpush1.bf16.msra.mxu0 %v5092_v37  ;;  %849 = vmatprep.mubr.bf16.mxu0 %v5476_v6 }
 0x2ef   :  { %831 = vmatprep.subr.bf16.mxu0 %v5097_v62 }
 0x2f2   :  { %832 = vmatpush1.bf16.msra.mxu0 %v5095_v63 }
 0x2f3   :  { %1038 = vmatprep.subr.bf16.mxu0 %v5106_v36 }
 0x2f5   :  { %4645 = vmatmul.mubr.msk.bf16.vlgmr.msra.gmra.mxu0 %vm67_vm0, %v595_v59 }
 0x2f6   :  { %859 = vmatprep.mubr.bf16.mxu0 %v5476_v6  ;;  %1039 = vmatpush1.bf16.msra.mxu0 %v5104_v38 }
 0x2f7   :  { %1040 = vmatprep.subr.bf16.mxu0 %v5109_v43 }
 0x2fa   :  { %1041 = vmatpush1.bf16.msra.mxu0 %v5107_v47 }
 0x2fb   :  { %1042 = vmatprep.subr.bf16.mxu0 %v5112_v39 }
 0x2fe   :  { %1043 = vmatpush1.bf16.msra.mxu0 %v5110_v35 }
 0x3ad   :  { %v633_v2 = vpop.f32.mrf.mxu0 }
 0x3ae   :  { %v642_v3 = vadd.f32 %v633_v2, %v456_v7 }
 0x3af   :  { %v635_v4 = vpop.f32.mrf.mxu0 }
 0x3b0   :  { %v4633_v8 = vmul.f32 -1.442695, %v642_v3  ;;  %v656_v7 = vadd.f32 %v635_v4, %v5704_v19 }
 0x3b1   :  { %v637_v9 = vpop.f32.mrf.mxu0 }
 0x3b2   :  { %5258 = vpow2.f32 %v4633_v8  ;;  %v643_v11 = vadd.f32 %v637_v9, %v458_v53  ;;  %v694_v9 = vld [vmem:[%s6875_s3 + $0xb0] sm:$0x11] }
 0x3b3   :  { %v639_v20 = vpop.f32.mrf.mxu0 }
 0x3b4   :  { %v4634_v12 = vmul.f32 -1.442695, %v643_v11  ;;  %v657_v23 = vadd.f32 %v639_v20, %v5704_v19  ;;  %v5100_v19 = vld [vmem:[%s6875_s3 + $0xa4] ss:$8 sps:$4 sm:$0xff]  }
 0x3b5   :  { %751 = vmatprep.subr.bf16.mxu1 %v5100_v19  ;;  %v851_v2 = vpop.f32.mrf.mxu0 }
 0x3b6   :  { %5260 = vpow2.f32 %v4634_v12 }
 0x3b7   :  { %v853_v3 = vpop.f32.mrf.mxu0 }
 0x3b9   :  { %v855_v4 = vpop.f32.mrf.mxu0 }
 0x3bb   :  { %v857_v8 = vpop.f32.mrf.mxu0 }
 0x3bf   :  { %v5259_v14 = vpop.eup %5258 }
 0x3c0   :  { %v650_v15 = vadd.f32 1.0, %v5259_v14 }
 0x3c2   :  { %5262 = vrcp.f32 %v650_v15  ;;  %v695_v15 = vunpack.c.l.bf16 %v694_v9 }
 0x3c3   :  { %v5261_v16 = vpop.eup %5260 }
 0x3c4   :  { %v651_v17 = vadd.f32 1.0, %v5261_v16  ;;  %v696_v16 = vunpack.c.h.bf16 %v694_v9 }
 0x3c6   :  { %5264 = vrcp.f32 %v651_v17 }
 0x3cf   :  { %v5263_v18 = vpop.eup %5262 }
 0x3d0   :  { %v658_v21 = vmul.f32 %v5263_v18, %v656_v7 }
 0x3d2   :  { %v660_v22 = vadd.f32 %v658_v21, %v5698_v10  ;;  %v5098_v10 = vld [vmem:[%s6875_s3 + $0xa0] ss:$8 sps:$4 sm:$0xff]   ;;  %v873_v21 = vrot.slane %v695_v15, %v5609_v44 }
 0x3d3   :  { %v5265_v26 = vpop.eup %5264  ;;  %752 = vmatpush1.bf16.msra.mxu1 %v5098_v10 }
 0x3d4   :  { %5266 = vtanh.f32 %v660_v22  ;;  %v659_v45 = vmul.f32 %v5265_v26, %v657_v23  ;;  %v877_v23 = vrot.slane %v696_v16, %v5609_v44 }
 0x3d6   :  { %v661_v52 = vadd.f32 %v659_v45, %v5686_v0  ;;  %v5103_v0 = vld [vmem:[%s6875_s3 + $0x94] ss:$8 sps:$4 sm:$0xff]  }
 0x3d7   :  { %753 = vmatprep.subr.bf16.mxu1 %v5103_v0 }
 0x3d8   :  { %5268 = vtanh.f32 %v661_v52  ;;  %754 = vmatpush1.bf16.msra.mxu1 %v5101_v32 }
 0x3d9   :  { %947 = vmatprep.subr.bf16.mxu1 %v5106_v36 }
 0x3e1   :  { %v5267_v53 = vpop.eup %5266 }
 0x3e2   :  { %v664_v27 = vsub.f32 %v593_v61, %v5267_v53  ;;  %v5115_v61 = vld [vmem:[%s6875_s3 + $0xc4] ss:$8 sps:$4 sm:$0xff]  }
 0x3e3   :  { %1044 = vmatprep.subr.bf16.mxu0 %v5115_v61 }
 0x3e4   :  { %668 = vrot.lane.b32.xlu1 %v664_v27, %s5477_s10 }
 0x3e5   :  { %v5269_v28 = vpop.eup %5268 }
 0x3e6   :  { %v665_v29 = vsub.f32 %v594_v60, %v5269_v28 }
 0x3e8   :  { %670 = vrot.lane.b32.xlu0 %v665_v29, %s5477_s10 }
 0x456   :  { %v669_v30 = vpop.permute.xlu1 %668 }
 0x457   :  { %v674_v31 = vmul.f32 %v5263_v18, %v669_v30 }
 0x459   :  { %678 = vrot.lane.b32.xlu1 %v674_v31, %s5477_s10 }
 0x45a   :  { %v671_v33 = vpop.permute.xlu0 %670 }
 0x45b   :  { %v675_v34 = vmul.f32 %v5265_v26, %v671_v33 }
 0x45d   :  { %680 = vrot.lane.b32.xlu0 %v675_v34, %s5477_s10 }
 0x461   :  { %711 = vrot.lane.b32.xlu0 %v595_v59, %s5478_s27  ;;  %v5113_v59 = vld [vmem:[%s6875_s3 + $0xc0] ss:$8 sps:$4 sm:$0xff]  }
 0x462   :  { %1045 = vmatpush1.bf16.msra.mxu0 %v5113_v59 }
 0x4cb   :  { %v679_v50 = vpop.permute.xlu1 %678 }
 0x4cc   :  { %v684_v57 = vadd.f32 %v5267_v53, %v679_v50 }
 0x4cf   :  { %v681_v51 = vpop.permute.xlu0 %680 }
 0x4d0   :  { %v685_v60 = vadd.f32 %v5269_v28, %v681_v51 }
 0x4d2   :  { %v706_v37 = vpack.c.bf16 %v685_v60, %v684_v57 }
 0x4d3   :  { %v712_v63 = vpop.permute.xlu0 %711 }
 0x4d4   :  { %709 = vrot.lane.b32.xlu1 %v706_v37, %s5478_s27  ;;  %4646 = vmatmul.mubr.msk.bf16.gmra.mxu0 %vm67_vm0, %v706_v37 }
 0x4d5   :  { %1062 = vmatprep.mubr.bf16.mxu0 %v5476_v6 }
 0x546   :  { %v710_v62 = vpop.permute.xlu1 %709 }
 0x547   :  { %4639 = vmatmul.mubr.msk.bf16.vlgmr.msra.gmra.mxu1 %vm67_vm0, %v710_v62 }
 0x548   :  { %948 = vmatpush1.bf16.msra.mxu1 %v5104_v38  ;;  %781 = vmatprep.mubr.bf16.mxu1 %v5476_v6 }
 0x549   :  { %949 = vmatprep.subr.bf16.mxu1 %v5109_v43 }
 0x54c   :  { %950 = vmatpush1.bf16.msra.mxu1 %v5107_v47 }
 0x54d   :  { %951 = vmatprep.subr.bf16.mxu1 %v5112_v39 }
 0x54f   :  { %4640 = vmatmul.mubr.msk.bf16.gmra.mxu1 %vm67_vm0, %v712_v63 }
 0x550   :  { %952 = vmatpush1.bf16.msra.mxu1 %v5110_v35  ;;  %971 = vmatprep.mubr.bf16.mxu1 %v5476_v6 }
 0x551   :  { %953 = vmatprep.subr.bf16.mxu1 %v5115_v61 }
 0x554   :  { %954 = vmatpush1.bf16.msra.mxu1 %v5113_v59 }
 0x557   :  { %972 = vmatmul.mubr.bf16.vlgmr.msra.gmra.mxu1 %v5476_v6 }
 0x594   :  { %v861_v12 = vpop.f32.mrf.mxu0 }
 0x596   :  { %v863_v7 = vpop.f32.mrf.mxu0 }
 0x598   :  { %v865_v52 = vpop.f32.mrf.mxu0 }
 0x59a   :  { %v867_v34 = vpop.f32.mrf.mxu0 }
 0x607   :  { %v773_v11 = vpop.f32.mrf.mxu1 }
 0x608   :  { %v852_v20 = vadd.f32 %v851_v2, %v773_v11 }
 0x609   :  { %v775_v14 = vpop.f32.mrf.mxu1 }
 0x60a   :  { %v854_v22 = vadd.f32 %v853_v3, %v775_v14  ;;  %v5795_v27 = vadd.f32 %v873_v21, %v852_v20 }
 0x60b   :  { %v777_v17 = vpop.f32.mrf.mxu1 }
 0x60c   :  { %v856_v28 = vadd.f32 %v855_v4, %v777_v17  ;;  %v879_v19 = vadd.f32 %v877_v23, %v854_v22 }
 0x60d   :  { %v779_v18 = vpop.f32.mrf.mxu1 }
 0x60e   :  { %v858_v30 = vadd.f32 %v857_v8, %v779_v18  ;;  %v5803_v38 = vadd.f32 %v873_v21, %v856_v28 }
 0x60f   :  { %v783_v26 = vpop.f32.mrf.mxu1 }
 0x610   :  { %v862_v45 = vadd.f32 %v861_v12, %v783_v26  ;;  %v881_v35 = vadd.f32 %v877_v23, %v858_v30  ;;  %v697_v12 = vld [vmem:[%s6875_s3 + $0x100] sm:$0x1] }
 0x611   :  { %v785_v53 = vpop.f32.mrf.mxu1  ;;  %v894_v15 = vunpack.c.l.bf16 %v697_v12 }
 0x612   :  { %v5797_v29 = vadd.f32 %v873_v21, %v862_v45  ;;  %v864_v10 = vadd.f32 %v863_v7, %v785_v53 }
 0x613   :  { %v787_v0 = vpop.f32.mrf.mxu1  ;;  %v898_v16 = vrot.slane %v894_v15, %v5609_v44 }
 0x614   :  { %v883_v31 = vadd.f32 %v877_v23, %v864_v10  ;;  %v866_v32 = vadd.f32 %v865_v52, %v787_v0  ;;  %v890_v33 = vsel %vm5663_vm6, %v5797_v29, %v5795_v27  ;;  %v886_v39 = vsel %vm5663_vm6, %v5795_v27, %v5797_v29 }
 0x615   :  { %v789_v36 = vpop.f32.mrf.mxu1 }
 0x616   :  { %v5805_v43 = vadd.f32 %v873_v21, %v866_v32  ;;  %v868_v47 = vadd.f32 %v867_v34, %v789_v36  ;;  %v5809_v50 = vsel %vm34_vm7, %v883_v31, %v879_v19  ;;  %v887_v21 = vsel %vm34_vm7, %v879_v19, %v883_v31 }
 0x617   :  { %v973_v51 = vpop.f32.mrf.mxu1 }
 0x618   :  { %v885_v57 = vadd.f32 %v877_v23, %v868_v47  ;;  %v982_v60 = vadd.f32 %v973_v51, %v886_v39  ;;  %v892_v61 = vsel %vm5663_vm6, %v5805_v43, %v5803_v38  ;;  %v888_v63 = vsel %vm5663_vm6, %v5803_v38, %v5805_v43 }
 0x619   :  { %v975_v37 = vpop.f32.mrf.mxu1 }
 0x61a   :  { %v4655_v59 = vmul.f32 -1.442695, %v982_v60  ;;  %v5821_v62 = vsel %vm34_vm7, %v885_v57, %v881_v35  ;;  %v996_v17 = vadd.f32 %v975_v37, %v898_v16  ;;  %v889_v52 = vsel %vm34_vm7, %v881_v35, %v885_v57 }
 0x61b   :  { %v977_v2 = vpop.f32.mrf.mxu1 }
 0x61c   :  { %5270 = vpow2.f32 %v4655_v59  ;;  %v983_v3 = vadd.f32 %v977_v2, %v888_v63 }
 0x61d   :  { %v979_v18 = vpop.f32.mrf.mxu1 }
 0x61e   :  { %v4656_v4 = vmul.f32 -1.442695, %v983_v3  ;;  %v997_v23 = vadd.f32 %v979_v18, %v898_v16 }
 0x620   :  { %5272 = vpow2.f32 %v4656_v4 }
 0x629   :  { %v5271_v8 = vpop.eup %5270 }
 0x62a   :  { %v990_v9 = vadd.f32 1.0, %v5271_v8 }
 0x62c   :  { %5274 = vrcp.f32 %v990_v9 }
 0x62d   :  { %v5273_v11 = vpop.eup %5272 }
 0x62e   :  { %v991_v14 = vadd.f32 1.0, %v5273_v11 }
 0x630   :  { %5276 = vrcp.f32 %v991_v14 }
 0x639   :  { %v5275_v7 = vpop.eup %5274 }
 0x63a   :  { %v998_v20 = vmul.f32 %v5275_v7, %v996_v17 }
 0x63c   :  { %v1000_v22 = vadd.f32 %v998_v20, %v887_v21  ;;  %v5116_v21 = vld [vmem:[%s6875_s3 + $0x230] ss:$8 sps:$4 sm:$0xff]  }
 0x63d   :  { %v5277_v26 = vpop.eup %5276  ;;  %4957 = vmatprep.subr.bf16.mxu0 %v5116_v21 }
 0x63e   :  { %5278 = vtanh.f32 %v1000_v22  ;;  %v999_v45 = vmul.f32 %v5277_v26, %v997_v23 }
 0x640   :  { %v1001_v53 = vadd.f32 %v999_v45, %v889_v52  ;;  %v5119_v45 = vld [vmem:[%s6875_s3 + $0x240] ss:$8 sps:$4 sm:$0xff]   ;;  %v5479_v52 = vmov 1  }
 0x642   :  { %5280 = vtanh.f32 %v1001_v53  ;;  %v5454_v53 = vld [vmem:[%s6873_s0 + $0x8] sm:$0xff] }
 0x64b   :  { %v5279_v28 = vpop.eup %5278 }
 0x64c   :  { %v1004_v10 = vsub.f32 0.0, %v5279_v28 }
 0x64e   :  { %1008 = vrot.lane.b32.xlu1 %v1004_v10, %s5477_s10 }
 0x64f   :  { %v5281_v0 = vpop.eup %5280 }
 0x650   :  { %v1005_v30 = vsub.f32 0.0, %v5281_v0 }
 0x652   :  { %1010 = vrot.lane.b32.xlu0 %v1005_v30, %s5477_s10  ;;  %v5455_v30 = vld [vmem:[%s6873_s0] sm:$0xff] }
 0x6c0   :  { %v1009_v32 = vpop.permute.xlu1 %1008 }
 0x6c1   :  { %v1014_v19 = vmul.f32 %v5275_v7, %v1009_v32  ;;  %v5456_v32 = vld [vmem:[%s6873_s0 + $0x10] sm:$0xff] }
 0x6c3   :  { %1018 = vrot.lane.b32.xlu1 %v1014_v19, %s5477_s10  ;;  %v5457_v19 = vld [vmem:[%s6873_s0 + $0x18] sm:$0xff] }
 0x6c4   :  { %v1011_v31 = vpop.permute.xlu0 %1010 }
 0x6c5   :  { %v1015_v34 = vmul.f32 %v5277_v26, %v1011_v31  ;;  %v5118_v26 = vld [vmem:[%s6875_s3 + $0x250] ss:$8 sps:$4 sm:$0xff]  }
 0x6c6   :  { %4949 = vmatprep.subr.bf16.mxu1 %v5118_v26 }
 0x6c7   :  { %1020 = vrot.lane.b32.xlu0 %v1015_v34, %s5477_s10  ;;  %4950 = vmatpush3.bf16.msra.mxu1 %v5118_v26 }
 0x6c8   :  { %4951 = vmatprep.subr.bf16.mxu1 %v5119_v45 }
 0x6cb   :  { %4952 = vmatpush3.bf16.msra.mxu1 %v5119_v45 }
 0x735   :  { %v1019_v36 = vpop.permute.xlu1 %1018 }
 0x736   :  { %v1024_v43 = vadd.f32 %v5279_v28, %v1019_v36  ;;  %v3532_v36 = vld [vmem:[%s6875_s3 + $0x3d0] sm:$0x77] }
 0x739   :  { %v1021_v38 = vpop.permute.xlu0 %1020 }
 0x73a   :  { %v1025_v47 = vadd.f32 %v5281_v0, %v1021_v38 }
 0x73c   :  { %v1026_v39 = vpack.c.bf16 %v1025_v47, %v1024_v43 }
 0x73e   :  { %4657 = vmatmul.mubr.msk.bf16.vlgmr.msra.gmra.mxu0 %vm505_vm8, %v1026_v39 }
 0x73f   :  { %4961 = vmatprep.mubr.msk.bf16.mxu0 %vm67_vm0, %v1026_v39  ;;  %4958 = vmatpush3.bf16.msra.mxu0 %v5116_v21 }
 0x7fe   :  { %v1064_v51 = vpop.f32.mrf.mxu0 }
 0x7ff   :  { %v1073_v35 = vadd.f32 %v1064_v51, %v890_v33 }
 0x800   :  { %v1066_v57 = vpop.f32.mrf.mxu0 }
 0x801   :  { %v4658_v60 = vmul.f32 -1.442695, %v1073_v35  ;;  %v1087_v9 = vadd.f32 %v1066_v57, %v898_v16 }
 0x802   :  { %v1068_v37 = vpop.f32.mrf.mxu0 }
 0x803   :  { %5282 = vpow2.f32 %v4658_v60  ;;  %v1074_v59 = vadd.f32 %v1068_v37, %v892_v61 }
 0x804   :  { %v1070_v12 = vpop.f32.mrf.mxu0 }
 0x805   :  { %v4659_v63 = vmul.f32 -1.442695, %v1074_v59  ;;  %v1088_v29 = vadd.f32 %v1070_v12, %v898_v16 }
 0x807   :  { %5284 = vpow2.f32 %v4659_v63 }
 0x810   :  { %v5283_v2 = vpop.eup %5282 }
 0x811   :  { %v1081_v3 = vadd.f32 1.0, %v5283_v2 }
 0x813   :  { %5286 = vrcp.f32 %v1081_v3 }
 0x814   :  { %v5285_v4 = vpop.eup %5284 }
 0x815   :  { %v1082_v8 = vadd.f32 1.0, %v5285_v4 }
 0x817   :  { %5288 = vrcp.f32 %v1082_v8 }
 0x820   :  { %v5287_v11 = vpop.eup %5286 }
 0x821   :  { %v1089_v14 = vmul.f32 %v5287_v11, %v1087_v9 }
 0x823   :  { %v1091_v27 = vadd.f32 %v1089_v14, %v5809_v50  ;;  %v5117_v50 = vld [vmem:[%s6875_s3 + $0x220] ss:$8 sps:$4 sm:$0xff]  }
 0x824   :  { %v5289_v33 = vpop.eup %5288  ;;  %4959 = vmatprep.subr.bf16.mxu0 %v5117_v50 }
 0x825   :  { %5290 = vtanh.f32 %v1091_v27  ;;  %v1090_v15 = vmul.f32 %v5289_v33, %v1088_v29  ;;  %4960 = vmatpush3.bf16.msra.mxu0 %v5117_v50 }
 0x827   :  { %v1092_v61 = vadd.f32 %v1090_v15, %v5821_v62 }
 0x829   :  { %5292 = vtanh.f32 %v1092_v61 }
 0x832   :  { %v5291_v17 = vpop.eup %5290 }
 0x833   :  { %v1095_v7 = vsub.f32 %v1024_v43, %v5291_v17  ;;  %v3533_v43 = vunpack.c.l.bf16 %v3532_v36 }
 0x835   :  { %1099 = vrot.lane.b32.xlu1 %v1095_v7, %s5477_s10  ;;  %v5901_v51 = vrot.slane %v3533_v43, %v5611_v46 }
 0x836   :  { %v5293_v18 = vpop.eup %5292 }
 0x837   :  { %v1096_v20 = vsub.f32 %v1025_v47, %v5293_v18  ;;  %v3534_v47 = vunpack.c.h.bf16 %v3532_v36  ;;  %v5460_v36 = vld [vmem:[%s6876_s1 + $0x10] sm:$0xff] }
 0x839   :  { %1101 = vrot.lane.b32.xlu0 %v1096_v20, %s5477_s10  ;;  %v5904_v35 = vrot.slane %v3534_v47, %v5609_v44  ;;  %v5907_v57 = vrot.slane %v3534_v47, %v5611_v46  ;;  %v5127_v47 = vld [vmem:[%s6875_s3 + $0x154] ss:$8 sps:$4 sm:$0xff]  }
 0x8a7   :  { %v1100_v62 = vpop.permute.xlu1 %1099 }
 0x8a8   :  { %v1105_v16 = vmul.f32 %v5287_v11, %v1100_v62  ;;  %v1125_v62 = vld [vmem:[%s6875_s3 + $0x260] sm:$0x1] }
 0x8aa   :  { %1109 = vrot.lane.b32.xlu1 %v1105_v16, %s5477_s10 }
 0x8ab   :  { %v1102_v22 = vpop.permute.xlu0 %1101 }
 0x8ac   :  { %v1106_v23 = vmul.f32 %v5289_v33, %v1102_v22  ;;  %v5940_v33 = vld [vmem:[%s6875_s3 + $0x110] sm:$0x77]  ;;  %v1126_v22 = vunpack.c.l.bf16 %v1125_v62  ;;  %v1368_v62 = vld [vmem:[%s6875_s3 + $0x120] sm:$0x11] }
 0x8ad   :  { %v4673_v15 = vcombine.high %v5940_v33, %v5940_v33  ;;  %v4672_v61 = vcombine.low %v5940_v33, %v5940_v33 }
 0x8ae   :  { %1111 = vrot.lane.b32.xlu0 %v1106_v23, %s5477_s10 }
 0x8af   :  { %v1458_v7 = vrot.slane %v4672_v61, 1 }
 0x8b1   :  { %v1467_v20 = vsel %vm364_vm1, %v1458_v7, 0 }
 0x8b2   :  { %1132 = vrot.lane.b32.xlu0 %v1026_v39, %s5478_s27  ;;  %v5898_v39 = vrot.slane %v3533_v43, %v5609_v44  ;;  %v5461_v43 = vld [vmem:[%s6876_s1 + $0x18] sm:$0xff] }
 0x8b6   :  { %1382 = vperm.xlu0 %5074, %v5604_v41  }
 0x8ba   :  { %1392 = vperm.xlu0 %5074, %v5621_v54  }
 0x8be   :  { %5077 = vset.pattern.permute.xlu0 %v5479_v52 }
 0x8bf   :  { %1416 = vperm.xlu0 %5077, %v5454_v53   ;;  %v1270_v53 = vrot.slane %v1126_v22, %v5609_v44 }
 0x91c   :  { %v1110_v41 = vpop.permute.xlu1 %1109 }
 0x91d   :  { %v1115_v28 = vadd.f32 %v5291_v17, %v1110_v41  ;;  %v1459_v17 = vrot.slane %v4673_v15, 1 }
 0x91f   :  { %4674 = vmatprep.subr.msk.bf16.mxu0 %vm364_vm1, %v1459_v17 }
 0x920   :  { %v1112_v54 = vpop.permute.xlu0 %1111 }
 0x921   :  { %v1116_v10 = vadd.f32 %v5293_v18, %v1112_v54  ;;  %v5122_v18 = vld [vmem:[%s6875_s3 + $0x164] ss:$8 sps:$4 sm:$0xff]  }
 0x923   :  { %v1127_v0 = vpack.c.bf16 %v1116_v10, %v1115_v28 }
 0x925   :  { %1130 = vrot.lane.b32.xlu1 %v1127_v0, %s5478_s27  ;;  %4962 = vmatmul.mubr.msk.bf16.vlgmr.msra.gmra.mxu0 %vm67_vm0, %v1127_v0 }
 0x926   :  { %1504 = vmatprep.mubr.bf16.mxu0 %v5476_v6  ;;  %1487 = vmatpush1.bf16.msra.mxu0 %v1467_v20  ;;  %v1373_v20 = vunpack.c.l.bf16 %v5940_v33 }
 0x927   :  { %1701 = vmatprep.subr.bf16.mxu0 %v5122_v18 }
 0x929   :  { %1377 = vperm.xlu1 %5075, %v5614_v48   ;;  %v1133_v48 = vpop.permute.xlu0 %1132 }
 0x92d   :  { %1387 = vperm.xlu1 %5075, %v5635_v1   ;;  %v5458_v1 = vld [vmem:[%s6876_s1] sm:$0xff] }
 0x931   :  { %5076 = vset.pattern.permute.xlu1 %v5479_v52  ;;  %v6007_v7 = vpop.permute.xlu0 %1382 }
 0x932   :  { %1412 = vperm.xlu1 %5076, %v5455_v30  }
 0x936   :  { %1420 = vperm.xlu1 %5076, %v5456_v32  }
 0x93a   :  { %1424 = vperm.xlu1 %5076, %v5457_v19  }
 0x997   :  { %v1131_v31 = vpop.permute.xlu1 %1130 }
 0x998   :  { %4953 = vmatprep.mubr.msk.bf16.mxu1 %vm67_vm0, %v1131_v31 }
 0x999   :  { %4954 = vmatmul.mubr.msk.bf16.vlgmr.msra.gmra.mxu1 %vm67_vm0, %v1133_v48  ;;  %v5120_v48 = vld [vmem:[%s6875_s3 + $0x160] ss:$8 sps:$4 sm:$0xff]  }
 0x99a   :  { %4973 = vmatprep.mubr.msk.f32.mxu1 %vm67_vm0, %v5458_v1  ;;  %v5459_v1 = vld [vmem:[%s6876_s1 + $0x8] sm:$0xff] }
 0x9a4   :  { %v5890_v34 = vpop.permute.xlu1 %1377 }
 0x9a5   :  { %v3543_v37 = vmul.f32 %v5898_v39, %v5890_v34  ;;  %v3544_v63 = vmul.f32 %v5904_v35, %v5890_v34 }
 0x9a8   :  { %v5895_v38 = vpop.permute.xlu1 %1387 }
 0x9a9   :  { %v3547_v9 = vmul.f32 %v5898_v39, %v5895_v38  ;;  %v3548_v12 = vmul.f32 %v5904_v35, %v5895_v38 }
 0x9ad   :  { %v5909_v60 = vpop.permute.xlu1 %1412 }
 0x9ae   :  { %v3559_v59 = vmul.f32 %v5901_v51, %v5909_v60  ;;  %v3560_v2 = vmul.f32 %v5907_v57, %v5909_v60 }
 0x9b0   :  { %v5919_v3 = vadd.f32 %v3559_v59, %v3543_v37  ;;  %v5921_v4 = vadd.f32 %v3560_v2, %v3544_v63  ;;  %v5125_v37 = vld [vmem:[%s6875_s3 + $0x150] ss:$8 sps:$4 sm:$0xff]   ;;  %v5128_v59 = vld [vmem:[%s6875_s3 + $0x140] ss:$8 sps:$4 sm:$0xff]   ;;  %v5130_v63 = vld [vmem:[%s6875_s3 + $0x144] ss:$8 sps:$4 sm:$0xff]  }
 0x9b1   :  { %v5923_v8 = vpop.permute.xlu1 %1420  ;;  %v5131_v2 = vld [vmem:[%s6875_s3 + $0x130] ss:$8 sps:$4 sm:$0xff]  }
 0x9b2   :  { %v3563_v11 = vmul.f32 %v5901_v51, %v5923_v8  ;;  %v3564_v14 = vmul.f32 %v5907_v57, %v5923_v8 }
 0x9b4   :  { %v5933_v27 = vadd.f32 %v3563_v11, %v3547_v9  ;;  %v5935_v29 = vadd.f32 %v3564_v14, %v3548_v12  ;;  %v5133_v9 = vld [vmem:[%s6875_s3 + $0x134] ss:$8 sps:$4 sm:$0xff]  }
 0x9e5   :  { %v4963_v21 = vpop.f32.mrf.mxu0 }
 0x9e7   :  { %v1252_v50 = vpop.f32.mrf.mxu0 }
 0x9e9   :  { %v4964_v23 = vpop.f32.mrf.mxu0 }
 0x9eb   :  { %v1255_v54 = vpop.f32.mrf.mxu0 }
 0xa59   :  { %v4955_v16 = vpop.f32.mrf.mxu1 }
 0xa5a   :  { %v1261_v52 = vadd.f32 %v4963_v21, %v4955_v16  ;;  %v1374_v21 = vunpack.c.h.bf16 %v5940_v33  ;;  %v1398_v16 = vrot.slane %v1373_v20, %v5609_v44 }
 0xa5b   :  { %v1186_v26 = vpop.f32.mrf.mxu1 }
 0xa5c   :  { %v1273_v30 = vadd.f32 %v1270_v53, %v1261_v52  ;;  %v1253_v32 = vadd.f32 %v1252_v50, %v1186_v26  ;;  %v1430_v50 = vrot.slane %v1373_v20, %v5611_v46  ;;  %v1402_v52 = vrot.slane %v1374_v21, %v5609_v44 }
 0xa5d   :  { %v4956_v45 = vpop.f32.mrf.mxu1 }
 0xa5e   :  { %v1264_v41 = vadd.f32 %v4964_v23, %v4956_v45  ;;  %v1271_v31 = vadd.f32 %v1270_v53, %v1253_v32  ;;  %v1434_v23 = vrot.slane %v1374_v21, %v5611_v46  ;;  %v1435_v26 = vmul.f32 %v1430_v50, %v5909_v60 }
 0xa5f   :  { %v1189_v28 = vpop.f32.mrf.mxu1  ;;  %v1405_v32 = vmul.f32 %v1398_v16, %v6007_v7 }
 0xa60   :  { %v1274_v10 = vadd.f32 %v1270_v53, %v1264_v41  ;;  %v1256_v0 = vadd.f32 %v1255_v54, %v1189_v28  ;;  %v6024_v41 = vpop.permute.xlu1 %1424  ;;  %v1369_v54 = vunpack.c.l.bf16 %v1368_v62  ;;  %v1403_v28 = vmul.f32 %v1398_v16, %v5890_v34 }
 0xa61   :  { %v1442_v21 = vmul.f32 %v1434_v23, %v6024_v41 }
 0xa62   :  { %4965 = vmatprep.subr.mxu1 %v1274_v10  ;;  %v1272_v19 = vadd.f32 %v1270_v53, %v1256_v0  ;;  %v1436_v53 = vmul.f32 %v1434_v23, %v5909_v60  ;;  %v1370_v0 = vunpack.c.h.bf16 %v1368_v62  ;;  %v1440_v60 = vmul.f32 %v1434_v23, %v5923_v8 }
 0xa63   :  { %4966 = vmatpush3.msra.mxu1 %v1274_v10  ;;  %v1439_v10 = vmul.f32 %v1430_v50, %v5923_v8 }
 0xa64   :  { %4967 = vmatprep.subr.mxu1 %v1273_v30 }
 0xa65   :  { %4968 = vmatpush3.msra.mxu1 %v1273_v30  ;;  %v1404_v30 = vmul.f32 %v1402_v52, %v5890_v34  ;;  %v1536_v34 = vrot.slane %v1369_v54, %v5609_v44 }
 0xa66   :  { %4969 = vmatprep.subr.mxu1 %v1272_v19 }
 0xa67   :  { %4970 = vmatpush3.msra.mxu1 %v1272_v19 }
 0xa68   :  { %4971 = vmatprep.subr.mxu1 %v1271_v31 }
 0xa69   :  { %4972 = vmatpush3.msra.mxu1 %v1271_v31  ;;  %v1443_v31 = vadd.f32 %v1435_v26, %v1403_v28 }
 0xa6a   :  { %4974 = vmatmul.mubr.msk.f32.vlgmr.msra.gmra.mxu1 %vm67_vm0, %v5459_v1  ;;  %1610 = vmatprep.subr.bf16.mxu1 %v5122_v18  ;;  %v6009_v18 = vpop.permute.xlu0 %1392  ;;  %v1407_v1 = vmul.f32 %v1398_v16, %v5895_v38 }
 0xa6b   :  { %4976 = vmatprep.mubr.msk.f32.mxu1 %vm67_vm0, %v5460_v36  ;;  %1611 = vmatpush1.bf16.msra.mxu1 %v5120_v48  ;;  %v1444_v36 = vadd.f32 %v1436_v53, %v1404_v30  ;;  %v1409_v8 = vmul.f32 %v1398_v16, %v6009_v18  ;;  %v1410_v54 = vmul.f32 %v1402_v52, %v6009_v18 }
 0xa6c   :  { %1612 = vmatprep.subr.bf16.mxu1 %v5127_v47 }
 0xa6e   :  { %4977 = vmatmul.mubr.msk.f32.gmra.mxu1 %vm67_vm0, %v5461_v43  ;;  %v6020_v45 = vpop.permute.xlu0 %1416  ;;  %v1406_v43 = vmul.f32 %v1402_v52, %v6007_v7 }
 0xa6f   :  { %1634 = vmatprep.mubr.bf16.mxu1 %v5476_v6  ;;  %1613 = vmatpush1.bf16.msra.mxu1 %v5125_v37 }
 0xa70   :  { %1614 = vmatprep.subr.bf16.mxu1 %v5130_v63 }
 0xa73   :  { %1615 = vmatpush1.bf16.msra.mxu1 %v5128_v59 }
 0xa74   :  { %1616 = vmatprep.subr.bf16.mxu1 %v5133_v9 }
 0xa77   :  { %1617 = vmatpush1.bf16.msra.mxu1 %v5131_v2 }
 0xa7a   :  { %1635 = vmatmul.mubr.bf16.vlgmr.msra.gmra.mxu1 %v5476_v6 }
 0xa7b   :  { %1865 = vmatprep.mubr.bf16.mxu1 %v5476_v6 }
 0xb2a   :  { %v5991_v11 = vpop.f32.mrf.mxu1 }
 0xb2c   :  { %v5993_v12 = vpop.f32.mrf.mxu1 }
 0xb2d   :  { %v1451_v14 = vpack.c.bf16 %v5991_v11, %v5993_v12 }
 0xb2e   :  { %v5997_v15 = vpop.f32.mrf.mxu1 }
 0xb2f   :  { %4675 = vmatmul.mubr.msk.bf16.vlgmr.msra.gmra.mxu0 %vm360_vm9, %v1451_v14 }
 0xb30   :  { %1514 = vmatprep.mubr.bf16.mxu0 %v5476_v6  ;;  %1702 = vmatpush1.bf16.msra.mxu0 %v5120_v48  ;;  %v6001_v61 = vpop.f32.mrf.mxu1  ;;  %v1437_v48 = vmul.f32 %v1430_v50, %v6020_v45 }
 0xb31   :  { %1703 = vmatprep.subr.bf16.mxu0 %v5127_v47  ;;  %v1452_v17 = vpack.c.bf16 %v5997_v15, %v6001_v61  ;;  %v1438_v47 = vmul.f32 %v1434_v23, %v6020_v45 }
 0xb32   :  { %v1445_v62 = vadd.f32 %v1437_v48, %v1405_v32 }
 0xb33   :  { %v1446_v30 = vadd.f32 %v1438_v47, %v1406_v43 }
 0xb34   :  { %1704 = vmatpush1.bf16.msra.mxu0 %v5125_v37 }
 0xb35   :  { %1705 = vmatprep.subr.bf16.mxu0 %v5130_v63 }
 0xb37   :  { %4676 = vmatmul.mubr.msk.bf16.gmra.mxu0 %vm360_vm9, %v1452_v17  ;;  %v1540_v17 = vrot.slane %v1370_v0, %v5609_v44 }
 0xb38   :  { %1706 = vmatpush1.bf16.msra.mxu0 %v5128_v59  ;;  %1725 = vmatprep.mubr.bf16.mxu0 %v5476_v6  ;;  %v1441_v59 = vmul.f32 %v1430_v50, %v6024_v41 }
 0xb39   :  { %1707 = vmatprep.subr.bf16.mxu0 %v5133_v9  ;;  %v1408_v9 = vmul.f32 %v1402_v52, %v5895_v38 }
 0xb3a   :  { %v1636_v26 = vpop.f32.mrf.mxu1 }
 0xb3b   :  { %v1448_v28 = vadd.f32 %v1440_v60, %v1408_v9 }
 0xb3c   :  { %1708 = vmatpush1.bf16.msra.mxu0 %v5131_v2  ;;  %v1447_v2 = vadd.f32 %v1439_v10, %v1407_v1  ;;  %v1638_v32 = vpop.f32.mrf.mxu1 }
 0xbef   :  { %v1506_v22 = vpop.f32.mrf.mxu0 }
 0xbf0   :  { %v1525_v63 = vadd.f32 %v1506_v22, %v1443_v31  ;;  %v1449_v22 = vadd.f32 %v1441_v59, %v1409_v8 }
 0xbf1   :  { %v1508_v33 = vpop.f32.mrf.mxu0 }
 0xbf2   :  { %v1526_v14 = vadd.f32 %v1508_v33, %v1444_v36  ;;  %v6042_v10 = vadd.f32 %v1536_v34, %v1525_v63  ;;  %v1450_v36 = vadd.f32 %v1442_v21, %v1410_v54 }
 0xbf3   :  { %v1510_v19 = vpop.f32.mrf.mxu0 }
 0xbf4   :  { %v1527_v38 = vadd.f32 %v1510_v19, %v1445_v62  ;;  %v1542_v31 = vadd.f32 %v1540_v17, %v1526_v14  ;;  %v1640_v14 = vpop.f32.mrf.mxu1 }
 0xbf5   :  { %v1512_v37 = vpop.f32.mrf.mxu0 }
 0xbf6   :  { %v1528_v1 = vadd.f32 %v1512_v37, %v1446_v30  ;;  %v6054_v47 = vadd.f32 %v1536_v34, %v1527_v38 }
 0xbf7   :  { %v1516_v20 = vpop.f32.mrf.mxu0 }
 0xbf8   :  { %v1529_v53 = vadd.f32 %v1516_v20, %v1447_v2  ;;  %v1544_v9 = vadd.f32 %v1540_v17, %v1528_v1  ;;  %v1642_v1 = vpop.f32.mrf.mxu1 }
 0xbf9   :  { %v1518_v50 = vpop.f32.mrf.mxu0 }
 0xbfa   :  { %v6044_v33 = vadd.f32 %v1536_v34, %v1529_v53  ;;  %v1530_v0 = vadd.f32 %v1518_v50, %v1448_v28 }
 0xbfb   :  { %v1520_v16 = vpop.f32.mrf.mxu0 }
 0xbfc   :  { %v1549_v23 = vsel %vm5663_vm6, %v6042_v10, %v6044_v33  ;;  %v1546_v48 = vadd.f32 %v1540_v17, %v1530_v0  ;;  %v1531_v60 = vadd.f32 %v1520_v16, %v1449_v22  ;;  %v1553_v52 = vsel %vm5663_vm6, %v6044_v33, %v6042_v10 }
 0xbfd   :  { %v1645_v19 = vadd.f32 %v1636_v26, %v1549_v23  ;;  %v1522_v43 = vpop.f32.mrf.mxu0 }
 0xbfe   :  { %v6056_v37 = vadd.f32 %v1536_v34, %v1531_v60  ;;  %v1532_v59 = vadd.f32 %v1522_v43, %v1450_v36  ;;  %v6060_v63 = vsel %vm34_vm7, %v1546_v48, %v1542_v31  ;;  %v1550_v36 = vsel %vm34_vm7, %v1542_v31, %v1546_v48  ;;  %v5136_v31 = vld [vmem:[%s6875_s3 + $0x194] ss:$8 sps:$4 sm:$0xff]  }
 0xbff   :  { %v4685_v2 = vmul.f32 -1.442695, %v1645_v19  ;;  %1923 = vmatprep.subr.bf16.mxu0 %v5136_v31 }
 0xc00   :  { %v1551_v20 = vsel %vm5663_vm6, %v6054_v47, %v6056_v37  ;;  %v1548_v8 = vadd.f32 %v1540_v17, %v1532_v59  ;;  %v1555_v34 = vsel %vm5663_vm6, %v6056_v37, %v6054_v47  ;;  %v1371_v17 = vld [vmem:[%s6875_s3 + $0x170] sm:$0x1] }
 0xc01   :  { %5294 = vpow2.f32 %v4685_v2  ;;  %v1646_v21 = vadd.f32 %v1640_v14, %v1551_v20  ;;  %v1557_v22 = vunpack.c.l.bf16 %v1371_v17 }
 0xc02   :  { %v6072_v62 = vsel %vm34_vm7, %v1548_v8, %v1544_v9  ;;  %v1552_v59 = vsel %vm34_vm7, %v1544_v9, %v1548_v8 }
 0xc03   :  { %v4686_v26 = vmul.f32 -1.442695, %v1646_v21  ;;  %v6078_v54 = vrot.slane %v1557_v22, %v5609_v44 }
 0xc05   :  { %5296 = vpow2.f32 %v4686_v26  ;;  %v1659_v38 = vadd.f32 %v1638_v32, %v6078_v54  ;;  %v1660_v60 = vadd.f32 %v1642_v1, %v6078_v54 }
 0xc0e   :  { %v5295_v53 = vpop.eup %5294 }
 0xc0f   :  { %v1653_v28 = vadd.f32 1.0, %v5295_v53 }
 0xc11   :  { %5298 = vrcp.f32 %v1653_v28 }
 0xc12   :  { %v5297_v30 = vpop.eup %5296 }
 0xc13   :  { %v1654_v50 = vadd.f32 1.0, %v5297_v30 }
 0xc15   :  { %5300 = vrcp.f32 %v1654_v50  ;;  %v5134_v50 = vld [vmem:[%s6875_s3 + $0x190] ss:$8 sps:$4 sm:$0xff]  }
 0xc1e   :  { %v5299_v0 = vpop.eup %5298 }
 0xc1f   :  { %v1661_v16 = vmul.f32 %v5299_v0, %v1659_v38  ;;  %v5139_v38 = vld [vmem:[%s6875_s3 + $0x184] ss:$8 sps:$4 sm:$0xff]  }
 0xc21   :  { %v1663_v23 = vadd.f32 %v1661_v16, %v1550_v36 }
 0xc22   :  { %v5301_v19 = vpop.eup %5300 }
 0xc23   :  { %5302 = vtanh.f32 %v1663_v23  ;;  %v1662_v43 = vmul.f32 %v5301_v19, %v1660_v60 }
 0xc25   :  { %v1664_v2 = vadd.f32 %v1662_v43, %v1552_v59 }
 0xc27   :  { %5304 = vtanh.f32 %v1664_v2 }
 0xc30   :  { %v5303_v14 = vpop.eup %5302 }
 0xc31   :  { %v1667_v20 = vsub.f32 0.0, %v5303_v14 }
 0xc33   :  { %1671 = vrot.lane.b32.xlu0 %v1667_v20, %s5477_s10 }
 0xc34   :  { %v5305_v32 = vpop.eup %5304 }
 0xc35   :  { %v1668_v21 = vsub.f32 0.0, %v5305_v32 }
 0xc37   :  { %1673 = vrot.lane.b32.xlu1 %v1668_v21, %s5477_s10 }
 0xca5   :  { %v1672_v48 = vpop.permute.xlu0 %1671 }
 0xca6   :  { %v1677_v26 = vmul.f32 %v5299_v0, %v1672_v48  ;;  %v5137_v0 = vld [vmem:[%s6875_s3 + $0x180] ss:$8 sps:$4 sm:$0xff]  }
 0xca8   :  { %1681 = vrot.lane.b32.xlu0 %v1677_v26, %s5477_s10 }
 0xca9   :  { %v1674_v9 = vpop.permute.xlu1 %1673 }
 0xcaa   :  { %v1678_v8 = vmul.f32 %v5301_v19, %v1674_v9 }
 0xcac   :  { %1683 = vrot.lane.b32.xlu1 %v1678_v8, %s5477_s10 }
 0xd1a   :  { %v1682_v53 = vpop.permute.xlu0 %1681 }
 0xd1b   :  { %v1687_v30 = vadd.f32 %v5303_v14, %v1682_v53 }
 0xd1e   :  { %v1684_v28 = vpop.permute.xlu1 %1683 }
 0xd1f   :  { %v1688_v17 = vadd.f32 %v5305_v32, %v1684_v28 }
 0xd21   :  { %v1689_v22 = vpack.c.bf16 %v1688_v17, %v1687_v30 }
 0xd23   :  { %4687 = vmatmul.mubr.msk.bf16.vlgmr.msra.gmra.mxu0 %vm505_vm8, %v1689_v22 }
 0xd24   :  { %1924 = vmatpush1.bf16.msra.mxu0 %v5134_v50  ;;  %1943 = vmatprep.mubr.bf16.mxu0 %v5476_v6 }
 0xd25   :  { %1925 = vmatprep.subr.bf16.mxu0 %v5139_v38  ;;  %v5148_v38 = vld [vmem:[%s6875_s3 + $0x204] ss:$8 sps:$4 sm:$0xff]  }
 0xd28   :  { %1926 = vmatpush1.bf16.msra.mxu0 %v5137_v0  ;;  %v5146_v0 = vld [vmem:[%s6875_s3 + $0x200] ss:$8 sps:$4 sm:$0xff]  }
 0xd29   :  { %2132 = vmatprep.subr.bf16.mxu0 %v5148_v38 }
 0xd2b   :  { %4700 = vmatmul.mubr.msk.bf16.vlgmr.msra.gmra.mxu0 %vm67_vm0, %v1689_v22 }
 0xd2c   :  { %1953 = vmatprep.mubr.bf16.mxu0 %v5476_v6  ;;  %2133 = vmatpush1.bf16.msra.mxu0 %v5146_v0 }
 0xde3   :  { %v1727_v1 = vpop.f32.mrf.mxu0 }
 0xde4   :  { %v1736_v16 = vadd.f32 %v1727_v1, %v1553_v52  ;;  %v5151_v1 = vld [vmem:[%s6875_s3 + $0x1f4] ss:$8 sps:$4 sm:$0xff]  }
 0xde5   :  { %v1729_v36 = vpop.f32.mrf.mxu0  ;;  %2134 = vmatprep.subr.bf16.mxu0 %v5151_v1 }
 0xde6   :  { %v4688_v23 = vmul.f32 -1.442695, %v1736_v16  ;;  %v1750_v10 = vadd.f32 %v1729_v36, %v6078_v54  ;;  %v5154_v36 = vld [vmem:[%s6875_s3 + $0x1e4] ss:$8 sps:$4 sm:$0xff]  }
 0xde7   :  { %v1731_v60 = vpop.f32.mrf.mxu0 }
 0xde8   :  { %5306 = vpow2.f32 %v4688_v23  ;;  %v1737_v19 = vadd.f32 %v1731_v60, %v1555_v34  ;;  %v5152_v60 = vld [vmem:[%s6875_s3 + $0x1e0] ss:$8 sps:$4 sm:$0xff]  }
 0xde9   :  { %v1733_v52 = vpop.f32.mrf.mxu0 }
 0xdea   :  { %v4689_v43 = vmul.f32 -1.442695, %v1737_v19  ;;  %v1751_v31 = vadd.f32 %v1733_v52, %v6078_v54  ;;  %v5142_v54 = vld [vmem:[%s6875_s3 + $0x1b4] ss:$8 sps:$4 sm:$0xff]  }
 0xdeb   :  { %1845 = vmatprep.subr.bf16.mxu1 %v5142_v54 }
 0xdec   :  { %5308 = vpow2.f32 %v4689_v43 }
 0xdf5   :  { %v5307_v59 = vpop.eup %5306 }
 0xdf6   :  { %v1744_v2 = vadd.f32 1.0, %v5307_v59  ;;  %v5157_v59 = vld [vmem:[%s6875_s3 + $0x1d4] ss:$8 sps:$4 sm:$0xff]  }
 0xdf8   :  { %5310 = vrcp.f32 %v1744_v2 }
 0xdf9   :  { %v5309_v14 = vpop.eup %5308 }
 0xdfa   :  { %v1745_v20 = vadd.f32 1.0, %v5309_v14  ;;  %v5155_v14 = vld [vmem:[%s6875_s3 + $0x1d0] ss:$8 sps:$4 sm:$0xff]  }
 0xdfc   :  { %5312 = vrcp.f32 %v1745_v20 }
 0xe05   :  { %v5311_v33 = vpop.eup %5310 }
 0xe06   :  { %v1752_v32 = vmul.f32 %v5311_v33, %v1750_v10 }
 0xe08   :  { %v1754_v21 = vadd.f32 %v1752_v32, %v6060_v63  ;;  %v5140_v63 = vld [vmem:[%s6875_s3 + $0x1b0] ss:$8 sps:$4 sm:$0xff]  }
 0xe09   :  { %v5313_v48 = vpop.eup %5312  ;;  %1846 = vmatpush1.bf16.msra.mxu1 %v5140_v63 }
 0xe0a   :  { %5314 = vtanh.f32 %v1754_v21  ;;  %v1753_v47 = vmul.f32 %v5313_v48, %v1751_v31  ;;  %v1788_v31 = vld [vmem:[%s6875_s3 + $0x1c0] sm:$0x11] }
 0xe0c   :  { %v1755_v37 = vadd.f32 %v1753_v47, %v6072_v62  ;;  %v5145_v62 = vld [vmem:[%s6875_s3 + $0x1a4] ss:$8 sps:$4 sm:$0xff]  }
 0xe0d   :  { %1847 = vmatprep.subr.bf16.mxu1 %v5145_v62 }
 0xe0e   :  { %5316 = vtanh.f32 %v1755_v37 }
 0xe17   :  { %v5315_v34 = vpop.eup %5314 }
 0xe18   :  { %v1758_v26 = vsub.f32 %v1687_v30, %v5315_v34  ;;  %v5143_v30 = vld [vmem:[%s6875_s3 + $0x1a0] ss:$8 sps:$4 sm:$0xff]  }
 0xe19   :  { %1848 = vmatpush1.bf16.msra.mxu1 %v5143_v30 }
 0xe1a   :  { %1762 = vrot.lane.b32.xlu0 %v1758_v26, %s5477_s10  ;;  %2041 = vmatprep.subr.bf16.mxu1 %v5148_v38  ;;  %v1790_v26 = vunpack.c.h.bf16 %v1788_v31 }
 0xe1b   :  { %v5317_v9 = vpop.eup %5316 }
 0xe1c   :  { %v1759_v8 = vsub.f32 %v1688_v17, %v5317_v9 }
 0xe1e   :  { %1764 = vrot.lane.b32.xlu1 %v1759_v8, %s5477_s10 }
 0xe8c   :  { %v1763_v53 = vpop.permute.xlu0 %1762 }
 0xe8d   :  { %v1768_v28 = vmul.f32 %v5311_v33, %v1763_v53  ;;  %v1945_v33 = vpop.f32.mrf.mxu0 }
 0xe8f   :  { %1772 = vrot.lane.b32.xlu0 %v1768_v28, %s5477_s10  ;;  %v1947_v52 = vpop.f32.mrf.mxu0  ;;  %v1971_v28 = vrot.slane %v1790_v26, %v5609_v44 }
 0xe90   :  { %v1765_v17 = vpop.permute.xlu1 %1764 }
 0xe91   :  { %v1769_v50 = vmul.f32 %v5313_v48, %v1765_v17  ;;  %v1949_v32 = vpop.f32.mrf.mxu0 }
 0xe93   :  { %1774 = vrot.lane.b32.xlu1 %v1769_v50, %s5477_s10  ;;  %v1951_v21 = vpop.f32.mrf.mxu0 }
 0xe97   :  { %1805 = vrot.lane.b32.xlu1 %v1689_v22, %s5478_s27  ;;  %v5149_v22 = vld [vmem:[%s6875_s3 + $0x1f0] ss:$8 sps:$4 sm:$0xff]  }
 0xe98   :  { %2135 = vmatpush1.bf16.msra.mxu0 %v5149_v22 }
 0xe99   :  { %2136 = vmatprep.subr.bf16.mxu0 %v5154_v36 }
 0xe9c   :  { %2137 = vmatpush1.bf16.msra.mxu0 %v5152_v60 }
 0xe9d   :  { %2138 = vmatprep.subr.bf16.mxu0 %v5157_v59 }
 0xea0   :  { %2139 = vmatpush1.bf16.msra.mxu0 %v5155_v14 }
 0xf01   :  { %v1773_v16 = vpop.permute.xlu0 %1772 }
 0xf02   :  { %v1778_v19 = vadd.f32 %v5315_v34, %v1773_v16  ;;  %v1789_v34 = vunpack.c.l.bf16 %v1788_v31 }
 0xf04   :  { %v1967_v62 = vrot.slane %v1789_v34, %v5609_v44 }
 0xf05   :  { %v1775_v23 = vpop.permute.xlu1 %1774 }
 0xf06   :  { %v1779_v43 = vadd.f32 %v5317_v9, %v1775_v23 }
 0xf08   :  { %v1800_v2 = vpack.c.bf16 %v1779_v43, %v1778_v19 }
 0xf09   :  { %v1806_v10 = vpop.permute.xlu1 %1805 }
 0xf0a   :  { %1803 = vrot.lane.b32.xlu0 %v1800_v2, %s5478_s27  ;;  %4701 = vmatmul.mubr.msk.bf16.gmra.mxu0 %vm67_vm0, %v1800_v2 }
 0xf0b   :  { %2156 = vmatprep.mubr.bf16.mxu0 %v5476_v6 }
 0xf7c   :  { %v1804_v20 = vpop.permute.xlu0 %1803 }
 0xf7d   :  { %4694 = vmatmul.mubr.msk.bf16.vlgmr.msra.gmra.mxu1 %vm67_vm0, %v1804_v20 }
 0xf7e   :  { %2042 = vmatpush1.bf16.msra.mxu1 %v5146_v0  ;;  %1875 = vmatprep.mubr.bf16.mxu1 %v5476_v6 }
 0xf7f   :  { %2043 = vmatprep.subr.bf16.mxu1 %v5151_v1 }
 0xf82   :  { %2044 = vmatpush1.bf16.msra.mxu1 %v5149_v22 }
 0xf83   :  { %2045 = vmatprep.subr.bf16.mxu1 %v5154_v36 }
 0xf85   :  { %4695 = vmatmul.mubr.msk.bf16.gmra.mxu1 %vm67_vm0, %v1806_v10 }
 0xf86   :  { %2046 = vmatpush1.bf16.msra.mxu1 %v5152_v60  ;;  %2065 = vmatprep.mubr.bf16.mxu1 %v5476_v6 }
 0xf87   :  { %2047 = vmatprep.subr.bf16.mxu1 %v5157_v59 }
 0xf8a   :  { %2048 = vmatpush1.bf16.msra.mxu1 %v5155_v14 }
 0xf8d   :  { %2066 = vmatmul.mubr.bf16.vlgmr.msra.gmra.mxu1 %v5476_v6 }
 0xfca   :  { %v1955_v47 = vpop.f32.mrf.mxu0 }
 0xfcc   :  { %v1957_v8 = vpop.f32.mrf.mxu0 }
 0xfce   :  { %v1959_v50 = vpop.f32.mrf.mxu0 }
 0xfd0   :  { %v1961_v2 = vpop.f32.mrf.mxu0 }
0x103d   :  { %v1867_v48 = vpop.f32.mrf.mxu1 }
0x103e   :  { %v1946_v54 = vadd.f32 %v1945_v33, %v1867_v48 }
0x103f   :  { %v1869_v37 = vpop.f32.mrf.mxu1 }
0x1040   :  { %v1948_v53 = vadd.f32 %v1947_v52, %v1869_v37  ;;  %v6174_v0 = vadd.f32 %v1967_v62, %v1946_v54 }
0x1041   :  { %v1871_v9 = vpop.f32.mrf.mxu1 }
0x1042   :  { %v1950_v1 = vadd.f32 %v1949_v32, %v1871_v9  ;;  %v1973_v36 = vadd.f32 %v1971_v28, %v1948_v53 }
0x1043   :  { %v1873_v63 = vpop.f32.mrf.mxu1 }
0x1044   :  { %v1952_v60 = vadd.f32 %v1951_v21, %v1873_v63  ;;  %v6182_v20 = vadd.f32 %v1967_v62, %v1950_v1 }
0x1045   :  { %v1877_v30 = vpop.f32.mrf.mxu1 }
0x1046   :  { %v1956_v17 = vadd.f32 %v1955_v47, %v1877_v30  ;;  %v1975_v31 = vadd.f32 %v1971_v28, %v1952_v60 }
0x1047   :  { %v1879_v38 = vpop.f32.mrf.mxu1 }
0x1048   :  { %v6176_v22 = vadd.f32 %v1967_v62, %v1956_v17  ;;  %v1958_v16 = vadd.f32 %v1957_v8, %v1879_v38  ;;  %v1791_v17 = vld [vmem:[%s6875_s3 + $0x210] sm:$0x1] }
0x1049   :  { %v1881_v23 = vpop.f32.mrf.mxu1  ;;  %v1988_v38 = vunpack.c.l.bf16 %v1791_v17 }
0x104a   :  { %v1977_v19 = vadd.f32 %v1971_v28, %v1958_v16  ;;  %v1960_v43 = vadd.f32 %v1959_v50, %v1881_v23  ;;  %v1984_v59 = vsel %vm5663_vm6, %v6176_v22, %v6174_v0  ;;  %v1980_v32 = vsel %vm5663_vm6, %v6174_v0, %v6176_v22 }
0x104b   :  { %v1883_v14 = vpop.f32.mrf.mxu1  ;;  %v1992_v1 = vrot.slane %v1988_v38, %v5609_v44 }
0x104c   :  { %v6184_v10 = vadd.f32 %v1967_v62, %v1960_v43  ;;  %v1962_v33 = vadd.f32 %v1961_v2, %v1883_v14  ;;  %v6188_v52 = vsel %vm34_vm7, %v1977_v19, %v1973_v36  ;;  %v1981_v2 = vsel %vm34_vm7, %v1973_v36, %v1977_v19 }
0x104d   :  { %v2067_v21 = vpop.f32.mrf.mxu1 }
0x104e   :  { %v1979_v48 = vadd.f32 %v1971_v28, %v1962_v33  ;;  %v2076_v47 = vadd.f32 %v2067_v21, %v1980_v32  ;;  %v1986_v37 = vsel %vm5663_vm6, %v6184_v10, %v6182_v20  ;;  %v1982_v8 = vsel %vm5663_vm6, %v6182_v20, %v6184_v10 }
0x104f   :  { %v2069_v34 = vpop.f32.mrf.mxu1 }
0x1050   :  { %v4710_v26 = vmul.f32 -1.442695, %v2076_v47  ;;  %v6200_v9 = vsel %vm34_vm7, %v1979_v48, %v1975_v31  ;;  %v2090_v16 = vadd.f32 %v2069_v34, %v1992_v1  ;;  %v1983_v32 = vsel %vm34_vm7, %v1975_v31, %v1979_v48 }
0x1051   :  { %v2071_v63 = vpop.f32.mrf.mxu1 }
0x1052   :  { %5318 = vpow2.f32 %v4710_v26  ;;  %v2077_v54 = vadd.f32 %v2071_v63, %v1982_v8 }
0x1053   :  { %v2073_v60 = vpop.f32.mrf.mxu1 }
0x1054   :  { %v4711_v62 = vmul.f32 -1.442695, %v2077_v54  ;;  %v2091_v20 = vadd.f32 %v2073_v60, %v1992_v1 }
0x1056   :  { %5320 = vpow2.f32 %v4711_v62 }
0x105f   :  { %v5319_v53 = vpop.eup %5318 }
0x1060   :  { %v2084_v28 = vadd.f32 1.0, %v5319_v53 }
0x1062   :  { %5322 = vrcp.f32 %v2084_v28 }
0x1063   :  { %v5321_v30 = vpop.eup %5320 }
0x1064   :  { %v2085_v50 = vadd.f32 1.0, %v5321_v30 }
0x1066   :  { %5324 = vrcp.f32 %v2085_v50 }
0x106f   :  { %v5323_v23 = vpop.eup %5322 }
0x1070   :  { %v2092_v43 = vmul.f32 %v5323_v23, %v2090_v16 }
0x1072   :  { %v2094_v14 = vadd.f32 %v2092_v43, %v1981_v2 }
0x1073   :  { %v5325_v10 = vpop.eup %5324 }
0x1074   :  { %5326 = vtanh.f32 %v2094_v14  ;;  %v2093_v33 = vmul.f32 %v5325_v10, %v2091_v20 }
0x1076   :  { %v2095_v21 = vadd.f32 %v2093_v33, %v1983_v32 }
0x1078   :  { %5328 = vtanh.f32 %v2095_v21 }
0x1081   :  { %v5327_v47 = vpop.eup %5326 }
0x1082   :  { %v2098_v26 = vsub.f32 0.0, %v5327_v47 }
0x1084   :  { %2102 = vrot.lane.b32.xlu0 %v2098_v26, %s5477_s10 }
0x1085   :  { %v5329_v34 = vpop.eup %5328 }
0x1086   :  { %v2099_v8 = vsub.f32 0.0, %v5329_v34 }
0x1088   :  { %2104 = vrot.lane.b32.xlu1 %v2099_v8, %s5477_s10 }
0x10f6   :  { %v2103_v63 = vpop.permute.xlu0 %2102 }
0x10f7   :  { %v2108_v36 = vmul.f32 %v5323_v23, %v2103_v63 }
0x10f9   :  { %2112 = vrot.lane.b32.xlu0 %v2108_v36, %s5477_s10  ;;  %v5158_v36 = vld [vmem:[%s6875_s3 + $0x280] ss:$8 sps:$4 sm:$0xff]  }
0x10fa   :  { %v2105_v19 = vpop.permute.xlu1 %2104  ;;  %4987 = vmatprep.subr.bf16.mxu0 %v5158_v36 }
0x10fb   :  { %v2109_v54 = vmul.f32 %v5325_v10, %v2105_v19 }
0x10fd   :  { %2114 = vrot.lane.b32.xlu1 %v2109_v54, %s5477_s10 }
0x116b   :  { %v2113_v62 = vpop.permute.xlu0 %2112 }
0x116c   :  { %v2118_v48 = vadd.f32 %v5327_v47, %v2113_v62 }
0x116f   :  { %v2115_v31 = vpop.permute.xlu1 %2114 }
0x1170   :  { %v2119_v53 = vadd.f32 %v5329_v34, %v2115_v31 }
0x1172   :  { %v2120_v28 = vpack.c.bf16 %v2119_v53, %v2118_v48 }
0x1174   :  { %4712 = vmatmul.mubr.msk.bf16.vlgmr.msra.gmra.mxu0 %vm505_vm8, %v2120_v28 }
0x1175   :  { %4991 = vmatprep.mubr.msk.bf16.mxu0 %vm67_vm0, %v2120_v28  ;;  %4988 = vmatpush3.bf16.msra.mxu0 %v5158_v36 }
0x1234   :  { %v2158_v30 = vpop.f32.mrf.mxu0 }
0x1235   :  { %v2167_v17 = vadd.f32 %v2158_v30, %v1984_v59 }
0x1236   :  { %v2160_v50 = vpop.f32.mrf.mxu0 }
0x1237   :  { %v4713_v38 = vmul.f32 -1.442695, %v2167_v17  ;;  %v2181_v10 = vadd.f32 %v2160_v50, %v1992_v1 }
0x1238   :  { %v2162_v16 = vpop.f32.mrf.mxu0 }
0x1239   :  { %5330 = vpow2.f32 %v4713_v38  ;;  %v2168_v23 = vadd.f32 %v2162_v16, %v1986_v37 }
0x123a   :  { %v2164_v32 = vpop.f32.mrf.mxu0 }
0x123b   :  { %v4714_v60 = vmul.f32 -1.442695, %v2168_v23  ;;  %v2182_v22 = vadd.f32 %v2164_v32, %v1992_v1  ;;  %v5161_v1 = vld [vmem:[%s6875_s3 + $0x290] ss:$8 sps:$4 sm:$0xff]   ;;  %v6256_v23 = vld [vmem:[%s6875_s3 + $0x2c0] sm:$0x77] }
0x123c   :  { %v2219_v32 = vld [vmem:[%s6875_s3 + $0x2b0] sm:$0x1] }
0x123d   :  { %5332 = vpow2.f32 %v4714_v60  ;;  %v4728_v60 = vcombine.high %v6256_v23, %v6256_v23 }
0x1246   :  { %v5331_v43 = vpop.eup %5330 }
0x1247   :  { %v2175_v2 = vadd.f32 1.0, %v5331_v43  ;;  %v4727_v43 = vcombine.low %v6256_v23, %v6256_v23 }
0x1249   :  { %5334 = vrcp.f32 %v2175_v2  ;;  %v2521_v2 = vrot.slane %v4728_v60, 1  ;;  %v5175_v60 = vld [vmem:[%s6875_s3 + $0x2e4] ss:$8 sps:$4 sm:$0xff]  }
0x124a   :  { %v5333_v14 = vpop.eup %5332 }
0x124b   :  { %v2176_v20 = vadd.f32 1.0, %v5333_v14  ;;  %v2520_v14 = vrot.slane %v4727_v43, 1 }
0x124d   :  { %5336 = vrcp.f32 %v2176_v20  ;;  %v5164_v20 = vld [vmem:[%s6875_s3 + $0x314] ss:$8 sps:$4 sm:$0xff]  }
0x1256   :  { %v5335_v33 = vpop.eup %5334 }
0x1257   :  { %v2183_v21 = vmul.f32 %v5335_v33, %v2181_v10  ;;  %v2529_v10 = vsel %vm364_vm1, %v2520_v14, 0 }
0x1259   :  { %v2185_v0 = vadd.f32 %v2183_v21, %v6188_v52  ;;  %v5159_v52 = vld [vmem:[%s6875_s3 + $0x270] ss:$8 sps:$4 sm:$0xff]  }
0x125a   :  { %v5337_v59 = vpop.eup %5336  ;;  %4989 = vmatprep.subr.bf16.mxu0 %v5159_v52 }
0x125b   :  { %5338 = vtanh.f32 %v2185_v0  ;;  %v2184_v47 = vmul.f32 %v5337_v59, %v2182_v22  ;;  %4990 = vmatpush3.bf16.msra.mxu0 %v5159_v52  ;;  %v2220_v0 = vunpack.c.l.bf16 %v2219_v32  ;;  %v2471_v32 = vunpack.c.l.bf16 %v6256_v23 }
0x125c   :  { %4729 = vmatprep.subr.msk.bf16.mxu0 %vm364_vm1, %v2521_v2 }
0x125d   :  { %v2186_v37 = vadd.f32 %v2184_v47, %v6200_v9  ;;  %v5160_v9 = vld [vmem:[%s6875_s3 + $0x2a0] ss:$8 sps:$4 sm:$0xff]  }
0x125e   :  { %4979 = vmatprep.subr.bf16.mxu1 %v5160_v9 }
0x125f   :  { %5340 = vtanh.f32 %v2186_v37  ;;  %4980 = vmatpush3.bf16.msra.mxu1 %v5160_v9 }
0x1260   :  { %4981 = vmatprep.subr.bf16.mxu1 %v5161_v1 }
0x1263   :  { %4982 = vmatpush3.bf16.msra.mxu1 %v5161_v1 }
0x1268   :  { %v5339_v26 = vpop.eup %5338 }
0x1269   :  { %v2189_v34 = vsub.f32 %v2118_v48, %v5339_v26 }
0x126b   :  { %2193 = vrot.lane.b32.xlu0 %v2189_v34, %s5477_s10 }
0x126c   :  { %v5341_v8 = vpop.eup %5340 }
0x126d   :  { %v2190_v63 = vsub.f32 %v2119_v53, %v5341_v8 }
0x126f   :  { %2195 = vrot.lane.b32.xlu1 %v2190_v63, %s5477_s10 }
0x12dd   :  { %v2194_v19 = vpop.permute.xlu0 %2193 }
0x12de   :  { %v2199_v54 = vmul.f32 %v5335_v33, %v2194_v19 }
0x12e0   :  { %2203 = vrot.lane.b32.xlu0 %v2199_v54, %s5477_s10 }
0x12e1   :  { %v2196_v62 = vpop.permute.xlu1 %2195 }
0x12e2   :  { %v2200_v31 = vmul.f32 %v5337_v59, %v2196_v62 }
0x12e4   :  { %2205 = vrot.lane.b32.xlu1 %v2200_v31, %s5477_s10 }
0x12e8   :  { %2226 = vrot.lane.b32.xlu1 %v2120_v28, %s5478_s27  ;;  %v5462_v28 = vld [vmem:[%s6874_s2] sm:$0xff] }
0x1352   :  { %v2204_v48 = vpop.permute.xlu0 %2203 }
0x1353   :  { %v2209_v30 = vadd.f32 %v5339_v26, %v2204_v48  ;;  %v2364_v26 = vrot.slane %v2220_v0, %v5609_v44  ;;  %v2476_v0 = vrot.slane %v2471_v32, %v5609_v44 }
0x1356   :  { %v2206_v53 = vpop.permute.xlu1 %2205 }
0x1357   :  { %v2210_v17 = vadd.f32 %v5341_v8, %v2206_v53 }
0x1359   :  { %v2221_v50 = vpack.c.bf16 %v2210_v17, %v2209_v30  ;;  %v5162_v17 = vld [vmem:[%s6875_s3 + $0x310] ss:$8 sps:$4 sm:$0xff]  }
0x135a   :  { %v2227_v16 = vpop.permute.xlu1 %2226 }
0x135b   :  { %2224 = vrot.lane.b32.xlu0 %v2221_v50, %s5478_s27  ;;  %4992 = vmatmul.mubr.msk.bf16.vlgmr.msra.gmra.mxu0 %vm67_vm0, %v2221_v50  ;;  %v5167_v50 = vld [vmem:[%s6875_s3 + $0x300] ss:$8 sps:$4 sm:$0xff]  }
0x135c   :  { %2566 = vmatprep.mubr.bf16.mxu0 %v5476_v6  ;;  %2549 = vmatpush1.bf16.msra.mxu0 %v2529_v10 }
0x135d   :  { %2763 = vmatprep.subr.bf16.mxu0 %v5164_v20 }
0x13cd   :  { %v2225_v38 = vpop.permute.xlu0 %2224 }
0x13ce   :  { %4983 = vmatprep.mubr.msk.bf16.mxu1 %vm67_vm0, %v2225_v38  ;;  %v5170_v38 = vld [vmem:[%s6875_s3 + $0x2f0] ss:$8 sps:$4 sm:$0xff]  }
0x13cf   :  { %4984 = vmatmul.mubr.msk.bf16.vlgmr.msra.gmra.mxu1 %vm67_vm0, %v2227_v16  ;;  %v5172_v16 = vld [vmem:[%s6875_s3 + $0x2f4] ss:$8 sps:$4 sm:$0xff]  }
0x13d0   :  { %5003 = vmatprep.mubr.msk.f32.mxu1 %vm67_vm0, %v5462_v28  ;;  %v5173_v28 = vld [vmem:[%s6875_s3 + $0x2e0] ss:$8 sps:$4 sm:$0xff]  }
0x141b   :  { %v4993_v33 = vpop.f32.mrf.mxu0 }
0x141d   :  { %v2346_v21 = vpop.f32.mrf.mxu0 }
0x141f   :  { %v4994_v59 = vpop.f32.mrf.mxu0 }
0x1421   :  { %v2349_v63 = vpop.f32.mrf.mxu0 }
0x148f   :  { %v4985_v22 = vpop.f32.mrf.mxu1 }
0x1490   :  { %v2355_v37 = vadd.f32 %v4993_v33, %v4985_v22  ;;  %v2492_v22 = vrot.slane %v2471_v32, %v5611_v46 }
0x1491   :  { %v2280_v47 = vpop.f32.mrf.mxu1 }
0x1492   :  { %v2367_v52 = vadd.f32 %v2364_v26, %v2355_v37  ;;  %v2347_v9 = vadd.f32 %v2346_v21, %v2280_v47  ;;  %v2472_v21 = vunpack.c.h.bf16 %v6256_v23  ;;  %v2481_v23 = vmul.f32 %v2476_v0, %v5602_v40 }
0x1493   :  { %v4986_v34 = vpop.f32.mrf.mxu1 }
0x1494   :  { %v2358_v8 = vadd.f32 %v4994_v59, %v4986_v34  ;;  %v2365_v31 = vadd.f32 %v2364_v26, %v2347_v9  ;;  %v2371_v48 = vsub.f32 %v2367_v52, %v6001_v61  ;;  %v5169_v61 = vld [vmem:[%s6875_s3 + $0x304] ss:$8 sps:$4 sm:$0xff]   ;;  %v2466_v59 = vld [vmem:[%s6875_s3 + $0x2d0] sm:$0x11]  ;;  %v2480_v37 = vrot.slane %v2472_v21, %v5609_v44 }
0x1495   :  { %v2283_v36 = vpop.f32.mrf.mxu1  ;;  %v2497_v34 = vmul.f32 %v2492_v22, %v5640_v5  ;;  %v2501_v52 = vmul.f32 %v2492_v22, %v5652_v24  ;;  %v2468_v9 = vunpack.c.h.bf16 %v2466_v59 }
0x1496   :  { %v2368_v1 = vadd.f32 %v2364_v26, %v2358_v8  ;;  %v2350_v19 = vadd.f32 %v2349_v63, %v2283_v36  ;;  %v2369_v30 = vsub.f32 %v2365_v31, %v5993_v12  ;;  %v5465_v12 = vld [vmem:[%s6874_s2 + $0x18] sm:$0xff]  ;;  %v2467_v36 = vunpack.c.l.bf16 %v2466_v59 }
0x1497   :  { %v2499_v31 = vmul.f32 %v2492_v22, %v5629_v58 }
0x1498   :  { %v2366_v54 = vadd.f32 %v2364_v26, %v2350_v19  ;;  %v2372_v62 = vsub.f32 %v2368_v1, %v5997_v15  ;;  %v5463_v15 = vld [vmem:[%s6874_s2 + $0x8] sm:$0xff]  ;;  %v2496_v26 = vrot.slane %v2472_v21, %v5611_v46  ;;  %v2482_v1 = vmul.f32 %v2480_v37, %v5602_v40 }
0x1499   :  { %v2483_v19 = vmul.f32 %v2476_v0, %v5606_v42  ;;  %v2485_v46 = vmul.f32 %v2476_v0, %v5624_v56  ;;  %v2598_v40 = vrot.slane %v2467_v36, %v5609_v44 }
0x149a   :  { %4995 = vmatprep.subr.mxu1 %v2372_v62  ;;  %v2370_v53 = vsub.f32 %v2366_v54, %v5991_v11  ;;  %v5464_v11 = vld [vmem:[%s6874_s2 + $0x10] sm:$0xff]  ;;  %v2498_v8 = vmul.f32 %v2496_v26, %v5640_v5 }
0x149b   :  { %4996 = vmatpush3.msra.mxu1 %v2372_v62  ;;  %v2505_v62 = vadd.f32 %v2497_v34, %v2481_v23 }
0x149c   :  { %4997 = vmatprep.subr.mxu1 %v2371_v48  ;;  %v2506_v5 = vadd.f32 %v2498_v8, %v2482_v1 }
0x149d   :  { %4998 = vmatpush3.msra.mxu1 %v2371_v48  ;;  %v2502_v48 = vmul.f32 %v2496_v26, %v5652_v24  ;;  %v2487_v24 = vmul.f32 %v2476_v0, %v5616_v49 }
0x149e   :  { %4999 = vmatprep.subr.mxu1 %v2370_v53 }
0x149f   :  { %5000 = vmatpush3.msra.mxu1 %v2370_v53  ;;  %v2484_v53 = vmul.f32 %v2480_v37, %v5606_v42  ;;  %v2507_v42 = vadd.f32 %v2499_v31, %v2483_v19 }
0x14a0   :  { %5001 = vmatprep.subr.mxu1 %v2369_v30 }
0x14a1   :  { %5002 = vmatpush3.msra.mxu1 %v2369_v30  ;;  %v2500_v30 = vmul.f32 %v2496_v26, %v5629_v58 }
0x14a2   :  { %5004 = vmatmul.mubr.msk.f32.vlgmr.msra.gmra.mxu1 %vm67_vm0, %v5463_v15  ;;  %2672 = vmatprep.subr.bf16.mxu1 %v5164_v20  ;;  %v2503_v15 = vmul.f32 %v2492_v22, %v5645_v13  ;;  %v2488_v22 = vmul.f32 %v2480_v37, %v5616_v49 }
0x14a3   :  { %5006 = vmatprep.mubr.msk.f32.mxu1 %vm67_vm0, %v5464_v11  ;;  %2673 = vmatpush1.bf16.msra.mxu1 %v5162_v17 }
0x14a4   :  { %2674 = vmatprep.subr.bf16.mxu1 %v5169_v61  ;;  %v2511_v21 = vadd.f32 %v2503_v15, %v2487_v24 }
0x14a6   :  { %5007 = vmatmul.mubr.msk.f32.gmra.mxu1 %vm67_vm0, %v5465_v12  ;;  %v2509_v12 = vadd.f32 %v2501_v52, %v2485_v46 }
0x14a7   :  { %2696 = vmatprep.mubr.bf16.mxu1 %v5476_v6  ;;  %2675 = vmatpush1.bf16.msra.mxu1 %v5167_v50 }
0x14a8   :  { %2676 = vmatprep.subr.bf16.mxu1 %v5172_v16 }
0x14ab   :  { %2677 = vmatpush1.bf16.msra.mxu1 %v5170_v38 }
0x14ac   :  { %2678 = vmatprep.subr.bf16.mxu1 %v5175_v60 }
0x14af   :  { %2679 = vmatpush1.bf16.msra.mxu1 %v5173_v28 }
0x14b2   :  { %2697 = vmatmul.mubr.bf16.vlgmr.msra.gmra.mxu1 %v5476_v6 }
0x14b3   :  { %2927 = vmatprep.mubr.bf16.mxu1 %v5476_v6 }
0x1562   :  { %v6311_v43 = vpop.f32.mrf.mxu1 }
0x1564   :  { %v6313_v2 = vpop.f32.mrf.mxu1 }
0x1565   :  { %v2513_v14 = vpack.c.bf16 %v6311_v43, %v6313_v2 }
0x1566   :  { %v6317_v20 = vpop.f32.mrf.mxu1 }
0x1567   :  { %4730 = vmatmul.mubr.msk.bf16.vlgmr.msra.gmra.mxu0 %vm360_vm9, %v2513_v14 }
0x1568   :  { %2576 = vmatprep.mubr.bf16.mxu0 %v5476_v6  ;;  %2764 = vmatpush1.bf16.msra.mxu0 %v5162_v17  ;;  %v6321_v10 = vpop.f32.mrf.mxu1 }
0x1569   :  { %2765 = vmatprep.subr.bf16.mxu0 %v5169_v61  ;;  %v2514_v33 = vpack.c.bf16 %v6317_v20, %v6321_v10  ;;  %v2486_v61 = vmul.f32 %v2480_v37, %v5624_v56 }
0x156b   :  { %v2510_v14 = vadd.f32 %v2502_v48, %v2486_v61 }
0x156c   :  { %2766 = vmatpush1.bf16.msra.mxu0 %v5167_v50 }
0x156d   :  { %2767 = vmatprep.subr.bf16.mxu0 %v5172_v16 }
0x156f   :  { %4731 = vmatmul.mubr.msk.bf16.gmra.mxu0 %vm360_vm9, %v2514_v33  ;;  %v2508_v33 = vadd.f32 %v2500_v30, %v2484_v53 }
0x1570   :  { %2768 = vmatpush1.bf16.msra.mxu0 %v5170_v38  ;;  %2787 = vmatprep.mubr.bf16.mxu0 %v5476_v6  ;;  %v2602_v38 = vrot.slane %v2468_v9, %v5609_v44 }
0x1571   :  { %2769 = vmatprep.subr.bf16.mxu0 %v5175_v60 }
0x1572   :  { %v2698_v60 = vpop.f32.mrf.mxu1 }
0x1574   :  { %2770 = vmatpush1.bf16.msra.mxu0 %v5173_v28  ;;  %v2504_v28 = vmul.f32 %v2496_v26, %v5645_v13  ;;  %v2700_v26 = vpop.f32.mrf.mxu1 }
0x1576   :  { %v2512_v36 = vadd.f32 %v2504_v28, %v2488_v22  ;;  %v2702_v48 = vpop.f32.mrf.mxu1 }
0x1627   :  { %v2568_v47 = vpop.f32.mrf.mxu0 }
0x1628   :  { %v2587_v11 = vadd.f32 %v2568_v47, %v2505_v62 }
0x1629   :  { %v2570_v63 = vpop.f32.mrf.mxu0 }
0x162a   :  { %v2588_v50 = vadd.f32 %v2570_v63, %v2506_v5  ;;  %v6354_v59 = vadd.f32 %v2598_v40, %v2587_v11 }
0x162b   :  { %v2572_v54 = vpop.f32.mrf.mxu0 }
0x162c   :  { %v2589_v56 = vadd.f32 %v2572_v54, %v2507_v42  ;;  %v2604_v8 = vadd.f32 %v2602_v38, %v2588_v50  ;;  %v2469_v50 = vld [vmem:[%s6875_s3 + $0x320] sm:$0x1] }
0x162d   :  { %v2574_v17 = vpop.f32.mrf.mxu0 }
0x162e   :  { %v2590_v63 = vadd.f32 %v2574_v17, %v2508_v33  ;;  %v6366_v1 = vadd.f32 %v2598_v40, %v2589_v56 }
0x162f   :  { %v2578_v16 = vpop.f32.mrf.mxu0 }
0x1630   :  { %v2591_v58 = vadd.f32 %v2578_v16, %v2509_v12  ;;  %v2606_v46 = vadd.f32 %v2602_v38, %v2590_v63  ;;  %v2619_v16 = vunpack.c.l.bf16 %v2469_v50 }
0x1631   :  { %v2580_v32 = vpop.f32.mrf.mxu0 }
0x1632   :  { %v6356_v47 = vadd.f32 %v2598_v40, %v2591_v58  ;;  %v2592_v34 = vadd.f32 %v2580_v32, %v2510_v14  ;;  %v6390_v24 = vrot.slane %v2619_v16, %v5609_v44 }
0x1633   :  { %v2582_v0 = vpop.f32.mrf.mxu0 }
0x1634   :  { %v2611_v13 = vsel %vm5663_vm6, %v6354_v59, %v6356_v47  ;;  %v2608_v23 = vadd.f32 %v2602_v38, %v2592_v34  ;;  %v2593_v52 = vadd.f32 %v2582_v0, %v2511_v21  ;;  %v2615_v49 = vsel %vm5663_vm6, %v6356_v47, %v6354_v59 }
0x1635   :  { %v2707_v37 = vadd.f32 %v2698_v60, %v2611_v13  ;;  %v2584_v9 = vpop.f32.mrf.mxu0  ;;  %v2721_v28 = vadd.f32 %v2700_v26, %v6390_v24  ;;  %v2704_v60 = vpop.f32.mrf.mxu1 }
0x1636   :  { %v6368_v19 = vadd.f32 %v2598_v40, %v2593_v52  ;;  %v2594_v54 = vadd.f32 %v2584_v9, %v2512_v36  ;;  %v6372_v62 = vsel %vm34_vm7, %v2608_v23, %v2604_v8  ;;  %v2612_v14 = vsel %vm34_vm7, %v2604_v8, %v2608_v23  ;;  %v5178_v8 = vld [vmem:[%s6875_s3 + $0x344] ss:$8 sps:$4 sm:$0xff]  }
0x1637   :  { %v4740_v31 = vmul.f32 -1.442695, %v2707_v37  ;;  %v2722_v32 = vadd.f32 %v2704_v60, %v6390_v24  ;;  %2985 = vmatprep.subr.bf16.mxu0 %v5178_v8 }
0x1638   :  { %v2613_v5 = vsel %vm5663_vm6, %v6366_v1, %v6368_v19  ;;  %v2610_v53 = vadd.f32 %v2602_v38, %v2594_v54  ;;  %v2617_v30 = vsel %vm5663_vm6, %v6368_v19, %v6366_v1 }
0x1639   :  { %5342 = vpow2.f32 %v4740_v31  ;;  %v2708_v17 = vadd.f32 %v2702_v48, %v2613_v5  ;;  %v5176_v48 = vld [vmem:[%s6875_s3 + $0x340] ss:$8 sps:$4 sm:$0xff]  }
0x163a   :  { %v6384_v15 = vsel %vm34_vm7, %v2610_v53, %v2606_v46  ;;  %v2614_v56 = vsel %vm34_vm7, %v2606_v46, %v2610_v53  ;;  %v5181_v53 = vld [vmem:[%s6875_s3 + $0x334] ss:$8 sps:$4 sm:$0xff]  }
0x163b   :  { %v4741_v11 = vmul.f32 -1.442695, %v2708_v17  ;;  %v5179_v17 = vld [vmem:[%s6875_s3 + $0x330] ss:$8 sps:$4 sm:$0xff]  }
0x163d   :  { %5344 = vpow2.f32 %v4741_v11 }
0x1646   :  { %v5343_v40 = vpop.eup %5342 }
0x1647   :  { %v2715_v12 = vadd.f32 1.0, %v5343_v40 }
0x1649   :  { %5346 = vrcp.f32 %v2715_v12 }
0x164a   :  { %v5345_v61 = vpop.eup %5344 }
0x164b   :  { %v2716_v38 = vadd.f32 1.0, %v5345_v61 }
0x164d   :  { %5348 = vrcp.f32 %v2716_v38 }
0x1656   :  { %v5347_v42 = vpop.eup %5346 }
0x1657   :  { %v2723_v58 = vmul.f32 %v5347_v42, %v2721_v28 }
0x1659   :  { %v2725_v33 = vadd.f32 %v2723_v58, %v2612_v14 }
0x165a   :  { %v5349_v21 = vpop.eup %5348 }
0x165b   :  { %5350 = vtanh.f32 %v2725_v33  ;;  %v2724_v22 = vmul.f32 %v5349_v21, %v2722_v32 }
0x165d   :  { %v2726_v34 = vadd.f32 %v2724_v22, %v2614_v56 }
0x165f   :  { %5352 = vtanh.f32 %v2726_v34 }
0x1668   :  { %v5351_v63 = vpop.eup %5350 }
0x1669   :  { %v2729_v0 = vsub.f32 0.0, %v5351_v63 }
0x166b   :  { %2733 = vrot.lane.b32.xlu0 %v2729_v0, %s5477_s10 }
0x166c   :  { %v5353_v36 = vpop.eup %5352 }
0x166d   :  { %v2730_v13 = vsub.f32 0.0, %v5353_v36 }
0x166f   :  { %2735 = vrot.lane.b32.xlu1 %v2730_v13, %s5477_s10 }
0x16dd   :  { %v2734_v26 = vpop.permute.xlu0 %2733 }
0x16de   :  { %v2739_v23 = vmul.f32 %v5347_v42, %v2734_v26  ;;  %v5190_v26 = vld [vmem:[%s6875_s3 + $0x3b4] ss:$8 sps:$4 sm:$0xff]  }
0x16e0   :  { %2743 = vrot.lane.b32.xlu0 %v2739_v23, %s5477_s10  ;;  %v5188_v23 = vld [vmem:[%s6875_s3 + $0x3b0] ss:$8 sps:$4 sm:$0xff]  }
0x16e1   :  { %v2736_v52 = vpop.permute.xlu1 %2735 }
0x16e2   :  { %v2740_v37 = vmul.f32 %v5349_v21, %v2736_v52  ;;  %v5193_v52 = vld [vmem:[%s6875_s3 + $0x3a4] ss:$8 sps:$4 sm:$0xff]  }
0x16e4   :  { %2745 = vrot.lane.b32.xlu1 %v2740_v37, %s5477_s10  ;;  %v5191_v37 = vld [vmem:[%s6875_s3 + $0x3a0] ss:$8 sps:$4 sm:$0xff]  }
0x1752   :  { %v2744_v9 = vpop.permute.xlu0 %2743 }
0x1753   :  { %v2749_v31 = vadd.f32 %v5351_v63, %v2744_v9 }
0x1756   :  { %v2746_v54 = vpop.permute.xlu1 %2745 }
0x1757   :  { %v2750_v46 = vadd.f32 %v5353_v36, %v2746_v54  ;;  %v5185_v36 = vld [vmem:[%s6875_s3 + $0x350] ss:$8 sps:$4 sm:$0xff]  }
0x1759   :  { %v2751_v5 = vpack.c.bf16 %v2750_v46, %v2749_v31 }
0x175b   :  { %4742 = vmatmul.mubr.msk.bf16.vlgmr.msra.gmra.mxu0 %vm505_vm8, %v2751_v5 }
0x175c   :  { %2986 = vmatpush1.bf16.msra.mxu0 %v5176_v48  ;;  %3005 = vmatprep.mubr.bf16.mxu0 %v5476_v6 }
0x175d   :  { %2987 = vmatprep.subr.bf16.mxu0 %v5181_v53  ;;  %v5199_v53 = vld [vmem:[%s6875_s3 + $0x384] ss:$8 sps:$4 sm:$0xff]  }
0x1760   :  { %2988 = vmatpush1.bf16.msra.mxu0 %v5179_v17 }
0x1761   :  { %3194 = vmatprep.subr.bf16.mxu0 %v5190_v26 }
0x1763   :  { %4755 = vmatmul.mubr.msk.bf16.vlgmr.msra.gmra.mxu0 %vm67_vm0, %v2751_v5 }
0x1764   :  { %3015 = vmatprep.mubr.bf16.mxu0 %v5476_v6  ;;  %3195 = vmatpush1.bf16.msra.mxu0 %v5188_v23 }
0x1765   :  { %3196 = vmatprep.subr.bf16.mxu0 %v5193_v52 }
0x1768   :  { %3197 = vmatpush1.bf16.msra.mxu0 %v5191_v37 }
0x181b   :  { %v2789_v11 = vpop.f32.mrf.mxu0 }
0x181c   :  { %v2798_v40 = vadd.f32 %v2789_v11, %v2615_v49  ;;  %v5197_v11 = vld [vmem:[%s6875_s3 + $0x380] ss:$8 sps:$4 sm:$0xff]  }
0x181d   :  { %v2791_v12 = vpop.f32.mrf.mxu0 }
0x181e   :  { %v4743_v61 = vmul.f32 -1.442695, %v2798_v40  ;;  %v2812_v59 = vadd.f32 %v2791_v12, %v6390_v24 }
0x181f   :  { %v2793_v50 = vpop.f32.mrf.mxu0 }
0x1820   :  { %5354 = vpow2.f32 %v4743_v61  ;;  %v2799_v38 = vadd.f32 %v2793_v50, %v2617_v30 }
0x1821   :  { %v2795_v49 = vpop.f32.mrf.mxu0 }
0x1822   :  { %v4744_v16 = vmul.f32 -1.442695, %v2799_v38  ;;  %v2813_v32 = vadd.f32 %v2795_v49, %v6390_v24  ;;  %v5184_v24 = vld [vmem:[%s6875_s3 + $0x364] ss:$8 sps:$4 sm:$0xff]  }
0x1823   :  { %2907 = vmatprep.subr.bf16.mxu1 %v5184_v24  ;;  %v3007_v61 = vpop.f32.mrf.mxu0 }
0x1824   :  { %5356 = vpow2.f32 %v4744_v16 }
0x1825   :  { %v3009_v50 = vpop.f32.mrf.mxu0 }
0x1827   :  { %v3011_v38 = vpop.f32.mrf.mxu0 }
0x1829   :  { %v3013_v16 = vpop.f32.mrf.mxu0 }
0x182d   :  { %v5355_v28 = vpop.eup %5354 }
0x182e   :  { %v2806_v42 = vadd.f32 1.0, %v5355_v28  ;;  %v2850_v28 = vld [vmem:[%s6875_s3 + $0x370] sm:$0x11] }
0x1830   :  { %5358 = vrcp.f32 %v2806_v42 }
0x1831   :  { %v5357_v60 = vpop.eup %5356 }
0x1832   :  { %v2807_v58 = vadd.f32 1.0, %v5357_v60 }
0x1834   :  { %5360 = vrcp.f32 %v2807_v58 }
0x183d   :  { %v5359_v47 = vpop.eup %5358 }
0x183e   :  { %v2814_v14 = vmul.f32 %v5359_v47, %v2812_v59  ;;  %v2851_v59 = vunpack.c.l.bf16 %v2850_v28 }
0x1840   :  { %v2816_v33 = vadd.f32 %v2814_v14, %v6372_v62  ;;  %v5182_v62 = vld [vmem:[%s6875_s3 + $0x360] ss:$8 sps:$4 sm:$0xff]  }
0x1841   :  { %v5361_v21 = vpop.eup %5360  ;;  %2908 = vmatpush1.bf16.msra.mxu1 %v5182_v62 }
0x1842   :  { %5362 = vtanh.f32 %v2816_v33  ;;  %v2815_v1 = vmul.f32 %v5361_v21, %v2813_v32 }
0x1844   :  { %v2817_v19 = vadd.f32 %v2815_v1, %v6384_v15  ;;  %v5187_v15 = vld [vmem:[%s6875_s3 + $0x354] ss:$8 sps:$4 sm:$0xff]  }
0x1845   :  { %2909 = vmatprep.subr.bf16.mxu1 %v5187_v15 }
0x1846   :  { %5364 = vtanh.f32 %v2817_v19  ;;  %2910 = vmatpush1.bf16.msra.mxu1 %v5185_v36 }
0x1847   :  { %3103 = vmatprep.subr.bf16.mxu1 %v5190_v26 }
0x184f   :  { %v5363_v30 = vpop.eup %5362 }
0x1850   :  { %v2820_v22 = vsub.f32 %v2749_v31, %v5363_v30  ;;  %v5196_v31 = vld [vmem:[%s6875_s3 + $0x394] ss:$8 sps:$4 sm:$0xff]  }
0x1851   :  { %3198 = vmatprep.subr.bf16.mxu0 %v5196_v31 }
0x1852   :  { %2824 = vrot.lane.b32.xlu0 %v2820_v22, %s5477_s10 }
0x1853   :  { %v5365_v56 = vpop.eup %5364 }
0x1854   :  { %v2821_v34 = vsub.f32 %v2750_v46, %v5365_v56 }
0x1856   :  { %2826 = vrot.lane.b32.xlu1 %v2821_v34, %s5477_s10 }
0x18c4   :  { %v2825_v63 = vpop.permute.xlu0 %2824 }
0x18c5   :  { %v2830_v0 = vmul.f32 %v5359_v47, %v2825_v63  ;;  %v2852_v47 = vunpack.c.h.bf16 %v2850_v28 }
0x18c7   :  { %2834 = vrot.lane.b32.xlu0 %v2830_v0, %s5477_s10  ;;  %v3033_v19 = vrot.slane %v2852_v47, %v5609_v44  ;;  %v2853_v47 = vld [vmem:[%s6875_s3 + $0x3c0] sm:$0x1] }
0x18c8   :  { %v2827_v13 = vpop.permute.xlu1 %2826 }
0x18c9   :  { %v2831_v8 = vmul.f32 %v5361_v21, %v2827_v13  ;;  %v3029_v21 = vrot.slane %v2851_v59, %v5609_v44 }
0x18cb   :  { %2836 = vrot.lane.b32.xlu1 %v2831_v8, %s5477_s10 }
0x18cf   :  { %2867 = vrot.lane.b32.xlu1 %v2751_v5, %s5478_s27  ;;  %v5194_v5 = vld [vmem:[%s6875_s3 + $0x390] ss:$8 sps:$4 sm:$0xff]  }
0x18d0   :  { %3199 = vmatpush1.bf16.msra.mxu0 %v5194_v5 }
0x18d1   :  { %3200 = vmatprep.subr.bf16.mxu0 %v5199_v53 }
0x18d4   :  { %3201 = vmatpush1.bf16.msra.mxu0 %v5197_v11 }
0x1939   :  { %v2835_v9 = vpop.permute.xlu0 %2834 }
0x193a   :  { %v2840_v46 = vadd.f32 %v5363_v30, %v2835_v9 }
0x193d   :  { %v2837_v54 = vpop.permute.xlu1 %2836 }
0x193e   :  { %v2841_v48 = vadd.f32 %v5365_v56, %v2837_v54 }
0x1940   :  { %v2862_v17 = vpack.c.bf16 %v2841_v48, %v2840_v46 }
0x1941   :  { %v2868_v12 = vpop.permute.xlu1 %2867 }
0x1942   :  { %2865 = vrot.lane.b32.xlu0 %v2862_v17, %s5478_s27  ;;  %4756 = vmatmul.mubr.msk.bf16.gmra.mxu0 %vm67_vm0, %v2862_v17 }
0x1943   :  { %3218 = vmatprep.mubr.bf16.mxu0 %v5476_v6 }
0x19b4   :  { %v2866_v40 = vpop.permute.xlu0 %2865 }
0x19b5   :  { %4749 = vmatmul.mubr.msk.bf16.vlgmr.msra.gmra.mxu1 %vm67_vm0, %v2866_v40 }
0x19b6   :  { %3104 = vmatpush1.bf16.msra.mxu1 %v5188_v23  ;;  %2937 = vmatprep.mubr.bf16.mxu1 %v5476_v6 }
0x19b7   :  { %3105 = vmatprep.subr.bf16.mxu1 %v5193_v52 }
0x19ba   :  { %3106 = vmatpush1.bf16.msra.mxu1 %v5191_v37 }
0x19bb   :  { %3107 = vmatprep.subr.bf16.mxu1 %v5196_v31 }
0x19bd   :  { %4750 = vmatmul.mubr.msk.bf16.gmra.mxu1 %vm67_vm0, %v2868_v12 }
0x19be   :  { %3108 = vmatpush1.bf16.msra.mxu1 %v5194_v5  ;;  %3127 = vmatprep.mubr.bf16.mxu1 %v5476_v6 }
0x19bf   :  { %3109 = vmatprep.subr.bf16.mxu1 %v5199_v53 }
0x19c2   :  { %3110 = vmatpush1.bf16.msra.mxu1 %v5197_v11 }
0x19c5   :  { %3128 = vmatmul.mubr.bf16.vlgmr.msra.gmra.mxu1 %v5476_v6 }
0x1a02   :  { %v3017_v60 = vpop.f32.mrf.mxu0 }
0x1a04   :  { %v3019_v14 = vpop.f32.mrf.mxu0 }
0x1a06   :  { %v3021_v56 = vpop.f32.mrf.mxu0 }
0x1a08   :  { %v3023_v52 = vpop.f32.mrf.mxu0 }
0x1a75   :  { %v2929_v42 = vpop.f32.mrf.mxu1 }
0x1a76   :  { %v3008_v32 = vadd.f32 %v3007_v61, %v2929_v42 }
0x1a77   :  { %v2931_v58 = vpop.f32.mrf.mxu1 }
0x1a78   :  { %v3010_v1 = vadd.f32 %v3009_v50, %v2931_v58  ;;  %v6486_v62 = vadd.f32 %v3029_v21, %v3008_v32 }
0x1a79   :  { %v2933_v49 = vpop.f32.mrf.mxu1 }
0x1a7a   :  { %v3012_v24 = vadd.f32 %v3011_v38, %v2933_v49  ;;  %v3035_v0 = vadd.f32 %v3033_v19, %v3010_v1 }
0x1a7b   :  { %v2935_v33 = vpop.f32.mrf.mxu1 }
0x1a7c   :  { %v3014_v13 = vadd.f32 %v3013_v16, %v2935_v33  ;;  %v6494_v9 = vadd.f32 %v3029_v21, %v3012_v24 }
0x1a7d   :  { %v2939_v30 = vpop.f32.mrf.mxu1 }
0x1a7e   :  { %v3018_v22 = vadd.f32 %v3017_v60, %v2939_v30  ;;  %v3037_v53 = vadd.f32 %v3033_v19, %v3014_v13 }
0x1a7f   :  { %v2941_v34 = vpop.f32.mrf.mxu1 }
0x1a80   :  { %v6488_v15 = vadd.f32 %v3029_v21, %v3018_v22  ;;  %v3020_v63 = vadd.f32 %v3019_v14, %v2941_v34  ;;  %v3050_v14 = vunpack.c.l.bf16 %v2853_v47 }
0x1a81   :  { %v2943_v36 = vpop.f32.mrf.mxu1 }
0x1a82   :  { %v3039_v8 = vadd.f32 %v3033_v19, %v3020_v63  ;;  %v3022_v26 = vadd.f32 %v3021_v56, %v2943_v36  ;;  %v3046_v23 = vsel %vm5663_vm6, %v6488_v15, %v6486_v62  ;;  %v3042_v48 = vsel %vm5663_vm6, %v6486_v62, %v6488_v15 }
0x1a83   :  { %v2945_v37 = vpop.f32.mrf.mxu1  ;;  %v3054_v33 = vrot.slane %v3050_v14, %v5609_v44 }
0x1a84   :  { %v6496_v54 = vadd.f32 %v3029_v21, %v3022_v26  ;;  %v3024_v31 = vadd.f32 %v3023_v52, %v2945_v37  ;;  %v6500_v46 = vsel %vm34_vm7, %v3039_v8, %v3035_v0  ;;  %v3043_v30 = vsel %vm34_vm7, %v3035_v0, %v3039_v8 }
0x1a85   :  { %v3129_v5 = vpop.f32.mrf.mxu1 }
0x1a86   :  { %v3041_v17 = vadd.f32 %v3033_v19, %v3024_v31  ;;  %v3138_v11 = vadd.f32 %v3129_v5, %v3042_v48  ;;  %v3048_v40 = vsel %vm5663_vm6, %v6496_v54, %v6494_v9  ;;  %v3044_v38 = vsel %vm5663_vm6, %v6494_v9, %v6496_v54 }
0x1a87   :  { %v3131_v12 = vpop.f32.mrf.mxu1 }
0x1a88   :  { %v4765_v61 = vmul.f32 -1.442695, %v3138_v11  ;;  %v6512_v50 = vsel %vm34_vm7, %v3041_v17, %v3037_v53  ;;  %v3152_v32 = vadd.f32 %v3131_v12, %v3054_v33  ;;  %v3045_v63 = vsel %vm34_vm7, %v3037_v53, %v3041_v17 }
0x1a89   :  { %v3133_v16 = vpop.f32.mrf.mxu1 }
0x1a8a   :  { %5366 = vpow2.f32 %v4765_v61  ;;  %v3139_v28 = vadd.f32 %v3133_v16, %v3044_v38 }
0x1a8b   :  { %v3135_v1 = vpop.f32.mrf.mxu1 }
0x1a8c   :  { %v4766_v42 = vmul.f32 -1.442695, %v3139_v28  ;;  %v3153_v56 = vadd.f32 %v3135_v1, %v3054_v33 }
0x1a8e   :  { %5368 = vpow2.f32 %v4766_v42 }
0x1a97   :  { %v5367_v60 = vpop.eup %5366 }
0x1a98   :  { %v3146_v58 = vadd.f32 1.0, %v5367_v60 }
0x1a9a   :  { %5370 = vrcp.f32 %v3146_v58 }
0x1a9b   :  { %v5369_v59 = vpop.eup %5368 }
0x1a9c   :  { %v3147_v49 = vadd.f32 1.0, %v5369_v59 }
0x1a9e   :  { %5372 = vrcp.f32 %v3147_v49 }
0x1aa7   :  { %v5371_v21 = vpop.eup %5370 }
0x1aa8   :  { %v3154_v19 = vmul.f32 %v5371_v21, %v3152_v32 }
0x1aaa   :  { %v3156_v22 = vadd.f32 %v3154_v19, %v3043_v30 }
0x1aab   :  { %v5373_v34 = vpop.eup %5372 }
0x1aac   :  { %5374 = vtanh.f32 %v3156_v22  ;;  %v3155_v24 = vmul.f32 %v5373_v34, %v3153_v56 }
0x1aae   :  { %v3157_v36 = vadd.f32 %v3155_v24, %v3045_v63 }
0x1ab0   :  { %5376 = vtanh.f32 %v3157_v36 }
0x1ab9   :  { %v5375_v13 = vpop.eup %5374 }
0x1aba   :  { %v3160_v26 = vsub.f32 0.0, %v5375_v13 }
0x1abc   :  { %3164 = vrot.lane.b32.xlu0 %v3160_v26, %s5477_s10 }
0x1abd   :  { %v5377_v52 = vpop.eup %5376 }
0x1abe   :  { %v3161_v37 = vsub.f32 0.0, %v5377_v52 }
0x1ac0   :  { %3166 = vrot.lane.b32.xlu1 %v3161_v37, %s5477_s10 }
0x1b2e   :  { %v3165_v9 = vpop.permute.xlu0 %3164 }
0x1b2f   :  { %v3170_v0 = vmul.f32 %v5371_v21, %v3165_v9 }
0x1b31   :  { %3174 = vrot.lane.b32.xlu0 %v3170_v0, %s5477_s10 }
0x1b32   :  { %v3167_v8 = vpop.permute.xlu1 %3166 }
0x1b33   :  { %v3171_v54 = vmul.f32 %v5373_v34, %v3167_v8  ;;  %v5200_v34 = vld [vmem:[%s6875_s3 + $0x4f0] ss:$8 sps:$4 sm:$0xff]  }
0x1b34   :  { %5017 = vmatprep.subr.bf16.mxu0 %v5200_v34 }
0x1b35   :  { %3176 = vrot.lane.b32.xlu1 %v3171_v54, %s5477_s10 }
0x1ba3   :  { %v3175_v31 = vpop.permute.xlu0 %3174 }
0x1ba4   :  { %v3180_v5 = vadd.f32 %v5375_v13, %v3175_v31  ;;  %v5466_v31 = vld [vmem:[%s6876_s1] sm:$0xff] }
0x1ba7   :  { %v3177_v48 = vpop.permute.xlu1 %3176 }
0x1ba8   :  { %v3181_v53 = vadd.f32 %v5377_v52, %v3177_v48  ;;  %v5467_v48 = vld [vmem:[%s6875_s3 + $0x3d0] sm:$0x77] }
0x1baa   :  { %v3182_v17 = vpack.c.bf16 %v3181_v53, %v3180_v5 }
0x1bac   :  { %4767 = vmatmul.mubr.msk.bf16.vlgmr.msra.gmra.mxu0 %vm505_vm8, %v3182_v17 }
0x1bad   :  { %5021 = vmatprep.mubr.msk.bf16.mxu0 %vm67_vm0, %v3182_v17  ;;  %5018 = vmatpush3.bf16.msra.mxu0 %v5200_v34 }
0x1c6c   :  { %v3220_v11 = vpop.f32.mrf.mxu0 }
0x1c6d   :  { %v3229_v12 = vadd.f32 %v3220_v11, %v3046_v23 }
0x1c6e   :  { %v3222_v61 = vpop.f32.mrf.mxu0 }
0x1c6f   :  { %v4768_v38 = vmul.f32 -1.442695, %v3229_v12  ;;  %v3243_v49 = vadd.f32 %v3222_v61, %v3054_v33  ;;  %v5206_v12 = vld [vmem:[%s6875_s3 + $0x424] ss:$8 sps:$4 sm:$0xff]  }
0x1c70   :  { %v3224_v16 = vpop.f32.mrf.mxu0 }
0x1c71   :  { %5378 = vpow2.f32 %v4768_v38  ;;  %v3230_v28 = vadd.f32 %v3224_v16, %v3048_v40  ;;  %v3281_v16 = vld [vmem:[%s6875_s3 + $0x520] sm:$0x1] }
0x1c72   :  { %v3226_v32 = vpop.f32.mrf.mxu0 }
0x1c73   :  { %v4769_v42 = vmul.f32 -1.442695, %v3230_v28  ;;  %v3244_v15 = vadd.f32 %v3226_v32, %v3054_v33  ;;  %v5203_v33 = vld [vmem:[%s6875_s3 + $0x500] ss:$8 sps:$4 sm:$0xff]  }
0x1c75   :  { %5380 = vpow2.f32 %v4769_v42  ;;  %v3282_v42 = vunpack.c.l.bf16 %v3281_v16 }
0x1c7e   :  { %v5379_v60 = vpop.eup %5378 }
0x1c7f   :  { %v3237_v58 = vadd.f32 1.0, %v5379_v60 }
0x1c81   :  { %5382 = vrcp.f32 %v3237_v58 }
0x1c82   :  { %v5381_v59 = vpop.eup %5380 }
0x1c83   :  { %v3238_v47 = vadd.f32 1.0, %v5381_v59 }
0x1c85   :  { %5384 = vrcp.f32 %v3238_v47 }
0x1c8e   :  { %v5383_v14 = vpop.eup %5382 }
0x1c8f   :  { %v3245_v21 = vmul.f32 %v5383_v14, %v3243_v49  ;;  %v3426_v49 = vrot.slane %v3282_v42, %v5609_v44  ;;  %v3546_v42 = vmul.f32 %v5904_v35, %v6007_v7 }
0x1c91   :  { %v3247_v62 = vadd.f32 %v3245_v21, %v6500_v46  ;;  %v5201_v46 = vld [vmem:[%s6875_s3 + $0x4e0] ss:$8 sps:$4 sm:$0xff]  }
0x1c92   :  { %v5385_v23 = vpop.eup %5384  ;;  %5019 = vmatprep.subr.bf16.mxu0 %v5201_v46 }
0x1c93   :  { %5386 = vtanh.f32 %v3247_v62  ;;  %v3246_v1 = vmul.f32 %v5385_v23, %v3244_v15  ;;  %5020 = vmatpush3.bf16.msra.mxu0 %v5201_v46 }
0x1c95   :  { %v3248_v40 = vadd.f32 %v3246_v1, %v6512_v50  ;;  %v5202_v50 = vld [vmem:[%s6875_s3 + $0x510] ss:$8 sps:$4 sm:$0xff]  }
0x1c96   :  { %5009 = vmatprep.subr.bf16.mxu1 %v5202_v50 }
0x1c97   :  { %5388 = vtanh.f32 %v3248_v40  ;;  %5010 = vmatpush3.bf16.msra.mxu1 %v5202_v50  ;;  %v5204_v50 = vld [vmem:[%s6875_s3 + $0x420] ss:$8 sps:$4 sm:$0xff]  }
0x1c98   :  { %5011 = vmatprep.subr.bf16.mxu1 %v5203_v33 }
0x1c9b   :  { %5012 = vmatpush3.bf16.msra.mxu1 %v5203_v33  ;;  %v5211_v33 = vld [vmem:[%s6875_s3 + $0x414] ss:$8 sps:$4 sm:$0xff]  }
0x1ca0   :  { %v5387_v19 = vpop.eup %5386 }
0x1ca1   :  { %v3251_v30 = vsub.f32 %v3180_v5, %v5387_v19  ;;  %v4783_v5 = vcombine.high %v5467_v48, %v5467_v48 }
0x1ca3   :  { %3255 = vrot.lane.b32.xlu0 %v3251_v30, %s5477_s10 }
0x1ca4   :  { %v5389_v22 = vpop.eup %5388 }
0x1ca5   :  { %v3252_v56 = vsub.f32 %v3181_v53, %v5389_v22  ;;  %v4782_v53 = vcombine.low %v5467_v48, %v5467_v48 }
0x1ca7   :  { %3257 = vrot.lane.b32.xlu1 %v3252_v56, %s5477_s10  ;;  %v3582_v11 = vrot.slane %v4782_v53, 1 }
0x1ca9   :  { %v3591_v61 = vsel %vm364_vm1, %v3582_v11, 0 }
0x1d15   :  { %v3256_v24 = vpop.permute.xlu0 %3255 }
0x1d16   :  { %v3261_v63 = vmul.f32 %v5383_v14, %v3256_v24  ;;  %v5212_v24 = vld [vmem:[%s6875_s3 + $0x400] ss:$8 sps:$4 sm:$0xff]  }
0x1d18   :  { %3265 = vrot.lane.b32.xlu0 %v3261_v63, %s5477_s10  ;;  %v5214_v63 = vld [vmem:[%s6875_s3 + $0x404] ss:$8 sps:$4 sm:$0xff]  }
0x1d19   :  { %v3258_v36 = vpop.permute.xlu1 %3257 }
0x1d1a   :  { %v3262_v13 = vmul.f32 %v5385_v23, %v3258_v36  ;;  %v5215_v36 = vld [vmem:[%s6875_s3 + $0x3f0] ss:$8 sps:$4 sm:$0xff]  }
0x1d1c   :  { %3267 = vrot.lane.b32.xlu1 %v3262_v13, %s5477_s10  ;;  %v5217_v13 = vld [vmem:[%s6875_s3 + $0x3f4] ss:$8 sps:$4 sm:$0xff]  }
0x1d20   :  { %3288 = vrot.lane.b32.xlu1 %v3182_v17, %s5478_s27  ;;  %v3583_v17 = vrot.slane %v4783_v5, 1 }
0x1d22   :  { %4784 = vmatprep.subr.msk.bf16.mxu0 %vm364_vm1, %v3583_v17  ;;  %v3561_v17 = vmul.f32 %v5901_v51, %v6020_v45 }
0x1d8a   :  { %v3266_v26 = vpop.permute.xlu0 %3265 }
0x1d8b   :  { %v3271_v37 = vadd.f32 %v5387_v19, %v3266_v26 }
0x1d8e   :  { %v3268_v52 = vpop.permute.xlu1 %3267 }
0x1d8f   :  { %v3272_v9 = vadd.f32 %v5389_v22, %v3268_v52 }
0x1d91   :  { %v3283_v0 = vpack.c.bf16 %v3272_v9, %v3271_v37 }
0x1d92   :  { %v3289_v54 = vpop.permute.xlu1 %3288 }
0x1d93   :  { %3286 = vrot.lane.b32.xlu0 %v3283_v0, %s5478_s27  ;;  %5022 = vmatmul.mubr.msk.bf16.vlgmr.msra.gmra.mxu0 %vm67_vm0, %v3283_v0 }
0x1d94   :  { %3628 = vmatprep.mubr.bf16.mxu0 %v5476_v6  ;;  %3611 = vmatpush1.bf16.msra.mxu0 %v3591_v61  ;;  %v3562_v61 = vmul.f32 %v5907_v57, %v6020_v45  ;;  %v3566_v45 = vmul.f32 %v5907_v57, %v6024_v41 }
0x1d95   :  { %3825 = vmatprep.subr.bf16.mxu0 %v5206_v12 }
0x1e05   :  { %v3287_v8 = vpop.permute.xlu0 %3286 }
0x1e06   :  { %5013 = vmatprep.mubr.msk.bf16.mxu1 %vm67_vm0, %v3287_v8 }
0x1e07   :  { %5014 = vmatmul.mubr.msk.bf16.vlgmr.msra.gmra.mxu1 %vm67_vm0, %v3289_v54  ;;  %v3528_v54 = vld [vmem:[%s6875_s3 + $0x3e0] sm:$0x11] }
0x1e08   :  { %5033 = vmatprep.mubr.msk.f32.mxu1 %vm67_vm0, %v5466_v31  ;;  %v3529_v5 = vunpack.c.l.bf16 %v3528_v54  ;;  %v3530_v53 = vunpack.c.h.bf16 %v3528_v54 }
0x1e53   :  { %v5023_v38 = vpop.f32.mrf.mxu0 }
0x1e55   :  { %v3408_v28 = vpop.f32.mrf.mxu0 }
0x1e57   :  { %v5024_v58 = vpop.f32.mrf.mxu0 }
0x1e59   :  { %v3411_v21 = vpop.f32.mrf.mxu0 }
0x1ec7   :  { %v5015_v60 = vpop.f32.mrf.mxu1 }
0x1ec8   :  { %v3417_v47 = vadd.f32 %v5023_v38, %v5015_v60  ;;  %v3565_v60 = vmul.f32 %v5901_v51, %v6024_v41  ;;  %v3550_v51 = vmul.f32 %v5904_v35, %v6009_v18 }
0x1ec9   :  { %v3342_v59 = vpop.f32.mrf.mxu1 }
0x1eca   :  { %v3429_v15 = vadd.f32 %v3426_v49, %v3417_v47  ;;  %v3409_v23 = vadd.f32 %v3408_v28, %v3342_v59  ;;  %v3660_v28 = vrot.slane %v3529_v5, %v5609_v44  ;;  %v3664_v59 = vrot.slane %v3530_v53, %v5609_v44 }
0x1ecb   :  { %v5016_v14 = vpop.f32.mrf.mxu1 }
0x1ecc   :  { %v3420_v32 = vadd.f32 %v5024_v58, %v5016_v14  ;;  %v3427_v22 = vadd.f32 %v3426_v49, %v3409_v23  ;;  %v3433_v56 = vsub.f32 %v3429_v15, %v6321_v10  ;;  %v5209_v10 = vld [vmem:[%s6875_s3 + $0x410] ss:$8 sps:$4 sm:$0xff]  }
0x1ecd   :  { %v3345_v62 = vpop.f32.mrf.mxu1 }
0x1ece   :  { %v3430_v1 = vadd.f32 %v3426_v49, %v3420_v32  ;;  %v3412_v40 = vadd.f32 %v3411_v21, %v3345_v62  ;;  %v3431_v46 = vsub.f32 %v3427_v22, %v6313_v2  ;;  %v5470_v2 = vld [vmem:[%s6876_s1 + $0x18] sm:$0xff]  ;;  %v3549_v32 = vmul.f32 %v5898_v39, %v6009_v18 }
0x1ed0   :  { %v3428_v19 = vadd.f32 %v3426_v49, %v3412_v40  ;;  %v3434_v30 = vsub.f32 %v3430_v1, %v6317_v20  ;;  %v5468_v20 = vld [vmem:[%s6876_s1 + $0x8] sm:$0xff]  ;;  %v3573_v1 = vadd.f32 %v3565_v60, %v3549_v32 }
0x1ed2   :  { %5025 = vmatprep.subr.mxu1 %v3434_v30  ;;  %v3432_v34 = vsub.f32 %v3428_v19, %v6311_v43  ;;  %v5469_v43 = vld [vmem:[%s6876_s1 + $0x10] sm:$0xff] }
0x1ed3   :  { %5026 = vmatpush3.msra.mxu1 %v3434_v30 }
0x1ed4   :  { %5027 = vmatprep.subr.mxu1 %v3433_v56 }
0x1ed5   :  { %5028 = vmatpush3.msra.mxu1 %v3433_v56 }
0x1ed6   :  { %5029 = vmatprep.subr.mxu1 %v3432_v34 }
0x1ed7   :  { %5030 = vmatpush3.msra.mxu1 %v3432_v34 }
0x1ed8   :  { %5031 = vmatprep.subr.mxu1 %v3431_v46 }
0x1ed9   :  { %5032 = vmatpush3.msra.mxu1 %v3431_v46 }
0x1eda   :  { %5034 = vmatmul.mubr.msk.f32.vlgmr.msra.gmra.mxu1 %vm67_vm0, %v5468_v20  ;;  %3734 = vmatprep.subr.bf16.mxu1 %v5206_v12  ;;  %v3545_v12 = vmul.f32 %v5898_v39, %v6007_v7  ;;  %v3570_v7 = vadd.f32 %v3562_v61, %v3546_v42 }
0x1edb   :  { %5036 = vmatprep.mubr.msk.f32.mxu1 %vm67_vm0, %v5469_v43  ;;  %3735 = vmatpush1.bf16.msra.mxu1 %v5204_v50 }
0x1edc   :  { %3736 = vmatprep.subr.bf16.mxu1 %v5211_v33  ;;  %v3569_v47 = vadd.f32 %v3561_v17, %v3545_v12 }
0x1ede   :  { %5037 = vmatmul.mubr.msk.f32.gmra.mxu1 %vm67_vm0, %v5470_v2 }
0x1edf   :  { %3758 = vmatprep.mubr.bf16.mxu1 %v5476_v6  ;;  %3737 = vmatpush1.bf16.msra.mxu1 %v5209_v10 }
0x1ee0   :  { %3738 = vmatprep.subr.bf16.mxu1 %v5214_v63 }
0x1ee3   :  { %3739 = vmatpush1.bf16.msra.mxu1 %v5212_v24 }
0x1ee4   :  { %3740 = vmatprep.subr.bf16.mxu1 %v5217_v13 }
0x1ee7   :  { %3741 = vmatpush1.bf16.msra.mxu1 %v5215_v36 }
0x1eea   :  { %3759 = vmatmul.mubr.bf16.vlgmr.msra.gmra.mxu1 %v5476_v6 }
0x1eeb   :  { %3989 = vmatprep.mubr.bf16.mxu1 %v5476_v6 }
0x1f9a   :  { %v5035_v26 = vpop.f32.mrf.mxu1 }
0x1f9c   :  { %v3501_v52 = vpop.f32.mrf.mxu1 }
0x1f9d   :  { %v3575_v37 = vpack.c.bf16 %v5035_v26, %v3501_v52 }
0x1f9e   :  { %v5038_v9 = vpop.f32.mrf.mxu1 }
0x1f9f   :  { %4785 = vmatmul.mubr.msk.bf16.vlgmr.msra.gmra.mxu0 %vm360_vm9, %v3575_v37 }
0x1fa0   :  { %3638 = vmatprep.mubr.bf16.mxu0 %v5476_v6  ;;  %3826 = vmatpush1.bf16.msra.mxu0 %v5204_v50  ;;  %v3511_v0 = vpop.f32.mrf.mxu1 }
0x1fa1   :  { %3827 = vmatprep.subr.bf16.mxu0 %v5211_v33  ;;  %v3576_v8 = vpack.c.bf16 %v5038_v9, %v3511_v0 }
0x1fa4   :  { %3828 = vmatpush1.bf16.msra.mxu0 %v5209_v10 }
0x1fa5   :  { %3829 = vmatprep.subr.bf16.mxu0 %v5214_v63 }
0x1fa7   :  { %4786 = vmatmul.mubr.msk.bf16.gmra.mxu0 %vm360_vm9, %v3576_v8  ;;  %v3531_v8 = vld [vmem:[%s6875_s3 + $0x430] sm:$0x1] }
0x1fa8   :  { %3830 = vmatpush1.bf16.msra.mxu0 %v5212_v24  ;;  %3849 = vmatprep.mubr.bf16.mxu0 %v5476_v6 }
0x1fa9   :  { %3831 = vmatprep.subr.bf16.mxu0 %v5217_v13 }
0x1faa   :  { %v3760_v14 = vpop.f32.mrf.mxu1 }
0x1fac   :  { %3832 = vmatpush1.bf16.msra.mxu0 %v5215_v36  ;;  %v3762_v19 = vpop.f32.mrf.mxu1 }
0x1fae   :  { %v3764_v10 = vpop.f32.mrf.mxu1 }
0x1fb0   :  { %v3766_v17 = vpop.f32.mrf.mxu1 }
0x205f   :  { %v3630_v31 = vpop.f32.mrf.mxu0 }
0x2060   :  { %v3649_v16 = vadd.f32 %v3630_v31, %v5919_v3  ;;  %v3681_v31 = vunpack.c.l.bf16 %v3531_v8 }
0x2061   :  { %v3632_v48 = vpop.f32.mrf.mxu0 }
0x2062   :  { %v3650_v58 = vadd.f32 %v3632_v48, %v5921_v4  ;;  %v6645_v4 = vadd.f32 %v3660_v28, %v3649_v16  ;;  %v3685_v48 = vrot.slane %v3681_v31, %v5609_v44  ;;  %v5232_v31 = vld [vmem:[%s6875_s3 + $0x4c4] ss:$8 sps:$4 sm:$0xff]  }
0x2063   :  { %v3634_v11 = vpop.f32.mrf.mxu0 }
0x2064   :  { %v3651_v21 = vadd.f32 %v3634_v11, %v3569_v47  ;;  %v3666_v57 = vadd.f32 %v3664_v59, %v3650_v58  ;;  %v3783_v5 = vadd.f32 %v3762_v19, %v3685_v48  ;;  %v3784_v61 = vadd.f32 %v3766_v17, %v3685_v48  ;;  %v5220_v47 = vld [vmem:[%s6875_s3 + $0x454] ss:$8 sps:$4 sm:$0xff]  }
0x2065   :  { %v3636_v38 = vpop.f32.mrf.mxu0  ;;  %4047 = vmatprep.subr.bf16.mxu0 %v5220_v47 }
0x2066   :  { %v3652_v41 = vadd.f32 %v3636_v38, %v3570_v7  ;;  %v6658_v18 = vadd.f32 %v3660_v28, %v3651_v21 }
0x2067   :  { %v3640_v49 = vpop.f32.mrf.mxu0 }
0x2068   :  { %v3653_v3 = vadd.f32 %v3640_v49, %v5933_v27  ;;  %v3574_v27 = vadd.f32 %v3566_v45, %v3550_v51  ;;  %v3668_v2 = vadd.f32 %v3664_v59, %v3652_v41  ;;  %v5218_v51 = vld [vmem:[%s6875_s3 + $0x450] ss:$8 sps:$4 sm:$0xff]  }
0x2069   :  { %v3642_v62 = vpop.f32.mrf.mxu0 }
0x206a   :  { %v6647_v15 = vadd.f32 %v3660_v28, %v3653_v3  ;;  %v3654_v23 = vadd.f32 %v3642_v62, %v5935_v29 }
0x206b   :  { %v3644_v40 = vpop.f32.mrf.mxu0 }
0x206c   :  { %v3673_v39 = vsel %vm5663_vm6, %v6645_v4, %v6647_v15  ;;  %v3670_v30 = vadd.f32 %v3664_v59, %v3654_v23  ;;  %v3655_v22 = vadd.f32 %v3644_v40, %v3573_v1  ;;  %v3677_v35 = vsel %vm5663_vm6, %v6647_v15, %v6645_v4  ;;  %v5223_v1 = vld [vmem:[%s6875_s3 + $0x444] ss:$8 sps:$4 sm:$0xff]  }
0x206d   :  { %v3769_v29 = vadd.f32 %v3760_v14, %v3673_v39  ;;  %v3646_v56 = vpop.f32.mrf.mxu0 }
0x206e   :  { %v3674_v34 = vsel %vm34_vm7, %v3666_v57, %v3670_v30  ;;  %v6662_v46 = vadd.f32 %v3660_v28, %v3655_v22  ;;  %v3656_v50 = vadd.f32 %v3646_v56, %v3574_v27  ;;  %v6666_v20 = vsel %vm34_vm7, %v3670_v30, %v3666_v57  ;;  %v5221_v57 = vld [vmem:[%s6875_s3 + $0x440] ss:$8 sps:$4 sm:$0xff]  }
0x206f   :  { %v4795_v43 = vmul.f32 -1.442695, %v3769_v29 }
0x2070   :  { %v3675_v33 = vsel %vm5663_vm6, %v6658_v18, %v6662_v46  ;;  %v3672_v24 = vadd.f32 %v3664_v59, %v3656_v50  ;;  %v3679_v63 = vsel %vm5663_vm6, %v6662_v46, %v6658_v18 }
0x2071   :  { %5390 = vpow2.f32 %v4795_v43  ;;  %v3770_v36 = vadd.f32 %v3764_v10, %v3675_v33 }
0x2072   :  { %v3676_v13 = vsel %vm34_vm7, %v3668_v2, %v3672_v24  ;;  %v6680_v26 = vsel %vm34_vm7, %v3672_v24, %v3668_v2 }
0x2073   :  { %v4796_v52 = vmul.f32 -1.442695, %v3770_v36 }
0x2075   :  { %5392 = vpow2.f32 %v4796_v52  ;;  %v5224_v52 = vld [vmem:[%s6875_s3 + $0x470] ss:$8 sps:$4 sm:$0xff]  }
0x207e   :  { %v5391_v37 = vpop.eup %5390 }
0x207f   :  { %v3777_v9 = vadd.f32 1.0, %v5391_v37 }
0x2081   :  { %5394 = vrcp.f32 %v3777_v9 }
0x2082   :  { %v5393_v0 = vpop.eup %5392 }
0x2083   :  { %v3778_v54 = vadd.f32 1.0, %v5393_v0  ;;  %v5227_v0 = vld [vmem:[%s6875_s3 + $0x460] ss:$8 sps:$4 sm:$0xff]  }
0x2085   :  { %5396 = vrcp.f32 %v3778_v54 }
0x208e   :  { %v5395_v53 = vpop.eup %5394 }
0x208f   :  { %v3785_v11 = vmul.f32 %v5395_v53, %v3783_v5  ;;  %v5235_v5 = vld [vmem:[%s6875_s3 + $0x4b4] ss:$8 sps:$4 sm:$0xff]  }
0x2091   :  { %v3787_v12 = vadd.f32 %v3785_v11, %v3674_v34 }
0x2092   :  { %v5397_v38 = vpop.eup %5396 }
0x2093   :  { %5398 = vtanh.f32 %v3787_v12  ;;  %v3786_v16 = vmul.f32 %v5397_v38, %v3784_v61  ;;  %v5238_v12 = vld [vmem:[%s6875_s3 + $0x4a4] ss:$8 sps:$4 sm:$0xff]  }
0x2095   :  { %v3788_v28 = vadd.f32 %v3786_v16, %v3676_v13  ;;  %v5236_v16 = vld [vmem:[%s6875_s3 + $0x4a0] ss:$8 sps:$4 sm:$0xff]  }
0x2097   :  { %5400 = vtanh.f32 %v3788_v28  ;;  %v5241_v28 = vld [vmem:[%s6875_s3 + $0x494] ss:$8 sps:$4 sm:$0xff]  }
0x20a0   :  { %v5399_v42 = vpop.eup %5398 }
0x20a1   :  { %v3791_v60 = vsub.f32 0.0, %v5399_v42 }
0x20a3   :  { %3795 = vrot.lane.b32.xlu0 %v3791_v60, %s5477_s10  ;;  %v5239_v60 = vld [vmem:[%s6875_s3 + $0x490] ss:$8 sps:$4 sm:$0xff]  }
0x20a4   :  { %v5401_v58 = vpop.eup %5400 }
0x20a5   :  { %v3792_v59 = vsub.f32 0.0, %v5401_v58 }
0x20a7   :  { %3797 = vrot.lane.b32.xlu1 %v3792_v59, %s5477_s10 }
0x2115   :  { %v3796_v49 = vpop.permute.xlu0 %3795 }
0x2116   :  { %v3801_v45 = vmul.f32 %v5395_v53, %v3796_v49  ;;  %v5233_v53 = vld [vmem:[%s6875_s3 + $0x4b0] ss:$8 sps:$4 sm:$0xff]  }
0x2118   :  { %3805 = vrot.lane.b32.xlu0 %v3801_v45, %s5477_s10 }
0x2119   :  { %v3798_v14 = vpop.permute.xlu1 %3797 }
0x211a   :  { %v3802_v3 = vmul.f32 %v5397_v38, %v3798_v14 }
0x211c   :  { %3807 = vrot.lane.b32.xlu1 %v3802_v3, %s5477_s10  ;;  %v3912_v3 = vld [vmem:[%s6875_s3 + $0x480] sm:$0x11] }
0x218a   :  { %v3806_v32 = vpop.permute.xlu0 %3805 }
0x218b   :  { %v3811_v7 = vadd.f32 %v5399_v42, %v3806_v32 }
0x218e   :  { %v3808_v21 = vpop.permute.xlu1 %3807 }
0x218f   :  { %v3812_v62 = vadd.f32 %v5401_v58, %v3808_v21 }
0x2191   :  { %v3813_v23 = vpack.c.bf16 %v3812_v62, %v3811_v7 }
0x2193   :  { %4797 = vmatmul.mubr.msk.bf16.vlgmr.msra.gmra.mxu0 %vm505_vm8, %v3813_v23 }
0x2194   :  { %4048 = vmatpush1.bf16.msra.mxu0 %v5218_v51  ;;  %4067 = vmatprep.mubr.bf16.mxu0 %v5476_v6  ;;  %v3914_v51 = vunpack.c.h.bf16 %v3912_v3 }
0x2195   :  { %4049 = vmatprep.subr.bf16.mxu0 %v5223_v1 }
0x2198   :  { %4050 = vmatpush1.bf16.msra.mxu0 %v5221_v57 }
0x2199   :  { %4256 = vmatprep.subr.bf16.mxu0 %v5232_v31 }
0x219b   :  { %4810 = vmatmul.mubr.msk.bf16.vlgmr.msra.gmra.mxu0 %vm67_vm0, %v3813_v23 }
0x219c   :  { %4077 = vmatprep.mubr.bf16.mxu0 %v5476_v6 }
0x2253   :  { %v3851_v41 = vpop.f32.mrf.mxu0 }
0x2254   :  { %v3860_v40 = vadd.f32 %v3851_v41, %v3677_v35 }
0x2255   :  { %v3853_v27 = vpop.f32.mrf.mxu0 }
0x2256   :  { %v4798_v39 = vmul.f32 -1.442695, %v3860_v40  ;;  %v3874_v46 = vadd.f32 %v3853_v27, %v3685_v48  ;;  %v4095_v27 = vrot.slane %v3914_v51, %v5609_v44 }
0x2257   :  { %v3855_v19 = vpop.f32.mrf.mxu0 }
0x2258   :  { %5402 = vpow2.f32 %v4798_v39  ;;  %v3861_v30 = vadd.f32 %v3855_v19, %v3679_v63 }
0x2259   :  { %v3857_v43 = vpop.f32.mrf.mxu0 }
0x225a   :  { %v4799_v22 = vmul.f32 -1.442695, %v3861_v30  ;;  %v3875_v15 = vadd.f32 %v3857_v43, %v3685_v48  ;;  %v5230_v48 = vld [vmem:[%s6875_s3 + $0x4c0] ss:$8 sps:$4 sm:$0xff]  }
0x225b   :  { %4257 = vmatpush1.bf16.msra.mxu0 %v5230_v48  ;;  %v4069_v47 = vpop.f32.mrf.mxu0 }
0x225c   :  { %5404 = vpow2.f32 %v4799_v22  ;;  %4258 = vmatprep.subr.bf16.mxu0 %v5235_v5 }
0x225d   :  { %v4071_v49 = vpop.f32.mrf.mxu0 }
0x225f   :  { %4259 = vmatpush1.bf16.msra.mxu0 %v5233_v53  ;;  %v4073_v45 = vpop.f32.mrf.mxu0 }
0x2260   :  { %4260 = vmatprep.subr.bf16.mxu0 %v5238_v12 }
0x2261   :  { %v4075_v14 = vpop.f32.mrf.mxu0 }
0x2263   :  { %4261 = vmatpush1.bf16.msra.mxu0 %v5236_v16 }
0x2264   :  { %4262 = vmatprep.subr.bf16.mxu0 %v5241_v28 }
0x2265   :  { %v5403_v18 = vpop.eup %5402 }
0x2266   :  { %v3868_v29 = vadd.f32 1.0, %v5403_v18 }
0x2267   :  { %4263 = vmatpush1.bf16.msra.mxu0 %v5239_v60 }
0x2268   :  { %5406 = vrcp.f32 %v3868_v29 }
0x2269   :  { %v5405_v56 = vpop.eup %5404 }
0x226a   :  { %v3869_v34 = vadd.f32 1.0, %v5405_v56 }
0x226c   :  { %5408 = vrcp.f32 %v3869_v34 }
0x2275   :  { %v5407_v50 = vpop.eup %5406 }
0x2276   :  { %v3876_v2 = vmul.f32 %v5407_v50, %v3874_v46 }
0x2278   :  { %v3878_v4 = vadd.f32 %v3876_v2, %v6666_v20  ;;  %v5226_v20 = vld [vmem:[%s6875_s3 + $0x474] ss:$8 sps:$4 sm:$0xff]  }
0x2279   :  { %v5409_v35 = vpop.eup %5408  ;;  %3969 = vmatprep.subr.bf16.mxu1 %v5226_v20 }
0x227a   :  { %5410 = vtanh.f32 %v3878_v4  ;;  %v3877_v10 = vmul.f32 %v5409_v35, %v3875_v15  ;;  %3970 = vmatpush1.bf16.msra.mxu1 %v5224_v52 }
0x227c   :  { %v3879_v33 = vadd.f32 %v3877_v10, %v6680_v26  ;;  %v5229_v26 = vld [vmem:[%s6875_s3 + $0x464] ss:$8 sps:$4 sm:$0xff]  }
0x227d   :  { %3971 = vmatprep.subr.bf16.mxu1 %v5229_v26 }
0x227e   :  { %5412 = vtanh.f32 %v3879_v33  ;;  %3972 = vmatpush1.bf16.msra.mxu1 %v5227_v0 }
0x227f   :  { %4165 = vmatprep.subr.bf16.mxu1 %v5232_v31 }
0x2287   :  { %v5411_v24 = vpop.eup %5410 }
0x2288   :  { %v3882_v63 = vsub.f32 %v3811_v7, %v5411_v24 }
0x228a   :  { %3886 = vrot.lane.b32.xlu0 %v3882_v63, %s5477_s10 }
0x228b   :  { %v5413_v36 = vpop.eup %5412 }
0x228c   :  { %v3883_v13 = vsub.f32 %v3812_v62, %v5413_v36  ;;  %v3913_v62 = vunpack.c.l.bf16 %v3912_v3 }
0x228e   :  { %3888 = vrot.lane.b32.xlu1 %v3883_v13, %s5477_s10  ;;  %v4091_v40 = vrot.slane %v3913_v62, %v5609_v44 }
0x22fc   :  { %v3887_v37 = vpop.permute.xlu0 %3886 }
0x22fd   :  { %v3892_v9 = vmul.f32 %v5407_v50, %v3887_v37 }
0x22ff   :  { %3896 = vrot.lane.b32.xlu0 %v3892_v9, %s5477_s10 }
0x2300   :  { %v3889_v8 = vpop.permute.xlu1 %3888 }
0x2301   :  { %v3893_v54 = vmul.f32 %v5409_v35, %v3889_v8 }
0x2303   :  { %3898 = vrot.lane.b32.xlu1 %v3893_v54, %s5477_s10 }
0x2307   :  { %3929 = vrot.lane.b32.xlu1 %v3813_v23, %s5478_s27 }
0x2371   :  { %v3897_v17 = vpop.permute.xlu0 %3896 }
0x2372   :  { %v3902_v61 = vadd.f32 %v5411_v24, %v3897_v17 }
0x2375   :  { %v3899_v11 = vpop.permute.xlu1 %3898 }
0x2376   :  { %v3903_v38 = vadd.f32 %v5413_v36, %v3899_v11 }
0x2378   :  { %v3924_v42 = vpack.c.bf16 %v3903_v38, %v3902_v61  ;;  %v3915_v61 = vld [vmem:[%s6875_s3 + $0x4d0] sm:$0x1] }
0x2379   :  { %v3930_v59 = vpop.permute.xlu1 %3929 }
0x237a   :  { %3927 = vrot.lane.b32.xlu0 %v3924_v42, %s5478_s27  ;;  %4811 = vmatmul.mubr.msk.bf16.gmra.mxu0 %vm67_vm0, %v3924_v42 }
0x237b   :  { %4280 = vmatprep.mubr.bf16.mxu0 %v5476_v6 }
0x23ec   :  { %v3928_v58 = vpop.permute.xlu0 %3927 }
0x23ed   :  { %4804 = vmatmul.mubr.msk.bf16.vlgmr.msra.gmra.mxu1 %vm67_vm0, %v3928_v58 }
0x23ee   :  { %4166 = vmatpush1.bf16.msra.mxu1 %v5230_v48  ;;  %3999 = vmatprep.mubr.bf16.mxu1 %v5476_v6 }
0x23ef   :  { %4167 = vmatprep.subr.bf16.mxu1 %v5235_v5 }
0x23f2   :  { %4168 = vmatpush1.bf16.msra.mxu1 %v5233_v53 }
0x23f3   :  { %4169 = vmatprep.subr.bf16.mxu1 %v5238_v12 }
0x23f5   :  { %4805 = vmatmul.mubr.msk.bf16.gmra.mxu1 %vm67_vm0, %v3930_v59 }
0x23f6   :  { %4170 = vmatpush1.bf16.msra.mxu1 %v5236_v16  ;;  %4189 = vmatprep.mubr.bf16.mxu1 %v5476_v6  ;;  %v4112_v16 = vunpack.c.l.bf16 %v3915_v61 }
0x23f7   :  { %4171 = vmatprep.subr.bf16.mxu1 %v5241_v28 }
0x23f8   :  { %v4116_v28 = vrot.slane %v4112_v16, %v5609_v44 }
0x23fa   :  { %4172 = vmatpush1.bf16.msra.mxu1 %v5239_v60 }
0x23fd   :  { %4190 = vmatmul.mubr.bf16.vlgmr.msra.gmra.mxu1 %v5476_v6 }
0x243a   :  { %v4079_v21 = vpop.f32.mrf.mxu0 }
0x243c   :  { %v4081_v1 = vpop.f32.mrf.mxu0 }
0x243e   :  { %v4083_v30 = vpop.f32.mrf.mxu0 }
0x2440   :  { %v4085_v35 = vpop.f32.mrf.mxu0 }
0x24ad   :  { %v3991_v32 = vpop.f32.mrf.mxu1 }
0x24ae   :  { %v4070_v41 = vadd.f32 %v4069_v47, %v3991_v32 }
0x24af   :  { %v3993_v7 = vpop.f32.mrf.mxu1 }
0x24b0   :  { %v4072_v6 = vadd.f32 %v4071_v49, %v3993_v7  ;;  %v6767_v18 = vadd.f32 %v4091_v40, %v4070_v41 }
0x24b1   :  { %v3995_v23 = vpop.f32.mrf.mxu1 }
0x24b2   :  { %v4074_v29 = vadd.f32 %v4073_v45, %v3995_v23  ;;  %v4097_v46 = vadd.f32 %v4095_v27, %v4072_v6 }
0x24b3   :  { %v3997_v57 = vpop.f32.mrf.mxu1 }
0x24b4   :  { %v4076_v43 = vadd.f32 %v4075_v14, %v3997_v57  ;;  %v6775_v33 = vadd.f32 %v4091_v40, %v4074_v29 }
0x24b5   :  { %v4001_v39 = vpop.f32.mrf.mxu1 }
0x24b6   :  { %v4080_v19 = vadd.f32 %v4079_v21, %v4001_v39  ;;  %v4099_v20 = vadd.f32 %v4095_v27, %v4076_v43 }
0x24b7   :  { %v4003_v22 = vpop.f32.mrf.mxu1 }
0x24b8   :  { %v6769_v56 = vadd.f32 %v4091_v40, %v4080_v19  ;;  %v4082_v34 = vadd.f32 %v4081_v1, %v4003_v22 }
0x24b9   :  { %v4005_v50 = vpop.f32.mrf.mxu1 }
0x24ba   :  { %v4101_v2 = vadd.f32 %v4095_v27, %v4082_v34  ;;  %v4084_v4 = vadd.f32 %v4083_v30, %v4005_v50  ;;  %v4108_v15 = vsel %vm5663_vm6, %v6769_v56, %v6767_v18  ;;  %v4104_v13 = vsel %vm5663_vm6, %v6767_v18, %v6769_v56 }
0x24bb   :  { %v4007_v10 = vpop.f32.mrf.mxu1 }
0x24bc   :  { %v6777_v24 = vadd.f32 %v4091_v40, %v4084_v4  ;;  %v4086_v63 = vadd.f32 %v4085_v35, %v4007_v10  ;;  %v6781_v36 = vsel %vm34_vm7, %v4101_v2, %v4097_v46  ;;  %v4105_v47 = vsel %vm34_vm7, %v4097_v46, %v4101_v2 }
0x24bd   :  { %v4191_v52 = vpop.f32.mrf.mxu1 }
0x24be   :  { %v4103_v26 = vadd.f32 %v4095_v27, %v4086_v63  ;;  %v4200_v37 = vadd.f32 %v4191_v52, %v4104_v13  ;;  %v4110_v9 = vsel %vm5663_vm6, %v6777_v24, %v6775_v33  ;;  %v4106_v31 = vsel %vm5663_vm6, %v6775_v33, %v6777_v24 }
0x24bf   :  { %v4193_v0 = vpop.f32.mrf.mxu1 }
0x24c0   :  { %v4820_v8 = vmul.f32 -1.442695, %v4200_v37  ;;  %v6793_v54 = vsel %vm34_vm7, %v4103_v26, %v4099_v20  ;;  %v4214_v42 = vadd.f32 %v4193_v0, %v4116_v28  ;;  %v4107_v32 = vsel %vm34_vm7, %v4099_v20, %v4103_v26  ;;  %v5242_v0 = vld [vmem:[%s6875_s3 + $0x540] ss:$8 sps:$4 sm:$0xff]  }
0x24c1   :  { %v4195_v48 = vpop.f32.mrf.mxu1  ;;  %5047 = vmatprep.subr.bf16.mxu0 %v5242_v0 }
0x24c2   :  { %5414 = vpow2.f32 %v4820_v8  ;;  %v4201_v5 = vadd.f32 %v4195_v48, %v4106_v31  ;;  %v5244_v8 = vld [vmem:[%s6875_s3 + $0x560] ss:$8 sps:$4 sm:$0xff]  }
0x24c3   :  { %v4197_v58 = vpop.f32.mrf.mxu1  ;;  %5039 = vmatprep.subr.bf16.mxu1 %v5244_v8 }
0x24c4   :  { %v4821_v53 = vmul.f32 -1.442695, %v4201_v5  ;;  %v4215_v45 = vadd.f32 %v4197_v58, %v4116_v28  ;;  %5040 = vmatpush3.bf16.msra.mxu1 %v5244_v8 }
0x24c6   :  { %5416 = vpow2.f32 %v4821_v53 }
0x24cf   :  { %v5415_v17 = vpop.eup %5414 }
0x24d0   :  { %v4208_v11 = vadd.f32 1.0, %v5415_v17 }
0x24d2   :  { %5418 = vrcp.f32 %v4208_v11 }
0x24d3   :  { %v5417_v12 = vpop.eup %5416 }
0x24d4   :  { %v4209_v38 = vadd.f32 1.0, %v5417_v12 }
0x24d6   :  { %5420 = vrcp.f32 %v4209_v38 }
0x24df   :  { %v5419_v60 = vpop.eup %5418 }
0x24e0   :  { %v4216_v59 = vmul.f32 %v5419_v60, %v4214_v42  ;;  %v5471_v42 = vld [vmem:[%s6874_s2] sm:$0xff] }
0x24e2   :  { %v4218_v49 = vadd.f32 %v4216_v59, %v4105_v47  ;;  %v4343_v59 = vld [vmem:[%s6875_s3 + $0x570] sm:$0x1] }
0x24e3   :  { %v5421_v14 = vpop.eup %5420 }
0x24e4   :  { %5422 = vtanh.f32 %v4218_v49  ;;  %v4217_v3 = vmul.f32 %v5421_v14, %v4215_v45  ;;  %v4344_v49 = vunpack.c.l.bf16 %v4343_v59 }
0x24e6   :  { %v4219_v21 = vadd.f32 %v4217_v3, %v4107_v32 }
0x24e8   :  { %5424 = vtanh.f32 %v4219_v21  ;;  %v4488_v21 = vrot.slane %v4344_v49, %v5609_v44  ;;  %v5472_v44 = vld [vmem:[%s6874_s2 + $0x8] sm:$0xff] }
0x24f1   :  { %v5423_v7 = vpop.eup %5422 }
0x24f2   :  { %v4222_v62 = vsub.f32 0.0, %v5423_v7 }
0x24f4   :  { %4226 = vrot.lane.b32.xlu0 %v4222_v62, %s5477_s10 }
0x24f5   :  { %v5425_v51 = vpop.eup %5424 }
0x24f6   :  { %v4223_v23 = vsub.f32 0.0, %v5425_v51 }
0x24f8   :  { %4228 = vrot.lane.b32.xlu1 %v4223_v23, %s5477_s10 }
0x2566   :  { %v4227_v1 = vpop.permute.xlu0 %4226 }
0x2567   :  { %v4232_v57 = vmul.f32 %v5419_v60, %v4227_v1 }
0x2569   :  { %4236 = vrot.lane.b32.xlu0 %v4232_v57, %s5477_s10 }
0x256a   :  { %v4229_v41 = vpop.permute.xlu1 %4228 }
0x256b   :  { %v4233_v40 = vmul.f32 %v5421_v14, %v4229_v41 }
0x256d   :  { %4238 = vrot.lane.b32.xlu1 %v4233_v40, %s5477_s10 }
0x25db   :  { %v4237_v25 = vpop.permute.xlu0 %4236 }
0x25dc   :  { %v4242_v27 = vadd.f32 %v5423_v7, %v4237_v25 }
0x25df   :  { %v4239_v6 = vpop.permute.xlu1 %4238 }
0x25e0   :  { %v4243_v39 = vadd.f32 %v5425_v51, %v4239_v6  ;;  %v5473_v6 = vld [vmem:[%s6874_s2 + $0x10] sm:$0xff] }
0x25e2   :  { %v4244_v19 = vpack.c.bf16 %v4243_v39, %v4242_v27 }
0x25e4   :  { %4822 = vmatmul.mubr.msk.bf16.vlgmr.msra.gmra.mxu0 %vm505_vm8, %v4244_v19 }
0x25e5   :  { %5051 = vmatprep.mubr.msk.bf16.mxu0 %vm67_vm0, %v4244_v19  ;;  %5048 = vmatpush3.bf16.msra.mxu0 %v5242_v0 }
0x26a4   :  { %v4282_v30 = vpop.f32.mrf.mxu0 }
0x26a5   :  { %v4291_v22 = vadd.f32 %v4282_v30, %v4108_v15 }
0x26a6   :  { %v4284_v29 = vpop.f32.mrf.mxu0 }
0x26a7   :  { %v4823_v34 = vmul.f32 -1.442695, %v4291_v22  ;;  %v4305_v33 = vadd.f32 %v4284_v29, %v4116_v28 }
0x26a8   :  { %v4286_v46 = vpop.f32.mrf.mxu0 }
0x26a9   :  { %5426 = vpow2.f32 %v4823_v34  ;;  %v4292_v50 = vadd.f32 %v4286_v46, %v4110_v9 }
0x26aa   :  { %v4288_v55 = vpop.f32.mrf.mxu0 }
0x26ab   :  { %v4824_v43 = vmul.f32 -1.442695, %v4292_v50  ;;  %v4306_v56 = vadd.f32 %v4288_v55, %v4116_v28 }
0x26ad   :  { %5428 = vpow2.f32 %v4824_v43 }
0x26b6   :  { %v5427_v2 = vpop.eup %5426 }
0x26b7   :  { %v4299_v4 = vadd.f32 1.0, %v5427_v2 }
0x26b9   :  { %5430 = vrcp.f32 %v4299_v4 }
0x26ba   :  { %v5429_v35 = vpop.eup %5428 }
0x26bb   :  { %v4300_v10 = vadd.f32 1.0, %v5429_v35 }
0x26bd   :  { %5432 = vrcp.f32 %v4300_v10 }
0x26c6   :  { %v5431_v24 = vpop.eup %5430 }
0x26c7   :  { %v4307_v63 = vmul.f32 %v5431_v24, %v4305_v33 }
0x26c9   :  { %v4309_v18 = vadd.f32 %v4307_v63, %v6781_v36  ;;  %v5243_v36 = vld [vmem:[%s6875_s3 + $0x530] ss:$8 sps:$4 sm:$0xff]  }
0x26ca   :  { %v5433_v15 = vpop.eup %5432  ;;  %5049 = vmatprep.subr.bf16.mxu0 %v5243_v36 }
0x26cb   :  { %5434 = vtanh.f32 %v4309_v18  ;;  %v4308_v13 = vmul.f32 %v5433_v15, %v4306_v56  ;;  %5050 = vmatpush3.bf16.msra.mxu0 %v5243_v36 }
0x26cd   :  { %v4310_v52 = vadd.f32 %v4308_v13, %v6793_v54  ;;  %v5245_v54 = vld [vmem:[%s6875_s3 + $0x550] ss:$8 sps:$4 sm:$0xff]  }
0x26ce   :  { %5041 = vmatprep.subr.bf16.mxu1 %v5245_v54 }
0x26cf   :  { %5436 = vtanh.f32 %v4310_v52  ;;  %5042 = vmatpush3.bf16.msra.mxu1 %v5245_v54 }
0x26d8   :  { %v5435_v20 = vpop.eup %5434 }
0x26d9   :  { %v4313_v26 = vsub.f32 %v4242_v27, %v5435_v20  ;;  %v5474_v27 = vld [vmem:[%s6874_s2 + $0x18] sm:$0xff] }
0x26db   :  { %4317 = vrot.lane.b32.xlu0 %v4313_v26, %s5477_s10 }
0x26dc   :  { %v5437_v37 = vpop.eup %5436 }
0x26dd   :  { %v4314_v9 = vsub.f32 %v4243_v39, %v5437_v37 }
0x26df   :  { %4319 = vrot.lane.b32.xlu1 %v4314_v9, %s5477_s10 }
0x274d   :  { %v4318_v31 = vpop.permute.xlu0 %4317 }
0x274e   :  { %v4323_v48 = vmul.f32 %v5431_v24, %v4318_v31 }
0x2750   :  { %4327 = vrot.lane.b32.xlu0 %v4323_v48, %s5477_s10 }
0x2751   :  { %v4320_v5 = vpop.permute.xlu1 %4319 }
0x2752   :  { %v4324_v53 = vmul.f32 %v5433_v15, %v4320_v5 }
0x2754   :  { %4329 = vrot.lane.b32.xlu1 %v4324_v53, %s5477_s10 }
0x2758   :  { %4350 = vrot.lane.b32.xlu1 %v4244_v19, %s5478_s27 }
0x27c2   :  { %v4328_v17 = vpop.permute.xlu0 %4327 }
0x27c3   :  { %v4333_v12 = vadd.f32 %v5435_v20, %v4328_v17 }
0x27c6   :  { %v4330_v11 = vpop.permute.xlu1 %4329 }
0x27c7   :  { %v4334_v61 = vadd.f32 %v5437_v37, %v4330_v11 }
0x27c9   :  { %v4345_v38 = vpack.c.bf16 %v4334_v61, %v4333_v12 }
0x27ca   :  { %v4351_v28 = vpop.permute.xlu1 %4350 }
0x27cb   :  { %4348 = vrot.lane.b32.xlu0 %v4345_v38, %s5478_s27  ;;  %5052 = vmatmul.mubr.msk.bf16.vlgmr.msra.gmra.mxu0 %vm67_vm0, %v4345_v38 }
0x283d   :  { %v4349_v16 = vpop.permute.xlu0 %4348 }
0x283e   :  { %5043 = vmatprep.mubr.msk.bf16.mxu1 %vm67_vm0, %v4349_v16 }
0x283f   :  { %5044 = vmatmul.mubr.msk.bf16.vlgmr.msra.gmra.mxu1 %vm67_vm0, %v4351_v28 }
0x2840   :  { %5063 = vmatprep.mubr.msk.f32.mxu1 %vm67_vm0, %v5471_v42 }
0x288b   :  { %v5053_v60 = vpop.f32.mrf.mxu0 }
0x288d   :  { %v4470_v58 = vpop.f32.mrf.mxu0 }
0x288f   :  { %v5054_v45 = vpop.f32.mrf.mxu0 }
0x2891   :  { %v4473_v62 = vpop.f32.mrf.mxu0 }
0x28ff   :  { %v5045_v47 = vpop.f32.mrf.mxu1 }
0x2900   :  { %v4479_v32 = vadd.f32 %v5053_v60, %v5045_v47 }
0x2901   :  { %v4404_v14 = vpop.f32.mrf.mxu1 }
0x2902   :  { %v4491_v57 = vadd.f32 %v4488_v21, %v4479_v32  ;;  %v4471_v41 = vadd.f32 %v4470_v58, %v4404_v14 }
0x2903   :  { %v5046_v3 = vpop.f32.mrf.mxu1 }
0x2904   :  { %v4482_v7 = vadd.f32 %v5054_v45, %v5046_v3  ;;  %v4489_v25 = vadd.f32 %v4488_v21, %v4471_v41 }
0x2905   :  { %v4407_v51 = vpop.f32.mrf.mxu1 }
0x2906   :  { %v4492_v23 = vadd.f32 %v4488_v21, %v4482_v7  ;;  %v4474_v1 = vadd.f32 %v4473_v62, %v4407_v51 }
0x2908   :  { %5055 = vmatprep.subr.mxu1 %v4492_v23  ;;  %v4490_v40 = vadd.f32 %v4488_v21, %v4474_v1 }
0x2909   :  { %5056 = vmatpush3.msra.mxu1 %v4492_v23 }
0x290a   :  { %5057 = vmatprep.subr.mxu1 %v4491_v57 }
0x290b   :  { %5058 = vmatpush3.msra.mxu1 %v4491_v57 }
0x290c   :  { %5059 = vmatprep.subr.mxu1 %v4490_v40 }
0x290d   :  { %5060 = vmatpush3.msra.mxu1 %v4490_v40 }
0x290e   :  { %5061 = vmatprep.subr.mxu1 %v4489_v25 }
0x290f   :  { %5062 = vmatpush3.msra.mxu1 %v4489_v25 }
0x2910   :  { %5064 = vmatmul.mubr.msk.f32.vlgmr.msra.gmra.mxu1 %vm67_vm0, %v5472_v44 }
0x2911   :  { %5066 = vmatprep.mubr.msk.f32.mxu1 %vm67_vm0, %v5473_v6 }
0x2914   :  { %5067 = vmatmul.mubr.msk.f32.gmra.mxu1 %vm67_vm0, %v5474_v27 }
0x29d0   :  { %v5065_v39 = vpop.f32.mrf.mxu1 }
0x29d1   :  { %v4838_v19 = vmul.f32 -1.442695, %v5065_v39 }
0x29d2   :  { %v4559_v30 = vpop.f32.mrf.mxu1 }
0x29d3   :  { %5438 = vpow2.f32 %v4838_v19  ;;  %v4837_v22 = vmul.f32 -1.442695, %v4559_v30 }
0x29d4   :  { %v5068_v29 = vpop.f32.mrf.mxu1 }
0x29d5   :  { %5440 = vpow2.f32 %v4837_v22  ;;  %v4840_v34 = vmul.f32 -1.442695, %v5068_v29 }
0x29d6   :  { %v4569_v46 = vpop.f32.mrf.mxu1 }
0x29d7   :  { %5442 = vpow2.f32 %v4840_v34  ;;  %v4839_v50 = vmul.f32 -1.442695, %v4569_v46 }
0x29d9   :  { %5444 = vpow2.f32 %v4839_v50 }
0x29e0   :  { %v5439_v43 = vpop.eup %5438 }
0x29e1   :  { %v4591_v2 = vadd.f32 1.0, %v5439_v43 }
0x29e2   :  { %v5441_v4 = vpop.eup %5440 }
0x29e3   :  { %5446 = vrcp.f32 %v4591_v2  ;;  %v4590_v35 = vadd.f32 1.0, %v5441_v4 }
0x29e4   :  { %v5443_v10 = vpop.eup %5442 }
0x29e5   :  { %5448 = vrcp.f32 %v4590_v35  ;;  %v4593_v33 = vadd.f32 1.0, %v5443_v10 }
0x29e6   :  { %v5445_v24 = vpop.eup %5444 }
0x29e7   :  { %5450 = vrcp.f32 %v4593_v33  ;;  %v4592_v55 = vadd.f32 1.0, %v5445_v24 }
0x29e9   :  { %5452 = vrcp.f32 %v4592_v55 }
0x29f0   :  { %v5447_v63 = vpop.eup %5446 }
0x29f1   :  { %4604 = vst.msk [vmem:[%s6877_s4 + $0x8] sm:$0xff] %vm4602_vm10, %v5447_v63 }
0x29f2   :  { %v5449_v18 = vpop.eup %5448 }
0x29f3   :  { %4603 = vst.msk [vmem:[%s6877_s4] sm:$0xff] %vm4602_vm10, %v5449_v18 }
0x29f4   :  { %v5451_v56 = vpop.eup %5450 }
0x29f5   :  { %4606 = vst.msk [vmem:[%s6877_s4 + $0x18] sm:$0xff] %vm4602_vm10, %v5451_v56 }
0x29f6   :  { %v5453_v15 = vpop.eup %5452 }
0x29f7   :  { %4605 = vst.msk [vmem:[%s6877_s4 + $0x10] sm:$0xff] %vm4602_vm10, %v5453_v15 }

</bundles_post_ra>
